<compile_context>
chip_gen: v7x
topology: tpu7x:2x2x1
jax: 0.10.0
libtpu: 0.0.40
codegen_flags: <defaults>
</compile_context>

<pallas_src>
import functools
import math

import jax
import jax.numpy as jnp
from jax.experimental import pallas as pl
from jax.experimental.pallas import tpu as pltpu

# MXU-operand / inter-kernel activation dtype. Accumulation, softmax and
# LayerNorm statistics always stay f32.
MXU_DTYPE = jnp.bfloat16
MXU_ITEMSIZE = 2 if MXU_DTYPE == jnp.bfloat16 else 4
LN_EPS = 1e-5


# ----------------------------- shared math -----------------------------------

def _layernorm(y, gamma, beta):
    """LayerNorm over the last dim; y/gamma/beta are f32 values."""
    mu = jnp.mean(y, axis=-1, keepdims=True)
    yc = y - mu
    var = jnp.mean(yc * yc, axis=-1, keepdims=True)
    return yc * jax.lax.rsqrt(var + LN_EPS) * gamma + beta


# ----------------------------- Pallas kernels --------------------------------

def _attn_block_kernel(tgt_ref, mem_ref, wq_ref, bq_ref, wkv_ref, bkv_ref,
                       wo_ref, bo_ref, g1_ref, be1_ref, o_ref, *, nhead):
    """Fused q/kv in-proj + multi-head attention + out-proj + add&LayerNorm1.

    One grid step = one (batch, L-tile). All intermediates stay in VMEM/vregs.
    """
    x = tgt_ref[0]                                   # (TL, E) bf16
    m = mem_ref[0]                                   # (S, E)  bf16
    TL, E = x.shape
    H = nhead
    Dh = E // H

    # q projection (1/sqrt(Dh) pre-folded into wq/bq) and fused k/v projection.
    q = jnp.dot(x, wq_ref[...], preferred_element_type=jnp.float32) + bq_ref[...]
    kv = jnp.dot(m, wkv_ref[...], preferred_element_type=jnp.float32) + bkv_ref[...]
    wo = wo_ref[...]                                 # (E, E) bf16

    # Per-head attention with out-proj ACCUMULATION: no ctx concat, the live
    # set per head is one (TL,S) score tile + one (TL,Dh) ctx tile.
    attn = jnp.zeros((TL, E), jnp.float32)
    for h in range(H):
        lo = h * Dh
        qh = q[:, lo:lo + Dh].astype(MXU_DTYPE)                    # (TL, Dh)
        kh = kv[:, lo:lo + Dh].astype(MXU_DTYPE)                   # (S, Dh)
        vh = kv[:, E + lo:E + lo + Dh].astype(MXU_DTYPE)           # (S, Dh)
        s = jax.lax.dot_general(qh, kh, (((1,), (1,)), ((), ())),
                                preferred_element_type=jnp.float32)  # (TL, S)
        s_max = jnp.max(s, axis=-1, keepdims=True)
        p = jnp.exp(s - s_max)
        denom = jnp.sum(p, axis=-1, keepdims=True)
        ctx = jnp.dot(p.astype(MXU_DTYPE), vh,
                      preferred_element_type=jnp.float32)          # (TL, Dh)
        # Softmax normalization AFTER the PV matmul (scales TL*Dh, not TL*S).
        ctx = ctx * pl.reciprocal(denom, approx=True)
        attn = attn + jnp.dot(ctx.astype(MXU_DTYPE), wo[lo:lo + Dh, :],
                              preferred_element_type=jnp.float32)  # (TL, E)
    attn = attn + bo_ref[...]

    # residual + post-LayerNorm1 (stats in f32), PyTorch eps=1e-5.
    y = x.astype(jnp.float32) + attn
    o_ref[0] = _layernorm(y, g1_ref[...], be1_ref[...]).astype(o_ref.dtype)


def _ffn_resident_kernel(*refs, has_final_ln):
    """FFN with both weights resident in VMEM: linear1+ReLU+linear2+res+LN2
    (+ optional final decoder LayerNorm)."""
    if has_final_ln:
        (x_ref, w1_ref, b1_ref, w2_ref, b2_ref, g2_ref, be2_ref,
         gf_ref, bf_ref, o_ref) = refs
    else:
        x_ref, w1_ref, b1_ref, w2_ref, b2_ref, g2_ref, be2_ref, o_ref = refs

    x = x_ref[...]                                   # (TM, E) bf16
    h = jnp.dot(x, w1_ref[...], preferred_element_type=jnp.float32)
    h = jnp.maximum(h + b1_ref[...], 0.0)            # (TM, Hd)
    y2 = jnp.dot(h.astype(MXU_DTYPE), w2_ref[...],
                 preferred_element_type=jnp.float32) + b2_ref[...]
    y = x.astype(jnp.float32) + y2
    y = _layernorm(y, g2_ref[...], be2_ref[...])
    if has_final_ln:
        y = _layernorm(y, gf_ref[...], bf_ref[...])
    o_ref[...] = y.astype(o_ref.dtype)


def _ffn_tiled_kernel(*refs, has_final_ln):
    """FFN with the 2048-wide hidden dim streamed in tiles and reduced into an
    f32 VMEM accumulator; residual + LN2 (+ optional final LN) at finalize."""
    if has_final_ln:
        (x_ref, w1_ref, b1_ref, w2_ref, b2_ref, g2_ref, be2_ref,
         gf_ref, bf_ref, o_ref, acc_ref) = refs
    else:
        (x_ref, w1_ref, b1_ref, w2_ref, b2_ref, g2_ref, be2_ref,
         o_ref, acc_ref) = refs
    j = pl.program_id(1)

    @pl.when(j == 0)
    def _():
        acc_ref[...] = jnp.zeros_like(acc_ref)

    h = jnp.dot(x_ref[...], w1_ref[...], preferred_element_type=jnp.float32)
    h = jnp.maximum(h + b1_ref[...], 0.0)                          # (TM, TH)
    acc_ref[...] += jnp.dot(h.astype(MXU_DTYPE), w2_ref[...],
                            preferred_element_type=jnp.float32)    # (TM, E)

    @pl.when(j == pl.num_programs(1) - 1)
    def _():
        y = x_ref[...].astype(jnp.float32) + acc_ref[...] + b2_ref[...]
        y = _layernorm(y, g2_ref[...], be2_ref[...])
        if has_final_ln:
            y = _layernorm(y, gf_ref[...], bf_ref[...])
        o_ref[...] = y.astype(o_ref.dtype)


# ----------------------------- tiling helpers --------------------------------

def _l_tile(L):
    """Target-length tile: multiple of 8 dividing L (<=256), else full L."""
    if L % 8 != 0:
        return L
    tl = min(256, L)
    while L % tl != 0:
        tl -= 8
    return tl


def _row_tile(T):
    """Row tile for the FFN: multiple of 8 dividing T; prefer >=2 tiles."""
    if T % 8 != 0:
        return T
    tm = min(256, T)
    while T % tm != 0:
        tm -= 8
    if tm == T and T >= 16 and (T // 2) % 8 == 0:
        tm = T // 2
    return tm


def _hidden_tile(Hd):
    """FFN hidden tile for the tiled path: multiple of 128 dividing Hd."""
    if Hd % 128 != 0:
        return Hd
    th = min(512, Hd)
    while Hd % th != 0:
        th -= 128
    return th


def _mosaic_params(dimension_semantics, est_bytes):
    """Explicit VMEM ceiling: above the 16 MiB (v5e) / 32 MiB (v6e, v7x)
    scoped defaults, below v7x's 64 MiB physical VMEM."""
    limit = int(min(max(2 * est_bytes + (4 << 20), 32 << 20), 48 << 20))
    return pltpu.CompilerParams(dimension_semantics=dimension_semantics,
                                vmem_limit_bytes=limit)


# ----------------------------- pallas_call wrappers ---------------------------

def pallas_attention_block(tgt_nle, mem_nse, p, nhead):
    N, L, E = tgt_nle.shape
    S = mem_nse.shape[1]
    TL = _l_tile(L)
    est = (4 * E * E * MXU_ITEMSIZE                        # resident wq/wkv/wo
           + 2 * (TL * E + S * E + TL * E) * MXU_ITEMSIZE  # dbl-buffered blocks
           + (TL * E + 2 * S * E + TL * S + TL * E) * 4)   # f32 intermediates
    kernel = functools.partial(_attn_block_kernel, nhead=nhead)
    return pl.pallas_call(
        kernel,
        out_shape=jax.ShapeDtypeStruct((N, L, E), MXU_DTYPE),
        grid=(N, L // TL),
        in_specs=[
            pl.BlockSpec((1, TL, E), lambda b, l: (b, l, 0)),   # tgt L-tile
            pl.BlockSpec((1, S, E), lambda b, l: (b, 0, 0)),    # memory (per b)
            pl.BlockSpec((E, E), lambda b, l: (0, 0)),          # wq (scale folded)
            pl.BlockSpec((1, E), lambda b, l: (0, 0)),          # bq
            pl.BlockSpec((E, 2 * E), lambda b, l: (0, 0)),      # wkv (fused k/v)
            pl.BlockSpec((1, 2 * E), lambda b, l: (0, 0)),      # bkv
            pl.BlockSpec((E, E), lambda b, l: (0, 0)),          # wo
            pl.BlockSpec((1, E), lambda b, l: (0, 0)),          # bo
            pl.BlockSpec((1, E), lambda b, l: (0, 0)),          # ln1 gamma
            pl.BlockSpec((1, E), lambda b, l: (0, 0)),          # ln1 beta
        ],
        out_specs=pl.BlockSpec((1, TL, E), lambda b, l: (b, l, 0)),
        compiler_params=_mosaic_params(("parallel", "parallel"), est),
    )(tgt_nle, mem_nse, p["wq"], p["bq"], p["wkv"], p["bkv"],
      p["wo"], p["bo"], p["g1"], p["be1"])


def pallas_ffn_block(x2d, p, final_ln=None, out_dtype=None):
    T, E = x2d.shape
    Hd = p["w_ff1"].shape[1]
    out_dtype = out_dtype if out_dtype is not None else x2d.dtype
    TM = _row_tile(T)
    has_final = final_ln is not None
    weight_bytes = 2 * E * Hd * MXU_ITEMSIZE

    # Resident-weight path: both FFN weights live in VMEM, one clean
    # matmul->ReLU->matmul->res->LN chain per row tile (no accumulator RMW).
    if weight_bytes <= (8 << 20):
        kernel = functools.partial(_ffn_resident_kernel, has_final_ln=has_final)
        in_specs = [
            pl.BlockSpec((TM, E), lambda i: (i, 0)),        # x (also residual)
            pl.BlockSpec((E, Hd), lambda i: (0, 0)),        # w_ff1 (resident)
            pl.BlockSpec((1, Hd), lambda i: (0, 0)),        # b_ff1
            pl.BlockSpec((Hd, E), lambda i: (0, 0)),        # w_ff2 (resident)
            pl.BlockSpec((1, E), lambda i: (0, 0)),         # b_ff2
            pl.BlockSpec((1, E), lambda i: (0, 0)),         # ln2 gamma
            pl.BlockSpec((1, E), lambda i: (0, 0)),         # ln2 beta
        ]
        args = [x2d, p["w_ff1"], p["b_ff1"], p["w_ff2"], p["b_ff2"],
                p["g2"], p["be2"]]
        if has_final:
            in_specs += [pl.BlockSpec((1, E), lambda i: (0, 0)),
                         pl.BlockSpec((1, E), lambda i: (0, 0))]
            args += [final_ln[0], final_ln[1]]
        est = (weight_bytes + 4 * TM * E * MXU_ITEMSIZE
               + TM * Hd * 4 + 2 * TM * E * 4)
        return pl.pallas_call(
            kernel,
            out_shape=jax.ShapeDtypeStruct((T, E), out_dtype),
            grid=(T // TM,),
            in_specs=in_specs,
            out_specs=pl.BlockSpec((TM, E), lambda i: (i, 0)),
            compiler_params=_mosaic_params(("parallel",), est),
        )(*args)

    # Tiled path (large E, e.g. v7x 64 MiB VMEM): stream the hidden dim in TH
    # tiles and reduce into an f32 VMEM accumulator (pl.when init/finalize).
    TH = _hidden_tile(Hd)
    kernel = functools.partial(_ffn_tiled_kernel, has_final_ln=has_final)
    in_specs = [
        pl.BlockSpec((TM, E), lambda i, j: (i, 0)),
        pl.BlockSpec((E, TH), lambda i, j: (0, j)),
        pl.BlockSpec((1, TH), lambda i, j: (0, j)),
        pl.BlockSpec((TH, E), lambda i, j: (j, 0)),
        pl.BlockSpec((1, E), lambda i, j: (0, 0)),
        pl.BlockSpec((1, E), lambda i, j: (0, 0)),
        pl.BlockSpec((1, E), lambda i, j: (0, 0)),
    ]
    args = [x2d, p["w_ff1"], p["b_ff1"], p["w_ff2"], p["b_ff2"],
            p["g2"], p["be2"]]
    if has_final:
        in_specs += [pl.BlockSpec((1, E), lambda i, j: (0, 0)),
                     pl.BlockSpec((1, E), lambda i, j: (0, 0))]
        args += [final_ln[0], final_ln[1]]
    est = (4 * (E * TH + TH * E) * MXU_ITEMSIZE
           + 4 * TM * E * MXU_ITEMSIZE + TM * TH * 4 + 2 * TM * E * 4)
    return pl.pallas_call(
        kernel,
        out_shape=jax.ShapeDtypeStruct((T, E), out_dtype),
        grid=(T // TM, Hd // TH),
        in_specs=in_specs,
        out_specs=pl.BlockSpec((TM, E), lambda i, j: (i, 0)),
        scratch_shapes=[pltpu.VMEM((TM, E), jnp.float32)],
        compiler_params=_mosaic_params(("parallel", "arbitrary"), est),
    )(*args)


# ----------------------------- model forward --------------------------------

def decoder_layer_forward(x_nle, mem_nse, p, nhead, final_ln=None,
                          out_dtype=None):
    N, L, E = x_nle.shape
    x = pallas_attention_block(x_nle, mem_nse, p, nhead)        # (N, L, E) bf16
    x = pallas_ffn_block(x.reshape(N * L, E), p, final_ln=final_ln,
                         out_dtype=out_dtype)                   # (N*L, E)
    return x.reshape(N, L, E)


def transformer_decoder_forward(tgt, memory, params, nhead):
    # tgt: (L, N, E), memory: (S, N, E) -- PyTorch (batch_first=False) layout.
    # Batch axis moved in front once; inter-kernel activation stream is bf16.
    x = jnp.transpose(tgt, (1, 0, 2)).astype(MXU_DTYPE)         # (N, L, E)
    mem = jnp.transpose(memory, (1, 0, 2)).astype(MXU_DTYPE)    # (N, S, E)
    n_layers = len(params["layers"])
    for i, layer_p in enumerate(params["layers"]):
        last = (i == n_layers - 1)
        x = decoder_layer_forward(
            x, mem, layer_p, nhead,
            final_ln=(params["g_final"], params["b_final"]) if last else None,
            out_dtype=jnp.float32 if last else MXU_DTYPE)
    return jnp.transpose(x, (1, 0, 2))                          # (L, N, E)


# ----------------------------- parameters ------------------------------------

def init_params(key, num_layers, d_model, dim_ff=2048):
    """Raw f32 parameters, stored (in, out) so kernels compute x @ W."""
    def w(k, shape, s=0.02):
        return jax.random.normal(k, shape, jnp.float32) * s

    layers = []
    for _ in range(num_layers):
        key, *ks = jax.random.split(key, 13)
        layers.append(dict(
            wq=w(ks[0], (d_model, d_model)), bq=w(ks[1], (d_model,)),
            wk=w(ks[2], (d_model, d_model)), bk=w(ks[3], (d_model,)),
            wv=w(ks[4], (d_model, d_model)), bv=w(ks[5], (d_model,)),
            wo=w(ks[6], (d_model, d_model)), bo=w(ks[7], (d_model,)),
            g1=jnp.ones((d_model,), jnp.float32),
            be1=jnp.zeros((d_model,), jnp.float32),
            g2=jnp.ones((d_model,), jnp.float32),
            be2=jnp.zeros((d_model,), jnp.float32),
            w_ff1=w(ks[8], (d_model, dim_ff)), b_ff1=w(ks[9], (dim_ff,)),
            w_ff2=w(ks[10], (dim_ff, d_model)), b_ff2=w(ks[11], (d_model,)),
        ))
    return dict(
        layers=layers,
        g_final=jnp.ones((d_model,), jnp.float32),
        b_final=jnp.zeros((d_model,), jnp.float32),
    )


def prepare_params(raw, d_model, nhead):
    """Kernel-ready params: fold 1/sqrt(Dh) into the q projection, fuse k/v
    weights, cast matmul weights to the MXU dtype, reshape biases/LN to rows."""
    Dh = d_model // nhead
    scale = 1.0 / math.sqrt(Dh)

    def prep_layer(p):
        return dict(
            wq=(p["wq"] * scale).astype(MXU_DTYPE),
            bq=(p["bq"] * scale).reshape(1, d_model),
            wkv=jnp.concatenate([p["wk"], p["wv"]], axis=1).astype(MXU_DTYPE),
            bkv=jnp.concatenate([p["bk"], p["bv"]]).reshape(1, 2 * d_model),
            wo=p["wo"].astype(MXU_DTYPE), bo=p["bo"].reshape(1, d_model),
            g1=p["g1"].reshape(1, d_model), be1=p["be1"].reshape(1, d_model),
            w_ff1=p["w_ff1"].astype(MXU_DTYPE),
            b_ff1=p["b_ff1"].reshape(1, -1),
            w_ff2=p["w_ff2"].astype(MXU_DTYPE),
            b_ff2=p["b_ff2"].reshape(1, d_model),
            g2=p["g2"].reshape(1, d_model), be2=p["be2"].reshape(1, d_model),
        )

    return dict(
        layers=[prep_layer(p) for p in raw["layers"]],
        g_final=raw["g_final"].reshape(1, d_model),
        b_final=raw["b_final"].reshape(1, d_model),
    )


# ----------------------------- main ------------------------------------------

if __name__ == "__main__":
    num_layers = 2
    d_model = 32
    nhead = 4
    L, S, N = 8, 10, 2   # tgt len, memory len, batch

    key = jax.random.PRNGKey(0)
    k_tgt, k_mem, k_par = jax.random.split(key, 3)

    tgt = jax.random.normal(k_tgt, (L, N, d_model), jnp.float32)
    memory = jax.random.normal(k_mem, (S, N, d_model), jnp.float32)

    raw_params = init_params(k_par, num_layers, d_model)
    params = prepare_params(raw_params, d_model, nhead)

    # TODO(synk): dropout layers are identity (eval/inference semantics);
    # attention masks (tgt_mask / key_padding_mask) not used by the reference.
    fwd = jax.jit(lambda t, m, p: transformer_decoder_forward(t, m, p, nhead))
    out = fwd(tgt, memory, params)
    out = jax.block_until_ready(out)

    assert out.shape == (L, N, d_model)
    assert bool(jnp.all(jnp.isfinite(out)))
    print("KERNEL_OK")
</pallas_src>

<mosaic_0001>
module attributes {stable_mosaic.version = 11 : i64} {
  func.func @_attn_block_kernel(%arg0: i32, %arg1: i32, %arg2: memref<1x8x32xbf16, #tpu.memory_space<vmem>>, %arg3: memref<1x10x32xbf16, #tpu.memory_space<vmem>>, %arg4: memref<32x32xbf16, #tpu.memory_space<vmem>>, %arg5: memref<1x32xf32, #tpu.memory_space<vmem>>, %arg6: memref<32x64xbf16, #tpu.memory_space<vmem>>, %arg7: memref<1x64xf32, #tpu.memory_space<vmem>>, %arg8: memref<32x32xbf16, #tpu.memory_space<vmem>>, %arg9: memref<1x32xf32, #tpu.memory_space<vmem>>, %arg10: memref<1x32xf32, #tpu.memory_space<vmem>>, %arg11: memref<1x32xf32, #tpu.memory_space<vmem>>, %arg12: memref<1x8x32xbf16, #tpu.memory_space<vmem>>) attributes {dimension_semantics = [#tpu.dimension_semantics<parallel>, #tpu.dimension_semantics<parallel>], iteration_bounds = array<i64: 2, 1>, scalar_prefetch = 0 : i64, scratch_operands = 0 : i64, tpu.core_type = #tpu.core_type<tc>, window_params = [{transform_indices = @transform_0, window_bounds = array<i64: 1, 8, 32>}, {transform_indices = @transform_1, window_bounds = array<i64: 1, 10, 32>}, {pipeline_mode = #tpu.pipeline_mode<synchronous>, transform_indices = @transform_2, window_bounds = array<i64: 32, 32>}, {pipeline_mode = #tpu.pipeline_mode<synchronous>, transform_indices = @transform_3, window_bounds = array<i64: 1, 32>}, {pipeline_mode = #tpu.pipeline_mode<synchronous>, transform_indices = @transform_4, window_bounds = array<i64: 32, 64>}, {pipeline_mode = #tpu.pipeline_mode<synchronous>, transform_indices = @transform_5, window_bounds = array<i64: 1, 64>}, {pipeline_mode = #tpu.pipeline_mode<synchronous>, transform_indices = @transform_6, window_bounds = array<i64: 32, 32>}, {pipeline_mode = #tpu.pipeline_mode<synchronous>, transform_indices = @transform_7, window_bounds = array<i64: 1, 32>}, {pipeline_mode = #tpu.pipeline_mode<synchronous>, transform_indices = @transform_8, window_bounds = array<i64: 1, 32>}, {pipeline_mode = #tpu.pipeline_mode<synchronous>, transform_indices = @transform_9, window_bounds = array<i64: 1, 32>}, {transform_indices = @transform_10, window_bounds = array<i64: 1, 8, 32>}]} {
    %c0 = arith.constant 0 : index
    %c0_0 = arith.constant 0 : index
    %c0_1 = arith.constant 0 : index
    %0 = vector.load %arg2[%c0, %c0_0, %c0_1] : memref<1x8x32xbf16, #tpu.memory_space<vmem>>, vector<1x8x32xbf16>
    %1 = vector.shape_cast %0 : vector<1x8x32xbf16> to vector<8x32xbf16>
    %c0_2 = arith.constant 0 : index
    %c0_3 = arith.constant 0 : index
    %c0_4 = arith.constant 0 : index
    %2 = vector.load %arg3[%c0_2, %c0_3, %c0_4] : memref<1x10x32xbf16, #tpu.memory_space<vmem>>, vector<1x10x32xbf16>
    %3 = vector.shape_cast %2 : vector<1x10x32xbf16> to vector<10x32xbf16>
    %c0_5 = arith.constant 0 : index
    %c0_6 = arith.constant 0 : index
    %4 = vector.load %arg4[%c0_5, %c0_6] : memref<32x32xbf16, #tpu.memory_space<vmem>>, vector<32x32xbf16>
    %cst = arith.constant dense<0.000000e+00> : vector<8x32xf32>
    %5 = tpu.matmul %1, %4, %cst {dimension_numbers = #tpu.dot_dimension_numbers<[1], [0], [0], [1], [0, 0, 1, 1], [], []>} : vector<8x32xbf16>, vector<32x32xbf16>, vector<8x32xf32> -> vector<8x32xf32>
    %c0_7 = arith.constant 0 : index
    %c0_8 = arith.constant 0 : index
    %6 = vector.load %arg5[%c0_7, %c0_8] : memref<1x32xf32, #tpu.memory_space<vmem>>, vector<1x32xf32>
    %7 = vector.broadcast %6 : vector<1x32xf32> to vector<8x32xf32>
    %8 = arith.addf %5, %7 : vector<8x32xf32>
    %c0_9 = arith.constant 0 : index
    %c0_10 = arith.constant 0 : index
    %9 = vector.load %arg6[%c0_9, %c0_10] : memref<32x64xbf16, #tpu.memory_space<vmem>>, vector<32x64xbf16>
    %cst_11 = arith.constant dense<0.000000e+00> : vector<10x64xf32>
    %10 = tpu.matmul %3, %9, %cst_11 {dimension_numbers = #tpu.dot_dimension_numbers<[1], [0], [0], [1], [0, 0, 1, 1], [], []>} : vector<10x32xbf16>, vector<32x64xbf16>, vector<10x64xf32> -> vector<10x64xf32>
    %c0_12 = arith.constant 0 : index
    %c0_13 = arith.constant 0 : index
    %11 = vector.load %arg7[%c0_12, %c0_13] : memref<1x64xf32, #tpu.memory_space<vmem>>, vector<1x64xf32>
    %12 = vector.broadcast %11 : vector<1x64xf32> to vector<10x64xf32>
    %13 = arith.addf %10, %12 : vector<10x64xf32>
    %c0_14 = arith.constant 0 : index
    %c0_15 = arith.constant 0 : index
    %14 = vector.load %arg8[%c0_14, %c0_15] : memref<32x32xbf16, #tpu.memory_space<vmem>>, vector<32x32xbf16>
    %cst_16 = arith.constant 0.000000e+00 : f32
    %15 = vector.broadcast %cst_16 : f32 to vector<8x32xf32>
    %16 = vector.extract_strided_slice %8 {offsets = [0, 0], sizes = [8, 8], strides = [1, 1]} : vector<8x32xf32> to vector<8x8xf32>
    %17 = arith.truncf %16 : vector<8x8xf32> to vector<8x8xbf16>
    %18 = vector.extract_strided_slice %13 {offsets = [0, 0], sizes = [10, 8], strides = [1, 1]} : vector<10x64xf32> to vector<10x8xf32>
    %19 = arith.truncf %18 : vector<10x8xf32> to vector<10x8xbf16>
    %20 = vector.extract_strided_slice %13 {offsets = [0, 32], sizes = [10, 8], strides = [1, 1]} : vector<10x64xf32> to vector<10x8xf32>
    %21 = arith.truncf %20 : vector<10x8xf32> to vector<10x8xbf16>
    %cst_17 = arith.constant dense<0.000000e+00> : vector<8x10xf32>
    %22 = tpu.matmul %17, %19, %cst_17 {dimension_numbers = #tpu.dot_dimension_numbers<[1], [1], [0], [0], [0, 0, 1, 0], [], []>} : vector<8x8xbf16>, vector<10x8xbf16>, vector<8x10xf32> -> vector<8x10xf32>
    %cst_18 = arith.constant dense<0xFF800000> : vector<8xf32>
    %23 = vector.multi_reduction <maximumf>, %22, %cst_18 [1] : vector<8x10xf32> to vector<8xf32>
    %24 = vector.shape_cast %23 : vector<8xf32> to vector<8x1xf32>
    %25 = vector.broadcast %24 : vector<8x1xf32> to vector<8x10xf32>
    %26 = arith.subf %22, %25 : vector<8x10xf32>
    %27 = math.exp %26 : vector<8x10xf32>
    %cst_19 = arith.constant dense<0.000000e+00> : vector<8xf32>
    %28 = vector.multi_reduction <add>, %27, %cst_19 [1] : vector<8x10xf32> to vector<8xf32>
    %29 = vector.shape_cast %28 : vector<8xf32> to vector<8x1xf32>
    %30 = arith.truncf %27 : vector<8x10xf32> to vector<8x10xbf16>
    %cst_20 = arith.constant dense<0.000000e+00> : vector<8x8xf32>
    %31 = tpu.matmul %30, %21, %cst_20 {dimension_numbers = #tpu.dot_dimension_numbers<[1], [0], [0], [1], [0, 0, 1, 1], [], []>} : vector<8x10xbf16>, vector<10x8xbf16>, vector<8x8xf32> -> vector<8x8xf32>
    %32 = tpu.reciprocal %29 {approx = true} : vector<8x1xf32> -> vector<8x1xf32>
    %33 = vector.broadcast %32 : vector<8x1xf32> to vector<8x8xf32>
    %34 = arith.mulf %31, %33 : vector<8x8xf32>
    %35 = arith.truncf %34 : vector<8x8xf32> to vector<8x8xbf16>
    %36 = vector.extract_strided_slice %14 {offsets = [0, 0], sizes = [8, 32], strides = [1, 1]} : vector<32x32xbf16> to vector<8x32xbf16>
    %cst_21 = arith.constant dense<0.000000e+00> : vector<8x32xf32>
    %37 = tpu.matmul %35, %36, %cst_21 {dimension_numbers = #tpu.dot_dimension_numbers<[1], [0], [0], [1], [0, 0, 1, 1], [], []>} : vector<8x8xbf16>, vector<8x32xbf16>, vector<8x32xf32> -> vector<8x32xf32>
    %38 = arith.addf %15, %37 : vector<8x32xf32>
    %39 = vector.extract_strided_slice %8 {offsets = [0, 8], sizes = [8, 8], strides = [1, 1]} : vector<8x32xf32> to vector<8x8xf32>
    %40 = arith.truncf %39 : vector<8x8xf32> to vector<8x8xbf16>
    %41 = vector.extract_strided_slice %13 {offsets = [0, 8], sizes = [10, 8], strides = [1, 1]} : vector<10x64xf32> to vector<10x8xf32>
    %42 = arith.truncf %41 : vector<10x8xf32> to vector<10x8xbf16>
    %43 = vector.extract_strided_slice %13 {offsets = [0, 40], sizes = [10, 8], strides = [1, 1]} : vector<10x64xf32> to vector<10x8xf32>
    %44 = arith.truncf %43 : vector<10x8xf32> to vector<10x8xbf16>
    %cst_22 = arith.constant dense<0.000000e+00> : vector<8x10xf32>
    %45 = tpu.matmul %40, %42, %cst_22 {dimension_numbers = #tpu.dot_dimension_numbers<[1], [1], [0], [0], [0, 0, 1, 0], [], []>} : vector<8x8xbf16>, vector<10x8xbf16>, vector<8x10xf32> -> vector<8x10xf32>
    %cst_23 = arith.constant dense<0xFF800000> : vector<8xf32>
    %46 = vector.multi_reduction <maximumf>, %45, %cst_23 [1] : vector<8x10xf32> to vector<8xf32>
    %47 = vector.shape_cast %46 : vector<8xf32> to vector<8x1xf32>
    %48 = vector.broadcast %47 : vector<8x1xf32> to vector<8x10xf32>
    %49 = arith.subf %45, %48 : vector<8x10xf32>
    %50 = math.exp %49 : vector<8x10xf32>
    %cst_24 = arith.constant dense<0.000000e+00> : vector<8xf32>
    %51 = vector.multi_reduction <add>, %50, %cst_24 [1] : vector<8x10xf32> to vector<8xf32>
    %52 = vector.shape_cast %51 : vector<8xf32> to vector<8x1xf32>
    %53 = arith.truncf %50 : vector<8x10xf32> to vector<8x10xbf16>
    %cst_25 = arith.constant dense<0.000000e+00> : vector<8x8xf32>
    %54 = tpu.matmul %53, %44, %cst_25 {dimension_numbers = #tpu.dot_dimension_numbers<[1], [0], [0], [1], [0, 0, 1, 1], [], []>} : vector<8x10xbf16>, vector<10x8xbf16>, vector<8x8xf32> -> vector<8x8xf32>
    %55 = tpu.reciprocal %52 {approx = true} : vector<8x1xf32> -> vector<8x1xf32>
    %56 = vector.broadcast %55 : vector<8x1xf32> to vector<8x8xf32>
    %57 = arith.mulf %54, %56 : vector<8x8xf32>
    %58 = arith.truncf %57 : vector<8x8xf32> to vector<8x8xbf16>
    %59 = vector.extract_strided_slice %14 {offsets = [8, 0], sizes = [8, 32], strides = [1, 1]} : vector<32x32xbf16> to vector<8x32xbf16>
    %cst_26 = arith.constant dense<0.000000e+00> : vector<8x32xf32>
    %60 = tpu.matmul %58, %59, %cst_26 {dimension_numbers = #tpu.dot_dimension_numbers<[1], [0], [0], [1], [0, 0, 1, 1], [], []>} : vector<8x8xbf16>, vector<8x32xbf16>, vector<8x32xf32> -> vector<8x32xf32>
    %61 = arith.addf %38, %60 : vector<8x32xf32>
    %62 = vector.extract_strided_slice %8 {offsets = [0, 16], sizes = [8, 8], strides = [1, 1]} : vector<8x32xf32> to vector<8x8xf32>
    %63 = arith.truncf %62 : vector<8x8xf32> to vector<8x8xbf16>
    %64 = vector.extract_strided_slice %13 {offsets = [0, 16], sizes = [10, 8], strides = [1, 1]} : vector<10x64xf32> to vector<10x8xf32>
    %65 = arith.truncf %64 : vector<10x8xf32> to vector<10x8xbf16>
    %66 = vector.extract_strided_slice %13 {offsets = [0, 48], sizes = [10, 8], strides = [1, 1]} : vector<10x64xf32> to vector<10x8xf32>
    %67 = arith.truncf %66 : vector<10x8xf32> to vector<10x8xbf16>
    %cst_27 = arith.constant dense<0.000000e+00> : vector<8x10xf32>
    %68 = tpu.matmul %63, %65, %cst_27 {dimension_numbers = #tpu.dot_dimension_numbers<[1], [1], [0], [0], [0, 0, 1, 0], [], []>} : vector<8x8xbf16>, vector<10x8xbf16>, vector<8x10xf32> -> vector<8x10xf32>
    %cst_28 = arith.constant dense<0xFF800000> : vector<8xf32>
    %69 = vector.multi_reduction <maximumf>, %68, %cst_28 [1] : vector<8x10xf32> to vector<8xf32>
    %70 = vector.shape_cast %69 : vector<8xf32> to vector<8x1xf32>
    %71 = vector.broadcast %70 : vector<8x1xf32> to vector<8x10xf32>
    %72 = arith.subf %68, %71 : vector<8x10xf32>
    %73 = math.exp %72 : vector<8x10xf32>
    %cst_29 = arith.constant dense<0.000000e+00> : vector<8xf32>
    %74 = vector.multi_reduction <add>, %73, %cst_29 [1] : vector<8x10xf32> to vector<8xf32>
    %75 = vector.shape_cast %74 : vector<8xf32> to vector<8x1xf32>
    %76 = arith.truncf %73 : vector<8x10xf32> to vector<8x10xbf16>
    %cst_30 = arith.constant dense<0.000000e+00> : vector<8x8xf32>
    %77 = tpu.matmul %76, %67, %cst_30 {dimension_numbers = #tpu.dot_dimension_numbers<[1], [0], [0], [1], [0, 0, 1, 1], [], []>} : vector<8x10xbf16>, vector<10x8xbf16>, vector<8x8xf32> -> vector<8x8xf32>
    %78 = tpu.reciprocal %75 {approx = true} : vector<8x1xf32> -> vector<8x1xf32>
    %79 = vector.broadcast %78 : vector<8x1xf32> to vector<8x8xf32>
    %80 = arith.mulf %77, %79 : vector<8x8xf32>
    %81 = arith.truncf %80 : vector<8x8xf32> to vector<8x8xbf16>
    %82 = vector.extract_strided_slice %14 {offsets = [16, 0], sizes = [8, 32], strides = [1, 1]} : vector<32x32xbf16> to vector<8x32xbf16>
    %cst_31 = arith.constant dense<0.000000e+00> : vector<8x32xf32>
    %83 = tpu.matmul %81, %82, %cst_31 {dimension_numbers = #tpu.dot_dimension_numbers<[1], [0], [0], [1], [0, 0, 1, 1], [], []>} : vector<8x8xbf16>, vector<8x32xbf16>, vector<8x32xf32> -> vector<8x32xf32>
    %84 = arith.addf %61, %83 : vector<8x32xf32>
    %85 = vector.extract_strided_slice %8 {offsets = [0, 24], sizes = [8, 8], strides = [1, 1]} : vector<8x32xf32> to vector<8x8xf32>
    %86 = arith.truncf %85 : vector<8x8xf32> to vector<8x8xbf16>
    %87 = vector.extract_strided_slice %13 {offsets = [0, 24], sizes = [10, 8], strides = [1, 1]} : vector<10x64xf32> to vector<10x8xf32>
    %88 = arith.truncf %87 : vector<10x8xf32> to vector<10x8xbf16>
    %89 = vector.extract_strided_slice %13 {offsets = [0, 56], sizes = [10, 8], strides = [1, 1]} : vector<10x64xf32> to vector<10x8xf32>
    %90 = arith.truncf %89 : vector<10x8xf32> to vector<10x8xbf16>
    %cst_32 = arith.constant dense<0.000000e+00> : vector<8x10xf32>
    %91 = tpu.matmul %86, %88, %cst_32 {dimension_numbers = #tpu.dot_dimension_numbers<[1], [1], [0], [0], [0, 0, 1, 0], [], []>} : vector<8x8xbf16>, vector<10x8xbf16>, vector<8x10xf32> -> vector<8x10xf32>
    %cst_33 = arith.constant dense<0xFF800000> : vector<8xf32>
    %92 = vector.multi_reduction <maximumf>, %91, %cst_33 [1] : vector<8x10xf32> to vector<8xf32>
    %93 = vector.shape_cast %92 : vector<8xf32> to vector<8x1xf32>
    %94 = vector.broadcast %93 : vector<8x1xf32> to vector<8x10xf32>
    %95 = arith.subf %91, %94 : vector<8x10xf32>
    %96 = math.exp %95 : vector<8x10xf32>
    %cst_34 = arith.constant dense<0.000000e+00> : vector<8xf32>
    %97 = vector.multi_reduction <add>, %96, %cst_34 [1] : vector<8x10xf32> to vector<8xf32>
    %98 = vector.shape_cast %97 : vector<8xf32> to vector<8x1xf32>
    %99 = arith.truncf %96 : vector<8x10xf32> to vector<8x10xbf16>
    %cst_35 = arith.constant dense<0.000000e+00> : vector<8x8xf32>
    %100 = tpu.matmul %99, %90, %cst_35 {dimension_numbers = #tpu.dot_dimension_numbers<[1], [0], [0], [1], [0, 0, 1, 1], [], []>} : vector<8x10xbf16>, vector<10x8xbf16>, vector<8x8xf32> -> vector<8x8xf32>
    %101 = tpu.reciprocal %98 {approx = true} : vector<8x1xf32> -> vector<8x1xf32>
    %102 = vector.broadcast %101 : vector<8x1xf32> to vector<8x8xf32>
    %103 = arith.mulf %100, %102 : vector<8x8xf32>
    %104 = arith.truncf %103 : vector<8x8xf32> to vector<8x8xbf16>
    %105 = vector.extract_strided_slice %14 {offsets = [24, 0], sizes = [8, 32], strides = [1, 1]} : vector<32x32xbf16> to vector<8x32xbf16>
    %cst_36 = arith.constant dense<0.000000e+00> : vector<8x32xf32>
    %106 = tpu.matmul %104, %105, %cst_36 {dimension_numbers = #tpu.dot_dimension_numbers<[1], [0], [0], [1], [0, 0, 1, 1], [], []>} : vector<8x8xbf16>, vector<8x32xbf16>, vector<8x32xf32> -> vector<8x32xf32>
    %107 = arith.addf %84, %106 : vector<8x32xf32>
    %c0_37 = arith.constant 0 : index
    %c0_38 = arith.constant 0 : index
    %108 = vector.load %arg9[%c0_37, %c0_38] : memref<1x32xf32, #tpu.memory_space<vmem>>, vector<1x32xf32>
    %109 = vector.broadcast %108 : vector<1x32xf32> to vector<8x32xf32>
    %110 = arith.addf %107, %109 : vector<8x32xf32>
    %111 = arith.extf %1 : vector<8x32xbf16> to vector<8x32xf32>
    %112 = arith.addf %111, %110 : vector<8x32xf32>
    %c0_39 = arith.constant 0 : index
    %c0_40 = arith.constant 0 : index
    %113 = vector.load %arg10[%c0_39, %c0_40] : memref<1x32xf32, #tpu.memory_space<vmem>>, vector<1x32xf32>
    %c0_41 = arith.constant 0 : index
    %c0_42 = arith.constant 0 : index
    %114 = vector.load %arg11[%c0_41, %c0_42] : memref<1x32xf32, #tpu.memory_space<vmem>>, vector<1x32xf32>
    %cst_43 = arith.constant dense<0.000000e+00> : vector<8xf32>
    %115 = vector.multi_reduction <add>, %112, %cst_43 [1] : vector<8x32xf32> to vector<8xf32>
    %116 = vector.shape_cast %115 : vector<8xf32> to vector<8x1xf32>
    %cst_44 = arith.constant 3.200000e+01 : f32
    %117 = vector.broadcast %cst_44 : f32 to vector<8x1xf32>
    %118 = arith.divf %116, %117 : vector<8x1xf32>
    %119 = vector.broadcast %118 : vector<8x1xf32> to vector<8x32xf32>
    %120 = arith.subf %112, %119 : vector<8x32xf32>
    %121 = arith.mulf %120, %120 : vector<8x32xf32>
    %cst_45 = arith.constant dense<0.000000e+00> : vector<8xf32>
    %122 = vector.multi_reduction <add>, %121, %cst_45 [1] : vector<8x32xf32> to vector<8xf32>
    %123 = vector.shape_cast %122 : vector<8xf32> to vector<8x1xf32>
    %cst_46 = arith.constant 3.200000e+01 : f32
    %124 = vector.broadcast %cst_46 : f32 to vector<8x1xf32>
    %125 = arith.divf %123, %124 : vector<8x1xf32>
    %cst_47 = arith.constant 9.99999974E-6 : f32
    %126 = vector.broadcast %cst_47 : f32 to vector<8x1xf32>
    %127 = arith.addf %125, %126 : vector<8x1xf32>
    %128 = math.rsqrt %127 : vector<8x1xf32>
    %129 = vector.broadcast %128 : vector<8x1xf32> to vector<8x32xf32>
    %130 = arith.mulf %120, %129 : vector<8x32xf32>
    %131 = vector.broadcast %113 : vector<1x32xf32> to vector<8x32xf32>
    %132 = arith.mulf %130, %131 : vector<8x32xf32>
    %133 = vector.broadcast %114 : vector<1x32xf32> to vector<8x32xf32>
    %134 = arith.addf %132, %133 : vector<8x32xf32>
    %135 = arith.truncf %134 : vector<8x32xf32> to vector<8x32xbf16>
    %c0_48 = arith.constant 0 : index
    %c0_49 = arith.constant 0 : index
    %c0_50 = arith.constant 0 : index
    %136 = vector.load %arg12[%c0_48, %c0_49, %c0_50] : memref<1x8x32xbf16, #tpu.memory_space<vmem>>, vector<1x8x32xbf16>
    %137 = vector.shape_cast %136 : vector<1x8x32xbf16> to vector<8x32xbf16>
    %138 = vector.shape_cast %135 : vector<8x32xbf16> to vector<1x8x32xbf16>
    tpu.vector_store %arg12[%c0_48, %c0_49, %c0_50], %138 {strides = array<i32>} : memref<1x8x32xbf16, #tpu.memory_space<vmem>>, vector<1x8x32xbf16>,
    return
  }
  func.func @transform_0(%arg0: i32, %arg1: i32) -> (i32, i32, i32) {
    %c0_i32 = arith.constant 0 : i32
    %c0_i32_0 = arith.constant 0 : i32
    return %arg0, %arg1, %c0_i32 : i32, i32, i32
  }
  func.func @transform_1(%arg0: i32, %arg1: i32) -> (i32, i32, i32) {
    %c0_i32 = arith.constant 0 : i32
    %c0_i32_0 = arith.constant 0 : i32
    %c0_i32_1 = arith.constant 0 : i32
    return %arg0, %c0_i32, %c0_i32_0 : i32, i32, i32
  }
  func.func @transform_2(%arg0: i32, %arg1: i32) -> (i32, i32) {
    %c0_i32 = arith.constant 0 : i32
    %c0_i32_0 = arith.constant 0 : i32
    %c0_i32_1 = arith.constant 0 : i32
    return %c0_i32, %c0_i32_0 : i32, i32
  }
  func.func @transform_3(%arg0: i32, %arg1: i32) -> (i32, i32) {
    %c0_i32 = arith.constant 0 : i32
    %c0_i32_0 = arith.constant 0 : i32
    %c0_i32_1 = arith.constant 0 : i32
    return %c0_i32, %c0_i32_0 : i32, i32
  }
  func.func @transform_4(%arg0: i32, %arg1: i32) -> (i32, i32) {
    %c0_i32 = arith.constant 0 : i32
    %c0_i32_0 = arith.constant 0 : i32
    %c0_i32_1 = arith.constant 0 : i32
    return %c0_i32, %c0_i32_0 : i32, i32
  }
  func.func @transform_5(%arg0: i32, %arg1: i32) -> (i32, i32) {
    %c0_i32 = arith.constant 0 : i32
    %c0_i32_0 = arith.constant 0 : i32
    %c0_i32_1 = arith.constant 0 : i32
    return %c0_i32, %c0_i32_0 : i32, i32
  }
  func.func @transform_6(%arg0: i32, %arg1: i32) -> (i32, i32) {
    %c0_i32 = arith.constant 0 : i32
    %c0_i32_0 = arith.constant 0 : i32
    %c0_i32_1 = arith.constant 0 : i32
    return %c0_i32, %c0_i32_0 : i32, i32
  }
  func.func @transform_7(%arg0: i32, %arg1: i32) -> (i32, i32) {
    %c0_i32 = arith.constant 0 : i32
    %c0_i32_0 = arith.constant 0 : i32
    %c0_i32_1 = arith.constant 0 : i32
    return %c0_i32, %c0_i32_0 : i32, i32
  }
  func.func @transform_8(%arg0: i32, %arg1: i32) -> (i32, i32) {
    %c0_i32 = arith.constant 0 : i32
    %c0_i32_0 = arith.constant 0 : i32
    %c0_i32_1 = arith.constant 0 : i32
    return %c0_i32, %c0_i32_0 : i32, i32
  }
  func.func @transform_9(%arg0: i32, %arg1: i32) -> (i32, i32) {
    %c0_i32 = arith.constant 0 : i32
    %c0_i32_0 = arith.constant 0 : i32
    %c0_i32_1 = arith.constant 0 : i32
    return %c0_i32, %c0_i32_0 : i32, i32
  }
  func.func @transform_10(%arg0: i32, %arg1: i32) -> (i32, i32, i32) {
    %c0_i32 = arith.constant 0 : i32
    %c0_i32_0 = arith.constant 0 : i32
    return %arg0, %arg1, %c0_i32 : i32, i32, i32
  }
}

module attributes {stable_mosaic.version = 11 : i64} {
  func.func @_ffn_resident_kernel(%arg0: i32, %arg1: memref<8x32xbf16, #tpu.memory_space<vmem>>, %arg2: memref<32x2048xbf16, #tpu.memory_space<vmem>>, %arg3: memref<1x2048xf32, #tpu.memory_space<vmem>>, %arg4: memref<2048x32xbf16, #tpu.memory_space<vmem>>, %arg5: memref<1x32xf32, #tpu.memory_space<vmem>>, %arg6: memref<1x32xf32, #tpu.memory_space<vmem>>, %arg7: memref<1x32xf32, #tpu.memory_space<vmem>>, %arg8: memref<8x32xbf16, #tpu.memory_space<vmem>>) attributes {dimension_semantics = [#tpu.dimension_semantics<parallel>], iteration_bounds = array<i64: 2>, scalar_prefetch = 0 : i64, scratch_operands = 0 : i64, tpu.core_type = #tpu.core_type<tc>, window_params = [{transform_indices = @transform_0, window_bounds = array<i64: 8, 32>}, {pipeline_mode = #tpu.pipeline_mode<synchronous>, transform_indices = @transform_1, window_bounds = array<i64: 32, 2048>}, {pipeline_mode = #tpu.pipeline_mode<synchronous>, transform_indices = @transform_2, window_bounds = array<i64: 1, 2048>}, {pipeline_mode = #tpu.pipeline_mode<synchronous>, transform_indices = @transform_3, window_bounds = array<i64: 2048, 32>}, {pipeline_mode = #tpu.pipeline_mode<synchronous>, transform_indices = @transform_4, window_bounds = array<i64: 1, 32>}, {pipeline_mode = #tpu.pipeline_mode<synchronous>, transform_indices = @transform_5, window_bounds = array<i64: 1, 32>}, {pipeline_mode = #tpu.pipeline_mode<synchronous>, transform_indices = @transform_6, window_bounds = array<i64: 1, 32>}, {transform_indices = @transform_7, window_bounds = array<i64: 8, 32>}]} {
    %c0 = arith.constant 0 : index
    %c0_0 = arith.constant 0 : index
    %0 = vector.load %arg1[%c0, %c0_0] : memref<8x32xbf16, #tpu.memory_space<vmem>>, vector<8x32xbf16>
    %c0_1 = arith.constant 0 : index
    %c0_2 = arith.constant 0 : index
    %1 = vector.load %arg2[%c0_1, %c0_2] : memref<32x2048xbf16, #tpu.memory_space<vmem>>, vector<32x2048xbf16>
    %cst = arith.constant dense<0.000000e+00> : vector<8x2048xf32>
    %2 = tpu.matmul %0, %1, %cst {dimension_numbers = #tpu.dot_dimension_numbers<[1], [0], [0], [1], [0, 0, 1, 1], [], []>} : vector<8x32xbf16>, vector<32x2048xbf16>, vector<8x2048xf32> -> vector<8x2048xf32>
    %c0_3 = arith.constant 0 : index
    %c0_4 = arith.constant 0 : index
    %3 = vector.load %arg3[%c0_3, %c0_4] : memref<1x2048xf32, #tpu.memory_space<vmem>>, vector<1x2048xf32>
    %4 = vector.broadcast %3 : vector<1x2048xf32> to vector<8x2048xf32>
    %5 = arith.addf %2, %4 : vector<8x2048xf32>
    %cst_5 = arith.constant 0.000000e+00 : f32
    %6 = vector.broadcast %cst_5 : f32 to vector<8x2048xf32>
    %7 = arith.maximumf %5, %6 : vector<8x2048xf32>
    %8 = arith.truncf %7 : vector<8x2048xf32> to vector<8x2048xbf16>
    %c0_6 = arith.constant 0 : index
    %c0_7 = arith.constant 0 : index
    %9 = vector.load %arg4[%c0_6, %c0_7] : memref<2048x32xbf16, #tpu.memory_space<vmem>>, vector<2048x32xbf16>
    %cst_8 = arith.constant dense<0.000000e+00> : vector<8x32xf32>
    %10 = tpu.matmul %8, %9, %cst_8 {dimension_numbers = #tpu.dot_dimension_numbers<[1], [0], [0], [1], [0, 0, 1, 1], [], []>} : vector<8x2048xbf16>, vector<2048x32xbf16>, vector<8x32xf32> -> vector<8x32xf32>
    %c0_9 = arith.constant 0 : index
    %c0_10 = arith.constant 0 : index
    %11 = vector.load %arg5[%c0_9, %c0_10] : memref<1x32xf32, #tpu.memory_space<vmem>>, vector<1x32xf32>
    %12 = vector.broadcast %11 : vector<1x32xf32> to vector<8x32xf32>
    %13 = arith.addf %10, %12 : vector<8x32xf32>
    %14 = arith.extf %0 : vector<8x32xbf16> to vector<8x32xf32>
    %15 = arith.addf %14, %13 : vector<8x32xf32>
    %c0_11 = arith.constant 0 : index
    %c0_12 = arith.constant 0 : index
    %16 = vector.load %arg6[%c0_11, %c0_12] : memref<1x32xf32, #tpu.memory_space<vmem>>, vector<1x32xf32>
    %c0_13 = arith.constant 0 : index
    %c0_14 = arith.constant 0 : index
    %17 = vector.load %arg7[%c0_13, %c0_14] : memref<1x32xf32, #tpu.memory_space<vmem>>, vector<1x32xf32>
    %cst_15 = arith.constant dense<0.000000e+00> : vector<8xf32>
    %18 = vector.multi_reduction <add>, %15, %cst_15 [1] : vector<8x32xf32> to vector<8xf32>
    %19 = vector.shape_cast %18 : vector<8xf32> to vector<8x1xf32>
    %cst_16 = arith.constant 3.200000e+01 : f32
    %20 = vector.broadcast %cst_16 : f32 to vector<8x1xf32>
    %21 = arith.divf %19, %20 : vector<8x1xf32>
    %22 = vector.broadcast %21 : vector<8x1xf32> to vector<8x32xf32>
    %23 = arith.subf %15, %22 : vector<8x32xf32>
    %24 = arith.mulf %23, %23 : vector<8x32xf32>
    %cst_17 = arith.constant dense<0.000000e+00> : vector<8xf32>
    %25 = vector.multi_reduction <add>, %24, %cst_17 [1] : vector<8x32xf32> to vector<8xf32>
    %26 = vector.shape_cast %25 : vector<8xf32> to vector<8x1xf32>
    %cst_18 = arith.constant 3.200000e+01 : f32
    %27 = vector.broadcast %cst_18 : f32 to vector<8x1xf32>
    %28 = arith.divf %26, %27 : vector<8x1xf32>
    %cst_19 = arith.constant 9.99999974E-6 : f32
    %29 = vector.broadcast %cst_19 : f32 to vector<8x1xf32>
    %30 = arith.addf %28, %29 : vector<8x1xf32>
    %31 = math.rsqrt %30 : vector<8x1xf32>
    %32 = vector.broadcast %31 : vector<8x1xf32> to vector<8x32xf32>
    %33 = arith.mulf %23, %32 : vector<8x32xf32>
    %34 = vector.broadcast %16 : vector<1x32xf32> to vector<8x32xf32>
    %35 = arith.mulf %33, %34 : vector<8x32xf32>
    %36 = vector.broadcast %17 : vector<1x32xf32> to vector<8x32xf32>
    %37 = arith.addf %35, %36 : vector<8x32xf32>
    %38 = arith.truncf %37 : vector<8x32xf32> to vector<8x32xbf16>
    %c0_20 = arith.constant 0 : index
    %c0_21 = arith.constant 0 : index
    %39 = vector.load %arg8[%c0_20, %c0_21] : memref<8x32xbf16, #tpu.memory_space<vmem>>, vector<8x32xbf16>
    tpu.vector_store %arg8[%c0_20, %c0_21], %38 {strides = array<i32>} : memref<8x32xbf16, #tpu.memory_space<vmem>>, vector<8x32xbf16>,
    return
  }
  func.func @transform_0(%arg0: i32) -> (i32, i32) {
    %c0_i32 = arith.constant 0 : i32
    %c0_i32_0 = arith.constant 0 : i32
    return %arg0, %c0_i32 : i32, i32
  }
  func.func @transform_1(%arg0: i32) -> (i32, i32) {
    %c0_i32 = arith.constant 0 : i32
    %c0_i32_0 = arith.constant 0 : i32
    %c0_i32_1 = arith.constant 0 : i32
    return %c0_i32, %c0_i32_0 : i32, i32
  }
  func.func @transform_2(%arg0: i32) -> (i32, i32) {
    %c0_i32 = arith.constant 0 : i32
    %c0_i32_0 = arith.constant 0 : i32
    %c0_i32_1 = arith.constant 0 : i32
    return %c0_i32, %c0_i32_0 : i32, i32
  }
  func.func @transform_3(%arg0: i32) -> (i32, i32) {
    %c0_i32 = arith.constant 0 : i32
    %c0_i32_0 = arith.constant 0 : i32
    %c0_i32_1 = arith.constant 0 : i32
    return %c0_i32, %c0_i32_0 : i32, i32
  }
  func.func @transform_4(%arg0: i32) -> (i32, i32) {
    %c0_i32 = arith.constant 0 : i32
    %c0_i32_0 = arith.constant 0 : i32
    %c0_i32_1 = arith.constant 0 : i32
    return %c0_i32, %c0_i32_0 : i32, i32
  }
  func.func @transform_5(%arg0: i32) -> (i32, i32) {
    %c0_i32 = arith.constant 0 : i32
    %c0_i32_0 = arith.constant 0 : i32
    %c0_i32_1 = arith.constant 0 : i32
    return %c0_i32, %c0_i32_0 : i32, i32
  }
  func.func @transform_6(%arg0: i32) -> (i32, i32) {
    %c0_i32 = arith.constant 0 : i32
    %c0_i32_0 = arith.constant 0 : i32
    %c0_i32_1 = arith.constant 0 : i32
    return %c0_i32, %c0_i32_0 : i32, i32
  }
  func.func @transform_7(%arg0: i32) -> (i32, i32) {
    %c0_i32 = arith.constant 0 : i32
    %c0_i32_0 = arith.constant 0 : i32
    return %arg0, %c0_i32 : i32, i32
  }
}

module attributes {stable_mosaic.version = 11 : i64} {
  func.func @_ffn_resident_kernel(%arg0: i32, %arg1: memref<8x32xbf16, #tpu.memory_space<vmem>>, %arg2: memref<32x2048xbf16, #tpu.memory_space<vmem>>, %arg3: memref<1x2048xf32, #tpu.memory_space<vmem>>, %arg4: memref<2048x32xbf16, #tpu.memory_space<vmem>>, %arg5: memref<1x32xf32, #tpu.memory_space<vmem>>, %arg6: memref<1x32xf32, #tpu.memory_space<vmem>>, %arg7: memref<1x32xf32, #tpu.memory_space<vmem>>, %arg8: memref<1x32xf32, #tpu.memory_space<vmem>>, %arg9: memref<1x32xf32, #tpu.memory_space<vmem>>, %arg10: memref<8x32xf32, #tpu.memory_space<vmem>>) attributes {dimension_semantics = [#tpu.dimension_semantics<parallel>], iteration_bounds = array<i64: 2>, scalar_prefetch = 0 : i64, scratch_operands = 0 : i64, tpu.core_type = #tpu.core_type<tc>, window_params = [{transform_indices = @transform_0, window_bounds = array<i64: 8, 32>}, {pipeline_mode = #tpu.pipeline_mode<synchronous>, transform_indices = @transform_1, window_bounds = array<i64: 32, 2048>}, {pipeline_mode = #tpu.pipeline_mode<synchronous>, transform_indices = @transform_2, window_bounds = array<i64: 1, 2048>}, {pipeline_mode = #tpu.pipeline_mode<synchronous>, transform_indices = @transform_3, window_bounds = array<i64: 2048, 32>}, {pipeline_mode = #tpu.pipeline_mode<synchronous>, transform_indices = @transform_4, window_bounds = array<i64: 1, 32>}, {pipeline_mode = #tpu.pipeline_mode<synchronous>, transform_indices = @transform_5, window_bounds = array<i64: 1, 32>}, {pipeline_mode = #tpu.pipeline_mode<synchronous>, transform_indices = @transform_6, window_bounds = array<i64: 1, 32>}, {pipeline_mode = #tpu.pipeline_mode<synchronous>, transform_indices = @transform_7, window_bounds = array<i64: 1, 32>}, {pipeline_mode = #tpu.pipeline_mode<synchronous>, transform_indices = @transform_8, window_bounds = array<i64: 1, 32>}, {transform_indices = @transform_9, window_bounds = array<i64: 8, 32>}]} {
    %c0 = arith.constant 0 : index
    %c0_0 = arith.constant 0 : index
    %0 = vector.load %arg1[%c0, %c0_0] : memref<8x32xbf16, #tpu.memory_space<vmem>>, vector<8x32xbf16>
    %c0_1 = arith.constant 0 : index
    %c0_2 = arith.constant 0 : index
    %1 = vector.load %arg2[%c0_1, %c0_2] : memref<32x2048xbf16, #tpu.memory_space<vmem>>, vector<32x2048xbf16>
    %cst = arith.constant dense<0.000000e+00> : vector<8x2048xf32>
    %2 = tpu.matmul %0, %1, %cst {dimension_numbers = #tpu.dot_dimension_numbers<[1], [0], [0], [1], [0, 0, 1, 1], [], []>} : vector<8x32xbf16>, vector<32x2048xbf16>, vector<8x2048xf32> -> vector<8x2048xf32>
    %c0_3 = arith.constant 0 : index
    %c0_4 = arith.constant 0 : index
    %3 = vector.load %arg3[%c0_3, %c0_4] : memref<1x2048xf32, #tpu.memory_space<vmem>>, vector<1x2048xf32>
    %4 = vector.broadcast %3 : vector<1x2048xf32> to vector<8x2048xf32>
    %5 = arith.addf %2, %4 : vector<8x2048xf32>
    %cst_5 = arith.constant 0.000000e+00 : f32
    %6 = vector.broadcast %cst_5 : f32 to vector<8x2048xf32>
    %7 = arith.maximumf %5, %6 : vector<8x2048xf32>
    %8 = arith.truncf %7 : vector<8x2048xf32> to vector<8x2048xbf16>
    %c0_6 = arith.constant 0 : index
    %c0_7 = arith.constant 0 : index
    %9 = vector.load %arg4[%c0_6, %c0_7] : memref<2048x32xbf16, #tpu.memory_space<vmem>>, vector<2048x32xbf16>
    %cst_8 = arith.constant dense<0.000000e+00> : vector<8x32xf32>
    %10 = tpu.matmul %8, %9, %cst_8 {dimension_numbers = #tpu.dot_dimension_numbers<[1], [0], [0], [1], [0, 0, 1, 1], [], []>} : vector<8x2048xbf16>, vector<2048x32xbf16>, vector<8x32xf32> -> vector<8x32xf32>
    %c0_9 = arith.constant 0 : index
    %c0_10 = arith.constant 0 : index
    %11 = vector.load %arg5[%c0_9, %c0_10] : memref<1x32xf32, #tpu.memory_space<vmem>>, vector<1x32xf32>
    %12 = vector.broadcast %11 : vector<1x32xf32> to vector<8x32xf32>
    %13 = arith.addf %10, %12 : vector<8x32xf32>
    %14 = arith.extf %0 : vector<8x32xbf16> to vector<8x32xf32>
    %15 = arith.addf %14, %13 : vector<8x32xf32>
    %c0_11 = arith.constant 0 : index
    %c0_12 = arith.constant 0 : index
    %16 = vector.load %arg6[%c0_11, %c0_12] : memref<1x32xf32, #tpu.memory_space<vmem>>, vector<1x32xf32>
    %c0_13 = arith.constant 0 : index
    %c0_14 = arith.constant 0 : index
    %17 = vector.load %arg7[%c0_13, %c0_14] : memref<1x32xf32, #tpu.memory_space<vmem>>, vector<1x32xf32>
    %cst_15 = arith.constant dense<0.000000e+00> : vector<8xf32>
    %18 = vector.multi_reduction <add>, %15, %cst_15 [1] : vector<8x32xf32> to vector<8xf32>
    %19 = vector.shape_cast %18 : vector<8xf32> to vector<8x1xf32>
    %cst_16 = arith.constant 3.200000e+01 : f32
    %20 = vector.broadcast %cst_16 : f32 to vector<8x1xf32>
    %21 = arith.divf %19, %20 : vector<8x1xf32>
    %22 = vector.broadcast %21 : vector<8x1xf32> to vector<8x32xf32>
    %23 = arith.subf %15, %22 : vector<8x32xf32>
    %24 = arith.mulf %23, %23 : vector<8x32xf32>
    %cst_17 = arith.constant dense<0.000000e+00> : vector<8xf32>
    %25 = vector.multi_reduction <add>, %24, %cst_17 [1] : vector<8x32xf32> to vector<8xf32>
    %26 = vector.shape_cast %25 : vector<8xf32> to vector<8x1xf32>
    %cst_18 = arith.constant 3.200000e+01 : f32
    %27 = vector.broadcast %cst_18 : f32 to vector<8x1xf32>
    %28 = arith.divf %26, %27 : vector<8x1xf32>
    %cst_19 = arith.constant 9.99999974E-6 : f32
    %29 = vector.broadcast %cst_19 : f32 to vector<8x1xf32>
    %30 = arith.addf %28, %29 : vector<8x1xf32>
    %31 = math.rsqrt %30 : vector<8x1xf32>
    %32 = vector.broadcast %31 : vector<8x1xf32> to vector<8x32xf32>
    %33 = arith.mulf %23, %32 : vector<8x32xf32>
    %34 = vector.broadcast %16 : vector<1x32xf32> to vector<8x32xf32>
    %35 = arith.mulf %33, %34 : vector<8x32xf32>
    %36 = vector.broadcast %17 : vector<1x32xf32> to vector<8x32xf32>
    %37 = arith.addf %35, %36 : vector<8x32xf32>
    %c0_20 = arith.constant 0 : index
    %c0_21 = arith.constant 0 : index
    %38 = vector.load %arg8[%c0_20, %c0_21] : memref<1x32xf32, #tpu.memory_space<vmem>>, vector<1x32xf32>
    %c0_22 = arith.constant 0 : index
    %c0_23 = arith.constant 0 : index
    %39 = vector.load %arg9[%c0_22, %c0_23] : memref<1x32xf32, #tpu.memory_space<vmem>>, vector<1x32xf32>
    %cst_24 = arith.constant dense<0.000000e+00> : vector<8xf32>
    %40 = vector.multi_reduction <add>, %37, %cst_24 [1] : vector<8x32xf32> to vector<8xf32>
    %41 = vector.shape_cast %40 : vector<8xf32> to vector<8x1xf32>
    %cst_25 = arith.constant 3.200000e+01 : f32
    %42 = vector.broadcast %cst_25 : f32 to vector<8x1xf32>
    %43 = arith.divf %41, %42 : vector<8x1xf32>
    %44 = vector.broadcast %43 : vector<8x1xf32> to vector<8x32xf32>
    %45 = arith.subf %37, %44 : vector<8x32xf32>
    %46 = arith.mulf %45, %45 : vector<8x32xf32>
    %cst_26 = arith.constant dense<0.000000e+00> : vector<8xf32>
    %47 = vector.multi_reduction <add>, %46, %cst_26 [1] : vector<8x32xf32> to vector<8xf32>
    %48 = vector.shape_cast %47 : vector<8xf32> to vector<8x1xf32>
    %cst_27 = arith.constant 3.200000e+01 : f32
    %49 = vector.broadcast %cst_27 : f32 to vector<8x1xf32>
    %50 = arith.divf %48, %49 : vector<8x1xf32>
    %cst_28 = arith.constant 9.99999974E-6 : f32
    %51 = vector.broadcast %cst_28 : f32 to vector<8x1xf32>
    %52 = arith.addf %50, %51 : vector<8x1xf32>
    %53 = math.rsqrt %52 : vector<8x1xf32>
    %54 = vector.broadcast %53 : vector<8x1xf32> to vector<8x32xf32>
    %55 = arith.mulf %45, %54 : vector<8x32xf32>
    %56 = vector.broadcast %38 : vector<1x32xf32> to vector<8x32xf32>
    %57 = arith.mulf %55, %56 : vector<8x32xf32>
    %58 = vector.broadcast %39 : vector<1x32xf32> to vector<8x32xf32>
    %59 = arith.addf %57, %58 : vector<8x32xf32>
    %c0_29 = arith.constant 0 : index
    %c0_30 = arith.constant 0 : index
    %60 = vector.load %arg10[%c0_29, %c0_30] : memref<8x32xf32, #tpu.memory_space<vmem>>, vector<8x32xf32>
    tpu.vector_store %arg10[%c0_29, %c0_30], %59 {strides = array<i32>} : memref<8x32xf32, #tpu.memory_space<vmem>>, vector<8x32xf32>,
    return
  }
  func.func @transform_0(%arg0: i32) -> (i32, i32) {
    %c0_i32 = arith.constant 0 : i32
    %c0_i32_0 = arith.constant 0 : i32
    return %arg0, %c0_i32 : i32, i32
  }
  func.func @transform_1(%arg0: i32) -> (i32, i32) {
    %c0_i32 = arith.constant 0 : i32
    %c0_i32_0 = arith.constant 0 : i32
    %c0_i32_1 = arith.constant 0 : i32
    return %c0_i32, %c0_i32_0 : i32, i32
  }
  func.func @transform_2(%arg0: i32) -> (i32, i32) {
    %c0_i32 = arith.constant 0 : i32
    %c0_i32_0 = arith.constant 0 : i32
    %c0_i32_1 = arith.constant 0 : i32
    return %c0_i32, %c0_i32_0 : i32, i32
  }
  func.func @transform_3(%arg0: i32) -> (i32, i32) {
    %c0_i32 = arith.constant 0 : i32
    %c0_i32_0 = arith.constant 0 : i32
    %c0_i32_1 = arith.constant 0 : i32
    return %c0_i32, %c0_i32_0 : i32, i32
  }
  func.func @transform_4(%arg0: i32) -> (i32, i32) {
    %c0_i32 = arith.constant 0 : i32
    %c0_i32_0 = arith.constant 0 : i32
    %c0_i32_1 = arith.constant 0 : i32
    return %c0_i32, %c0_i32_0 : i32, i32
  }
  func.func @transform_5(%arg0: i32) -> (i32, i32) {
    %c0_i32 = arith.constant 0 : i32
    %c0_i32_0 = arith.constant 0 : i32
    %c0_i32_1 = arith.constant 0 : i32
    return %c0_i32, %c0_i32_0 : i32, i32
  }
  func.func @transform_6(%arg0: i32) -> (i32, i32) {
    %c0_i32 = arith.constant 0 : i32
    %c0_i32_0 = arith.constant 0 : i32
    %c0_i32_1 = arith.constant 0 : i32
    return %c0_i32, %c0_i32_0 : i32, i32
  }
  func.func @transform_7(%arg0: i32) -> (i32, i32) {
    %c0_i32 = arith.constant 0 : i32
    %c0_i32_0 = arith.constant 0 : i32
    %c0_i32_1 = arith.constant 0 : i32
    return %c0_i32, %c0_i32_0 : i32, i32
  }
  func.func @transform_8(%arg0: i32) -> (i32, i32) {
    %c0_i32 = arith.constant 0 : i32
    %c0_i32_0 = arith.constant 0 : i32
    %c0_i32_1 = arith.constant 0 : i32
    return %c0_i32, %c0_i32_0 : i32, i32
  }
  func.func @transform_9(%arg0: i32) -> (i32, i32) {
    %c0_i32 = arith.constant 0 : i32
    %c0_i32_0 = arith.constant 0 : i32
    return %arg0, %c0_i32 : i32, i32
  }
}

</mosaic_0001>

<bundles_post_ra>
// kernel: _lambda_.4
= control target key start
LH: loop header
LB: loop body
LE: loop exit
PB: predicated region body
PF: predicated region fallthrough
CT: control target
= control target key end

     0   :  { %s1614_s13 = smov 0   ;;  %s1616_s14 = smov 0   ;;  %s1796_s0 = inlined_call_operand.vmem [shape: bf16[2,8,32], index: 0, kind: input, shape index: {}]   ;;  %s1797_s1 = inlined_call_operand.vmem [shape: bf16[2,10,32], index: 1, kind: input, shape index: {}]   ;;  %s1798_s2 = inlined_call_operand.vmem [shape: bf16[32,32], index: 2, kind: input, shape index: {}]   ;;  %s1799_s3 = inlined_call_operand.vmem [shape: f32[1,32], index: 3, kind: input, shape index: {}]   ;;  %s1800_s4 = inlined_call_operand.vmem [shape: bf16[32,64], index: 4, kind: input, shape index: {}]   ;;  %s1801_s5 = inlined_call_operand.vmem [shape: f32[1,64], index: 5, kind: input, shape index: {}]   ;;  %s1802_s6 = inlined_call_operand.vmem [shape: bf16[32,32], index: 6, kind: input, shape index: {}]   ;;  %s1803_s7 = inlined_call_operand.vmem [shape: f32[1,32], index: 7, kind: input, shape index: {}]   ;;  %s1804_s8 = inlined_call_operand.vmem [shape: f32[1,32], index: 8, kind: input, shape index: {}]   ;;  %s1805_s9 = inlined_call_operand.vmem [shape: f32[1,32], index: 9, kind: input, shape index: {}]   ;;  %s1806_s10 = inlined_call_operand.vmem [shape: bf16[2,8,32], index: 10, kind: output, shape index: {}]  }
   0x1   :  { %s1618_s15 = smov 0  }
   0x2 LB: > { %s32_s16 = sadd.s32 1, %s1544_s14  ;;  %p1320_p0 = scmp.ge.s32.totalorder %s1548_s15, 1  ;;  %s1548_s15 = sphi %s1618_s15, %s20_s15   ;;  %s1544_s14 = sphi %s1616_s14, %s1808_s14   ;;  %s1540_s13 = sphi %s1614_s13, %s1807_s13  }
   0x3   : > { %p34_p1 = scmp.ge.s32.totalorder %s32_s16, 2  ;;  %p340_p2 = scmp.lt.s32.totalorder %s1548_s15, 3 }
   0x5   : > { %s1810_s16 = smov (%p34_p1, %s32_s16), 0  ;;  %p341_p3 = pnand %p1320_p0, %p340_p2 }
   0x6   : > { %v1503_v0 = vld [vmem:[%s1800_s4] sm:$0xff] (!%p341_p3)   ;;  %v1550_v1 = vmov (!%p341_p3), 0.0   ;;  %v1504_v2 = vld [vmem:[%s1800_s4 + $0x8] sm:$0xff] (!%p341_p3)   ;;  %vm1551_vm0 = vmmov (!%p341_p3), 0   ;;  %p387_p4 = scmp.lt.s32.totalorder (!%p341_p3), %s1540_s13, 1  ;;  %vm433_vm1 = vcmask (!%p341_p3), 261120  }
   0x7   : > { %344 = sbr.rel (%p341_p3) target bundleno = 2457 (0x999), region = 60  ;;  %1390 = vmatprep.subr.bf16.mxu1 (!%p341_p3), %v1550_v1  ;;  %1382 = vmatprep.subr.bf16.mxu0 (!%p341_p3), %v1550_v1  ;;  %v1505_v3 = vld [vmem:[%s1798_s2] sm:$0xff] (!%p341_p3)   ;;  %v1507_v4 = vld [vmem:[%s1798_s2 + $0x8] sm:$0xff] (!%p341_p3)   ;;  %vm555_vm2 = vcmask (!%p341_p3), 64512   ;;  %s1552_s21 = smov (!%p341_p3), 120   ;;  %vm619_vm3 = vcmask (!%p341_p3), 1044480  }
   0x8   : > { %1391 = vmatpush3.bf16.msra.mxu1 (!%p341_p3), %v1503_v0  ;;  %1394 = vmatprep.mubr.msk.bf16.mxu1 (!%p341_p3), %vm1551_vm0, %v1550_v1  ;;  %v1329_v7 = vld [vmem:[%s1801_s5] ss:$0 sm:$0xff] (!%p341_p3)  ;;  %s1553_s22 = smov (!%p341_p3), 96   ;;  %vm602_vm4 = vcmask (!%p341_p3), 80896   ;;  %s1554_s23 = smov (!%p341_p3), 88   ;;  %vm781_vm5 = vcmask (!%p341_p3), 1043456  }
   0x9   : > { %1392 = vmatprep.subr.bf16.mxu1 (!%p341_p3), %v1550_v1  ;;  %1386 = vmatprep.mubr.msk.bf16.mxu0 (!%p341_p3), %vm1551_vm0, %v1550_v1  ;;  %v1325_v9 = vld [vmem:[%s1799_s3] ss:$0 sm:$0xff] (!%p341_p3)  ;;  %s1555_s24 = smov (!%p341_p3), 112   ;;  %v550_v54 = vld [vmem:[%s1802_s6 + $0x4] sm:$0xf] (!%p341_p3)  ;;  %s1557_s11 = smov (!%p341_p3), 80  }
   0xa   : > { %1383 = vmatpush3.bf16.msra.mxu0 (!%p341_p3), %v1505_v3  ;;  %v549_v49 = vld [vmem:[%s1802_s6] sm:$0xf] (!%p341_p3)  ;;  %v783_v55 = vsel (!%p341_p3), %vm781_vm5, %v550_v54, 0  ;;  %vm1228_vm6 = vcmask (!%p341_p3), 257024  }
   0xb   : > { %1384 = vmatprep.subr.bf16.mxu0 (!%p341_p3), %v1550_v1  ;;  %v829_v53 = vsel (!%p341_p3), %vm781_vm5, %v549_v49, 0 }
   0xc   : > { %1393 = vmatpush3.bf16.msra.mxu1 (!%p341_p3), %v1504_v2 }
   0xd   : > { %1404 = vmatprep.subr.bf16.mxu1 (!%p341_p3), %v1550_v1 }
   0xe   : > { %s1812_s13 = smov (!%p387_p4, %s1540_s13), 1  ;;  %1385 = vmatpush3.bf16.msra.mxu0 %v1507_v4 }
   0xf   : > { %s1351_s25 = sshll.u32 %s1812_s13, 3  ;;  %s1321_s26 = sshll.u32 %s1812_s13, 2  ;;  %1398 = vmatprep.subr.bf16.mxu0 %v1550_v1 }
  0x10   : > { %s398_s29 = scalar_lea.vmem %s1797_s1, %s1351_s25  ;;  %s393_s12 = scalar_lea.vmem %s1796_s0, %s1321_s26 }
  0x11   : > { %v1506_v5 = vld [vmem:[%s398_s29] sm:$0x1f]   ;;  %s1556_s25 = smov 104   ;;  %s405_s30 = scalar_lea.vmem %s1806_s10, %s1321_s26 }
  0x12   : > { %v1665_v6 = vld [vmem:[%s393_s12] sm:$0xf]  ;;  %1395 = vmatmul.mubr.msk.bf16.vlgmr.msra.gmra.mrb[0].mxu1 %vm433_vm1, %v1506_v5  ;;  %s1558_s12 = smov 72  }
  0x13   : > { %1387 = vmatmul.mubr.msk.bf16.vlgmr.msra.gmra.mrb[0].mxu0 %vm433_vm1, %v1665_v6  ;;  %1406 = vmatprep.mubr.msk.bf16.mxu1 %vm1551_vm0, %v1550_v1 }
  0x14   : > { %1400 = vmatprep.mubr.msk.bf16.mxu0 %vm1551_vm0, %v1550_v1 }
  0xe5   : > { %v542_v8 = vpop.f32.mrb[0].mxu1 }
  0xe6   : > { %v1396_v10 = vpop.f32.mrb[1].mxu1  ;;  %v471_v11 = vpop.f32.mrb[0].mxu0  ;;  %v543_v14 = vadd.f32 %v1329_v7, %v542_v8 }
  0xe7   : > { %v545_v12 = vpop.f32.mrb[2].mxu1  ;;  %v1388_v13 = vpop.f32.mrb[1].mxu0  ;;  %v472_v17 = vadd.f32 %v1325_v9, %v471_v11 }
  0xe8   : > { %v546_v15 = vadd.f32 %v1329_v7, %v545_v12  ;;  %v1397_v16 = vpop.f32.mrb[3].mxu1  ;;  %v474_v18 = vpop.f32.mrb[2].mxu0 }
  0xe9   : > { %v1389_v19 = vpop.f32.mrb[3].mxu0  ;;  %v553_v21 = vpack.c.bf16 %v472_v17, %v472_v17 }
  0xea   : > { %v1681_v20 = vpack.c.bf16 %v546_v15, %v543_v14 }
  0xec   : > { %669 = vrot.lane.b32.xlu0 %v1681_v20, %s1552_s21  ;;  %v560_v22 = vsel %vm555_vm2, %v1681_v20, 0 }
  0xed   : > { %1399 = vmatpush3.bf16.xpose.msra.mxu0 %v560_v22 }
  0xee   : > { %1410 = vmatprep.subr.bf16.mxu0 %v1550_v1 }
  0xf0   : > { %667 = vrot.lane.b32.xlu0 %v553_v21, %s1552_s21 }
  0xf4   : > { %614 = vrot.lane.b32.xlu0 %v1681_v20, %s1553_s22  ;;  %1401 = vmatmul.mubr.msk.bf16.vlgmr.msra.gmra.mrb[4].mxu0 %vm555_vm2, %v553_v21 }
  0xf5   : > { %1412 = vmatprep.mubr.msk.bf16.mxu0 %vm1551_vm0, %v1550_v1 }
 0x15e   : > { %v670_v23 = vpop.permute.xlu0 %669 }
 0x15f   : > { %v675_v24 = vsel %vm555_vm2, %v670_v23, 0 }
 0x160   : > { %1411 = vmatpush3.bf16.xpose.msra.mxu0 %v675_v24 }
 0x161   : > { %1422 = vmatprep.subr.bf16.mxu0 %v1550_v1 }
 0x162   : > { %v668_v25 = vpop.permute.xlu0 %667 }
 0x166   : > { %v615_v26 = vpop.permute.xlu0 %614 }
 0x167   : > { %v621_v27 = vsel %vm619_vm3, %v615_v26, 0  ;;  %1413 = vmatmul.mubr.msk.bf16.vlgmr.msra.gmra.mrb[8].mxu0 %vm555_vm2, %v668_v25 }
 0x168   : > { %1405 = vmatpush3.bf16.msra.mxu1 %v621_v27  ;;  %1424 = vmatprep.mubr.msk.bf16.mxu0 %vm1551_vm0, %v1550_v1 }
 0x169   : > { %1416 = vmatprep.subr.bf16.mxu1 %v1550_v1  ;;  %1423 = vmatpush3.bf16.msra.mxu0 %v783_v55 }
 0x16a   : > { %1434 = vmatprep.subr.bf16.mxu0 %v1550_v1 }
 0x1c7   : > { %v596_v28 = vpop.f32.mrb[4].mxu0 }
 0x1c8   : > { %v1402_v29 = vpop.f32.mrb[5].mxu0  ;;  %v603_v30 = vsel %vm602_vm4, %v596_v28, -inf }
 0x1c9   : > { %604 = vmax.xlane.f32.xlu1 %v603_v30  ;;  %v599_v31 = vpop.f32.mrb[6].mxu0 }
 0x1ca   : > { %v1403_v32 = vpop.f32.mrb[7].mxu0 }
 0x23a   : > { %v711_v33 = vpop.f32.mrb[8].mxu0 }
 0x23b   : > { %v1414_v34 = vpop.f32.mrb[9].mxu0  ;;  %v717_v35 = vsel %vm602_vm4, %v711_v33, -inf }
 0x23c   : > { %718 = vmax.xlane.f32.xlu1 %v717_v35  ;;  %v714_v36 = vpop.f32.mrb[10].mxu0 }
 0x23d   : > { %v1415_v37 = vpop.f32.mrb[11].mxu0 }
 0x24d   : > { %727 = vrot.lane.b32.xlu1 %v1681_v20, %s1554_s23 }
 0x251   : > { %873 = vrot.lane.b32.xlu1 %v1681_v20, %s1555_s24 }
 0x255   : > { %871 = vrot.lane.b32.xlu1 %v553_v21, %s1555_s24 }
 0x256   : > { %v605_v38 = vpop.xlane.xlu1 %604 }
 0x257   : > { %v606_v39 = vsub.f32 %v596_v28, %v605_v38 }
 0x259   : > { %v607_v40 = vmul.f32 1.442695, %v606_v39  ;;  %v551_v39 = vld [vmem:[%s1802_s6 + $0x8] sm:$0xf] }
 0x25b   : > { %1508 = vpow2.f32 %v607_v40  ;;  %v986_v40 = vsel %vm781_vm5, %v551_v39, 0 }
 0x265   : > { %v1509_v41 = vpop.eup %1508 }
 0x266   : > { %v612_v42 = vpack.c.bf16 %v1509_v41, %v1509_v41  ;;  %v609_v43 = vsel %vm602_vm4, %v1509_v41, 0.0 }
 0x268   : > { %1407 = vmatmul.mubr.msk.bf16.vlgmr.msra.gmra.mrb[4].mxu1 %vm602_vm4, %v612_v42 }
 0x269   : > { %1418 = vmatprep.mubr.msk.bf16.mxu1 %vm1551_vm0, %v1550_v1 }
 0x279   : > { %610 = vadd.xlane.f32.xlu1 %v609_v43 }
 0x28a   : > { %1029 = vrot.lane.b32.xlu1 %v553_v21, %s1556_s25 }
 0x2c9   : > { %v719_v44 = vpop.xlane.xlu1 %718 }
 0x2ca   : > { %v720_v45 = vsub.f32 %v711_v33, %v719_v44 }
 0x2cc   : > { %v721_v46 = vmul.f32 1.442695, %v720_v45 }
 0x2cd   : > { %v728_v47 = vpop.permute.xlu1 %727 }
 0x2ce   : > { %1510 = vpow2.f32 %v721_v46  ;;  %v733_v48 = vsel %vm619_vm3, %v728_v47, 0 }
 0x2cf   : > { %1417 = vmatpush3.bf16.msra.mxu1 %v733_v48 }
 0x2d0   : > { %1428 = vmatprep.subr.bf16.mxu1 %v1550_v1 }
 0x2d1   : > { %v874_v56 = vpop.permute.xlu1 %873 }
 0x2d2   : > { %v879_v14 = vsel %vm555_vm2, %v874_v56, 0 }
 0x2d5   : > { %v872_v57 = vpop.permute.xlu1 %871 }
 0x2d8   : > { %v1511_v50 = vpop.eup %1510 }
 0x2d9   : > { %v723_v51 = vsel %vm602_vm4, %v1511_v50, 0.0  ;;  %v726_v52 = vpack.c.bf16 %v1511_v50, %v1511_v50 }
 0x2da   : > { %724 = vadd.xlane.f32.xlu0 %v723_v51 }
 0x2db   : > { %1419 = vmatmul.mubr.msk.bf16.vlgmr.msra.gmra.mrb[8].mxu1 %vm602_vm4, %v726_v52 }
 0x2dc   : > { %1429 = vmatpush3.bf16.msra.mxu1 %v829_v53  ;;  %1430 = vmatprep.mubr.msk.bf16.mxu1 %vm1551_vm0, %v1550_v1 }
 0x2dd   : > { %1440 = vmatprep.subr.bf16.mxu1 %v1550_v1 }
 0x2f0   : > { %931 = vrot.lane.b32.xlu0 %v1681_v20, %s1557_s11 }
 0x306   : > { %v611_v58 = vpop.xlane.xlu1 %610 }
 0x307   : > { %1512 = vrcp.f32 %v611_v58 }
 0x30a   : > { %v1030_v38 = vpop.permute.xlu1 %1029 }
 0x311   : > { %v1513_v59 = vpop.eup %1512 }
 0x33b   : > { %v657_v60 = vpop.f32.mrb[4].mxu1 }
 0x33c   : > { %v664_v61 = vmul.f32 %v1513_v59, %v657_v60  ;;  %v1408_v62 = vpop.f32.mrb[5].mxu1 }
 0x33d   : > { %v660_v63 = vpop.f32.mrb[6].mxu1 }
 0x33e   : > { %v665_v0 = vpack.c.bf16 %v664_v61, %v664_v61  ;;  %v1409_v2 = vpop.f32.mrb[7].mxu1 }
 0x340   : > { %1431 = vmatmul.mubr.msk.bf16.vlgmr.msra.gmra.mrb[12].mxu1 %vm555_vm2, %v665_v0 }
 0x341   : > { %1442 = vmatprep.mubr.msk.bf16.mxu1 %vm1551_vm0, %v1550_v1 }
 0x367   : > { %v725_v3 = vpop.xlane.xlu0 %724 }
 0x368   : > { %1514 = vrcp.f32 %v725_v3 }
 0x36b   : > { %v932_v4 = vpop.permute.xlu0 %931 }
 0x36c   : > { %v937_v5 = vsel %vm619_vm3, %v932_v4, 0 }
 0x36d   : > { %1441 = vmatpush3.bf16.msra.mxu1 %v937_v5 }
 0x36e   : > { %1452 = vmatprep.subr.bf16.mxu1 %v1550_v1 }
 0x372   : > { %v1515_v7 = vpop.eup %1514 }
 0x3ae   : > { %v769_v8 = vpop.f32.mrb[8].mxu1 }
 0x3af   : > { %v776_v9 = vmul.f32 %v1515_v7, %v769_v8  ;;  %v1420_v10 = vpop.f32.mrb[9].mxu1 }
 0x3b0   : > { %v772_v11 = vpop.f32.mrb[10].mxu1 }
 0x3b1   : > { %v777_v12 = vpack.c.bf16 %v776_v9, %v776_v9  ;;  %v1421_v13 = vpop.f32.mrb[11].mxu1 }
 0x3b3   : > { %1425 = vmatmul.mubr.msk.bf16.vlgmr.msra.gmra.mrb[12].mxu0 %vm555_vm2, %v777_v12 }
 0x3b4   : > { %1435 = vmatpush3.bf16.xpose.msra.mxu0 %v879_v14  ;;  %1436 = vmatprep.mubr.msk.bf16.mxu0 %vm1551_vm0, %v1550_v1  ;;  %v1346_v14 = vld [vmem:[%s1803_s7] ss:$0 sm:$0xff] }
 0x3b5   : > { %1446 = vmatprep.subr.bf16.mxu0 %v1550_v1 }
 0x3bb   : > { %1437 = vmatmul.mubr.msk.bf16.vlgmr.msra.gmra.mrb[16].mxu0 %vm555_vm2, %v872_v57 }
 0x3bc   : > { %1448 = vmatprep.mubr.msk.bf16.mxu0 %vm1551_vm0, %v1550_v1  ;;  %1447 = vmatpush3.bf16.msra.mxu0 %v986_v40 }
 0x3bd   : > { %1458 = vmatprep.subr.bf16.mxu0 %v1550_v1 }
 0x413   : > { %v865_v15 = vpop.f32.mrb[12].mxu1 }
 0x414   : > { %v1432_v16 = vpop.f32.mrb[13].mxu1 }
 0x415   : > { %v868_v17 = vpop.f32.mrb[14].mxu1 }
 0x416   : > { %v1433_v18 = vpop.f32.mrb[15].mxu1  ;;  %v1195_v17 = vunpack.c.l.bf16 %v1665_v6 }
 0x486   : > { %v819_v19 = vpop.f32.mrb[12].mxu0 }
 0x487   : > { %v1737_v21 = vadd.f32 %v865_v15, %v819_v19  ;;  %v1426_v22 = vpop.f32.mrb[13].mxu0 }
 0x488   : > { %v822_v23 = vpop.f32.mrb[14].mxu0 }
 0x489   : > { %v1427_v24 = vpop.f32.mrb[15].mxu0 }
 0x48e   : > { %v915_v25 = vpop.f32.mrb[16].mxu0 }
 0x48f   : > { %v1438_v26 = vpop.f32.mrb[17].mxu0  ;;  %v921_v27 = vsel %vm602_vm4, %v915_v25, -inf }
 0x490   : > { %922 = vmax.xlane.f32.xlu0 %v921_v27  ;;  %v918_v28 = vpop.f32.mrb[18].mxu0 }
 0x491   : > { %v1439_v29 = vpop.f32.mrb[19].mxu0 }
 0x4a6   : > { %1031 = vrot.lane.b32.xlu0 %v1681_v20, %s1556_s25 }
 0x51d   : > { %v923_v30 = vpop.xlane.xlu0 %922 }
 0x51e   : > { %v924_v31 = vsub.f32 %v915_v25, %v923_v30 }
 0x520   : > { %v925_v32 = vmul.f32 1.442695, %v924_v31 }
 0x521   : > { %v1032_v34 = vpop.permute.xlu0 %1031 }
 0x522   : > { %1516 = vpow2.f32 %v925_v32  ;;  %v1037_v37 = vsel %vm555_vm2, %v1032_v34, 0  ;;  %v1347_v32 = vld [vmem:[%s1804_s8] ss:$0 sm:$0xff] }
 0x523   : > { %v1348_v34 = vld [vmem:[%s1805_s9] ss:$0 sm:$0xff] }
 0x52c   : > { %v1517_v33 = vpop.eup %1516 }
 0x52d   : > { %v927_v35 = vsel %vm602_vm4, %v1517_v33, 0.0  ;;  %v930_v36 = vpack.c.bf16 %v1517_v33, %v1517_v33 }
 0x52e   : > { %928 = vadd.xlane.f32.xlu0 %v927_v35 }
 0x52f   : > { %1443 = vmatmul.mubr.msk.bf16.vlgmr.msra.gmra.mrb[16].mxu1 %vm602_vm4, %v930_v36 }
 0x530   : > { %1453 = vmatpush3.bf16.xpose.msra.mxu1 %v1037_v37  ;;  %1454 = vmatprep.mubr.msk.bf16.mxu1 %vm1551_vm0, %v1550_v1 }
 0x531   : > { %1464 = vmatprep.subr.bf16.mxu1 %v1550_v1 }
 0x537   : > { %1455 = vmatmul.mubr.msk.bf16.vlgmr.msra.gmra.mrb[20].mxu1 %vm555_vm2, %v1030_v38 }
 0x538   : > { %1466 = vmatprep.mubr.msk.bf16.mxu1 %vm1551_vm0, %v1550_v1 }
 0x544   : > { %1089 = vrot.lane.b32.xlu0 %v1681_v20, %s1558_s12 }
 0x5bb   : > { %v929_v41 = vpop.xlane.xlu0 %928 }
 0x5bc   : > { %1518 = vrcp.f32 %v929_v41 }
 0x5bf   : > { %v1090_v46 = vpop.permute.xlu0 %1089 }
 0x5c0   : > { %v1095_v20 = vsel %vm619_vm3, %v1090_v46, 0 }
 0x5c6   : > { %v1519_v42 = vpop.eup %1518 }
 0x602   : > { %v973_v43 = vpop.f32.mrb[16].mxu1 }
 0x603   : > { %v980_v44 = vmul.f32 %v1519_v42, %v973_v43  ;;  %v1444_v45 = vpop.f32.mrb[17].mxu1 }
 0x604   : > { %v976_v47 = vpop.f32.mrb[18].mxu1 }
 0x605   : > { %v981_v48 = vpack.c.bf16 %v980_v44, %v980_v44  ;;  %v1445_v49 = vpop.f32.mrb[19].mxu1 }
 0x607   : > { %1449 = vmatmul.mubr.msk.bf16.vlgmr.msra.gmra.mrb[20].mxu0 %vm555_vm2, %v981_v48 }
 0x608   : > { %1459 = vmatpush3.bf16.msra.mxu0 %v1095_v20  ;;  %1460 = vmatprep.mubr.msk.bf16.mxu0 %vm1551_vm0, %v1550_v1  ;;  %v552_v1 = vld [vmem:[%s1802_s6 + $0xc] sm:$0xf] }
 0x609   : > { %v1144_v61 = vsel %vm781_vm5, %v552_v1, 0 }
 0x60a   : > { %v1073_v50 = vpop.f32.mrb[20].mxu1  ;;  %1465 = vmatpush3.bf16.msra.mxu1 %v1144_v61 }
 0x60b   : > { %v1456_v51 = vpop.f32.mrb[21].mxu1  ;;  %v1079_v52 = vsel %vm602_vm4, %v1073_v50, -inf }
 0x60c   : > { %1080 = vmax.xlane.f32.xlu1 %v1079_v52  ;;  %v1076_v53 = vpop.f32.mrb[22].mxu1 }
 0x60d   : > { %v1457_v54 = vpop.f32.mrb[23].mxu1 }
 0x699   : > { %v1081_v55 = vpop.xlane.xlu1 %1080 }
 0x69a   : > { %v1082_v56 = vsub.f32 %v1073_v50, %v1081_v55 }
 0x69c   : > { %v1083_v57 = vmul.f32 1.442695, %v1082_v56 }
 0x69e   : > { %1520 = vpow2.f32 %v1083_v57 }
 0x6a8   : > { %v1521_v58 = vpop.eup %1520 }
 0x6a9   : > { %v1085_v59 = vsel %vm602_vm4, %v1521_v58, 0.0  ;;  %v1088_v60 = vpack.c.bf16 %v1521_v58, %v1521_v58 }
 0x6aa   : > { %1086 = vadd.xlane.f32.xlu1 %v1085_v59 }
 0x6ab   : > { %1461 = vmatmul.mubr.msk.bf16.vlgmr.msra.gmra.mrb[24].mxu0 %vm602_vm4, %v1088_v60 }
 0x6da   : > { %v1022_v62 = vpop.f32.mrb[20].mxu0 }
 0x6db   : > { %v1028_v63 = vadd.f32 %v1022_v62, %v1737_v21  ;;  %v1450_v0 = vpop.f32.mrb[21].mxu0 }
 0x6dc   : > { %v1025_v2 = vpop.f32.mrb[22].mxu0 }
 0x6dd   : > { %v1451_v3 = vpop.f32.mrb[23].mxu0 }
 0x737   : > { %v1087_v4 = vpop.xlane.xlu1 %1086 }
 0x738   : > { %1522 = vrcp.f32 %v1087_v4 }
 0x742   : > { %v1523_v5 = vpop.eup %1522 }
 0x77e   : > { %v1131_v7 = vpop.f32.mrb[24].mxu0 }
 0x77f   : > { %v1138_v8 = vmul.f32 %v1523_v5, %v1131_v7  ;;  %v1462_v9 = vpop.f32.mrb[25].mxu0 }
 0x780   : > { %v1134_v10 = vpop.f32.mrb[26].mxu0 }
 0x781   : > { %v1139_v11 = vpack.c.bf16 %v1138_v8, %v1138_v8  ;;  %v1463_v12 = vpop.f32.mrb[27].mxu0 }
 0x783   : > { %1467 = vmatmul.mubr.msk.bf16.vlgmr.msra.gmra.mrb[24].mxu1 %vm555_vm2, %v1139_v11 }
 0x856   : > { %v1180_v13 = vpop.f32.mrb[24].mxu1 }
 0x857   : > { %v1186_v15 = vadd.f32 %v1180_v13, %v1028_v63  ;;  %v1468_v16 = vpop.f32.mrb[25].mxu1 }
 0x858   : > { %v1183_v18 = vpop.f32.mrb[26].mxu1 }
 0x859   : > { %v1194_v19 = vadd.f32 %v1346_v14, %v1186_v15  ;;  %v1469_v21 = vpop.f32.mrb[27].mxu1 }
 0x85b   : > { %v1196_v22 = vadd.f32 %v1195_v17, %v1194_v19 }
 0x85d   : > { %v1199_v23 = vsel %vm433_vm1, %v1196_v22, 0.0 }
 0x85e   : > { %1200 = vadd.xlane.f32.xlu0 %v1199_v23 }
 0x8eb   : > { %v1201_v24 = vpop.xlane.xlu0 %1200 }
 0x8ec   : > { %v1203_v25 = vmul.f32 0.03125, %v1201_v24 }
 0x8ee   : > { %v1204_v26 = vsub.f32 %v1196_v22, %v1203_v25 }
 0x8f0   : > { %v1205_v27 = vmul.f32 %v1204_v26, %v1204_v26 }
 0x8f2   : > { %v1206_v28 = vsel %vm433_vm1, %v1205_v27, 0.0 }
 0x8f3   : > { %1207 = vadd.xlane.f32.xlu1 %v1206_v28 }
 0x980   : > { %v1208_v29 = vpop.xlane.xlu1 %1207 }
 0x981   : > { %v1209_v30 = vmul.f32 0.03125, %v1208_v29 }
 0x983   : > { %v1210_v31 = vadd.f32 1e-05, %v1209_v30 }
 0x985   : > { %1524 = vrsqrt.f32 %v1210_v31 }
 0x98f   : > { %v1525_v6 = vpop.eup %1524 }
 0x990   : > { %v1212_v33 = vmul.f32 %v1525_v6, %v1204_v26 }
 0x992   : > { %v1219_v35 = vmul.f32 %v1347_v32, %v1212_v33 }
 0x994   : > { %v1226_v36 = vadd.f32 %v1348_v34, %v1219_v35 }
 0x996   : > { %v1227_v37 = vpack.c.bf16 %v1226_v36, %v1226_v36 }
 0x998   : > { %1229 = vst.msk [vmem:[%s405_s30] sm:$0xf] %vm1228_vm6, %v1227_v37 }
 0x999 PF: > { %s20_s15 = sadd.s32 1, %s1548_s15   ;;  %s1807_s13 = smov %s1544_s14 }
 0x99a   : > { %p17_p5 = scmp.ge.s32.totalorder %s20_s15, 4   ;;  %s1808_s14 = smov %s1810_s16 }
 0x99c   :  { %19 = sbr.rel (!%p17_p5) target bundleno = 2 (0x2), region = 93 }

// kernel: _lambda_.5
= control target key start
LH: loop header
LB: loop body
LE: loop exit
PB: predicated region body
PF: predicated region fallthrough
CT: control target
= control target key end

     0   :  { %s2900_s24 = smov 0   ;;  %s3531_s0 = inlined_call_operand.vmem [shape: bf16[16,32], index: 0, kind: input, shape index: {}]   ;;  %s3532_s1 = inlined_call_operand.vmem [shape: bf16[32,2048], index: 1, kind: input, shape index: {}]   ;;  %s3533_s2 = inlined_call_operand.vmem [shape: f32[1,2048], index: 2, kind: input, shape index: {}]   ;;  %s3534_s3 = inlined_call_operand.vmem [shape: bf16[2048,32], index: 3, kind: input, shape index: {}]   ;;  %s3535_s4 = inlined_call_operand.vmem [shape: f32[1,32], index: 4, kind: input, shape index: {}]   ;;  %s3536_s5 = inlined_call_operand.vmem [shape: f32[1,32], index: 5, kind: input, shape index: {}]   ;;  %s3537_s6 = inlined_call_operand.vmem [shape: f32[1,32], index: 6, kind: input, shape index: {}]   ;;  %s3538_s7 = inlined_call_operand.vmem [shape: bf16[16,32], index: 7, kind: output, shape index: {}]  }
   0x1 LB: > { %s2355_s25 = sadd.s32 4294967295, %s2857_s24   ;;  %p2359_p0 = scmp.ge.s32.totalorder %s2857_s24, 1  ;;  %s2857_s24 = sphi %s2900_s24, %s17_s24  }
   0x2   : > { %p236_p1 = scmp.lt.s32.totalorder %s2857_s24, 3 }
   0x4   : > { %p237_p2 = pnand %p2359_p0, %p236_p1 }
   0x5   : > { %v276_v0 = vld [vmem:[%s3532_s1] sm:$0xff] (!%p237_p2)  ;;  %v277_v2 = vld [vmem:[%s3532_s1 + $0x8] sm:$0xff] (!%p237_p2)  ;;  %p2917_p3 = scmp.lt.s32.totalorder (!%p237_p2), %s2355_s25, 1  ;;  %v2859_v8 = vmov (!%p237_p2), 0   ;;  %v278_v14 = vld [vmem:[%s3532_s1 + $0x10] sm:$0xff] (!%p237_p2)  ;;  %vm552_vm0 = vcmask (!%p237_p2), 261120  }
   0x6   : > { %240 = sbr.rel (%p237_p2) target bundleno = 870 (0x366), region = 48  ;;  %v284_v1 = vld [vmem:[%s3532_s1 + $0x40] sm:$0xff] (!%p237_p2)  ;;  %v285_v4 = vld [vmem:[%s3532_s1 + $0x48] sm:$0xff] (!%p237_p2)  ;;  %588 = vmatprep.mubr.bf16.mxu0 (!%p237_p2), %v2859_v8  ;;  %629 = vmatprep.mubr.bf16.mxu1 (!%p237_p2), %v2859_v8  ;;  %v286_v16 = vld [vmem:[%s3532_s1 + $0x50] sm:$0xff] (!%p237_p2)  ;;  %vm2300_vm1 = vcmask (!%p237_p2), 257024  }
   0x7   : > { %v2363_v3 = vcombine.high (!%p237_p2), %v276_v0, %v284_v1  ;;  %v2362_v5 = vcombine.low (!%p237_p2), %v276_v0, %v284_v1  ;;  %v292_v6 = vld [vmem:[%s3532_s1 + $0x80] sm:$0xff] (!%p237_p2)  ;;  %v2365_v9 = vcombine.high (!%p237_p2), %v277_v2, %v285_v4  ;;  %v2364_v10 = vcombine.low (!%p237_p2), %v277_v2, %v285_v4  ;;  %v293_v12 = vld [vmem:[%s3532_s1 + $0x88] sm:$0xff] (!%p237_p2)  ;;  %v279_v17 = vld [vmem:[%s3532_s1 + $0x18] sm:$0xff] (!%p237_p2) }
   0x8   : > { %v300_v7 = vld [vmem:[%s3532_s1 + $0xc0] sm:$0xff] (!%p237_p2)  ;;  %v301_v13 = vld [vmem:[%s3532_s1 + $0xc8] sm:$0xff] (!%p237_p2)  ;;  %v287_v18 = vld [vmem:[%s3532_s1 + $0x58] sm:$0xff] (!%p237_p2)  ;;  %v2367_v21 = vcombine.high (!%p237_p2), %v278_v14, %v286_v16  ;;  %v2366_v28 = vcombine.low (!%p237_p2), %v278_v14, %v286_v16 }
   0x9   : > { %v2379_v11 = vcombine.high (!%p237_p2), %v292_v6, %v300_v7  ;;  %556 = vmatprep.subr.bf16.mxu0 (!%p237_p2), %v2363_v3  ;;  %v2381_v15 = vcombine.high (!%p237_p2), %v293_v12, %v301_v13  ;;  %597 = vmatprep.subr.bf16.mxu1 (!%p237_p2), %v2365_v9  ;;  %v2378_v19 = vcombine.low (!%p237_p2), %v292_v6, %v300_v7  ;;  %v294_v23 = vld [vmem:[%s3532_s1 + $0x90] sm:$0xff] (!%p237_p2)  ;;  %v295_v25 = vld [vmem:[%s3532_s1 + $0x98] sm:$0xff] (!%p237_p2)  ;;  %v280_v32 = vld [vmem:[%s3532_s1 + $0x20] sm:$0xff] (!%p237_p2) }
   0xa   : > { %557 = vmatpush1.bf16.msra.mxu0 (!%p237_p2), %v2362_v5  ;;  %598 = vmatpush1.bf16.msra.mxu1 (!%p237_p2), %v2364_v10  ;;  %v2380_v20 = vcombine.low (!%p237_p2), %v293_v12, %v301_v13  ;;  %v2369_v22 = vcombine.high (!%p237_p2), %v279_v17, %v287_v18  ;;  %v302_v24 = vld [vmem:[%s3532_s1 + $0xd0] sm:$0xff] (!%p237_p2)  ;;  %v303_v26 = vld [vmem:[%s3532_s1 + $0xd8] sm:$0xff] (!%p237_p2)  ;;  %v2368_v29 = vcombine.low (!%p237_p2), %v279_v17, %v287_v18  ;;  %v288_v33 = vld [vmem:[%s3532_s1 + $0x60] sm:$0xff] (!%p237_p2) }
   0xb   : > { %558 = vmatprep.subr.bf16.mxu0 (!%p237_p2), %v2379_v11  ;;  %599 = vmatprep.subr.bf16.mxu1 (!%p237_p2), %v2381_v15  ;;  %v2383_v30 = vcombine.high (!%p237_p2), %v294_v23, %v302_v24  ;;  %v2385_v31 = vcombine.high (!%p237_p2), %v295_v25, %v303_v26  ;;  %v281_v34 = vld [vmem:[%s3532_s1 + $0x28] sm:$0xff] (!%p237_p2)  ;;  %v2382_v36 = vcombine.low (!%p237_p2), %v294_v23, %v302_v24  ;;  %v296_v37 = vld [vmem:[%s3532_s1 + $0xa0] sm:$0xff] (!%p237_p2)  ;;  %v282_v45 = vld [vmem:[%s3532_s1 + $0x30] sm:$0xff] (!%p237_p2) }
   0xc   : > { %v289_v35 = vld [vmem:[%s3532_s1 + $0x68] sm:$0xff] (!%p237_p2)  ;;  %v2384_v38 = vcombine.low (!%p237_p2), %v295_v25, %v303_v26  ;;  %v2371_v39 = vcombine.high (!%p237_p2), %v280_v32, %v288_v33  ;;  %v304_v40 = vld [vmem:[%s3532_s1 + $0xe0] sm:$0xff] (!%p237_p2)  ;;  %v2370_v44 = vcombine.low (!%p237_p2), %v280_v32, %v288_v33  ;;  %v290_v48 = vld [vmem:[%s3532_s1 + $0x70] sm:$0xff] (!%p237_p2) }
   0xd   : > { %s3541_s25 = smov (!%p2917_p3, %s2355_s25), 1  ;;  %v2373_v41 = vcombine.high %v281_v34, %v289_v35  ;;  %v297_v42 = vld [vmem:[%s3532_s1 + $0xa8] sm:$0xff]  ;;  %v2372_v46 = vcombine.low %v281_v34, %v289_v35  ;;  %v2387_v47 = vcombine.high %v296_v37, %v304_v40  ;;  %v283_v50 = vld [vmem:[%s3532_s1 + $0x38] sm:$0xff]  ;;  %v2386_v52 = vcombine.low %v296_v37, %v304_v40  ;;  %v298_v53 = vld [vmem:[%s3532_s1 + $0xb0] sm:$0xff] }
   0xe   : > { %s2360_s30 = sshll.u32 %s3541_s25, 2  ;;  %559 = vmatpush1.bf16.msra.mxu0 %v2378_v19  ;;  %600 = vmatpush1.bf16.msra.mxu1 %v2380_v20  ;;  %v305_v43 = vld [vmem:[%s3532_s1 + $0xe8] sm:$0xff]  ;;  %v291_v51 = vld [vmem:[%s3532_s1 + $0x78] sm:$0xff]  ;;  %v2375_v55 = vcombine.high %v282_v45, %v290_v48  ;;  %v306_v56 = vld [vmem:[%s3532_s1 + $0xf0] sm:$0xff]  ;;  %v2374_v60 = vcombine.low %v282_v45, %v290_v48 }
   0xf   : > { %s2960_s10 = scalar_lea.vmem %s3531_s0, %s2360_s30  ;;  %638 = vmatprep.subr.bf16.mxu0 %v2367_v21  ;;  %679 = vmatprep.subr.bf16.mxu1 %v2369_v22  ;;  %v2389_v49 = vcombine.high %v297_v42, %v305_v43  ;;  %v2388_v54 = vcombine.low %v297_v42, %v305_v43  ;;  %v2377_v57 = vcombine.high %v283_v50, %v291_v51  ;;  %v299_v58 = vld [vmem:[%s3532_s1 + $0xb8] sm:$0xff]  ;;  %v2720_v1 = vld [vmem:[%s3534_s3 + $0x40] sm:$0xff]   ;;  %v2724_v6 = vld [vmem:[%s3534_s3 + $0x48] sm:$0xff]   ;;  %s273_s14 = scalar_lea.vmem %s3538_s7, %s2360_s30 }
  0x10   : > { %v2975_v27 = vld [vmem:[%s2960_s10] sm:$0xf]  ;;  %v307_v59 = vld [vmem:[%s3532_s1 + $0xf8] sm:$0xff]  ;;  %v2376_v61 = vcombine.low %v283_v50, %v291_v51  ;;  %v2391_v62 = vcombine.high %v298_v53, %v306_v56  ;;  %v2390_v0 = vcombine.low %v298_v53, %v306_v56  ;;  %v2725_v7 = vld [vmem:[%s3534_s3 + $0xc8] sm:$0xff]  }
  0x11   : > { %2394 = vmatmul.mubr.msk.bf16.vlgmr.msra.gmra.mrb[0].mxu0 %vm552_vm0, %v2975_v27  ;;  %2395 = vmatmul.mubr.msk.bf16.vlgmr.msra.gmra.mrb[0].mxu1 %vm552_vm0, %v2975_v27  ;;  %v2393_v63 = vcombine.high %v299_v58, %v307_v59  ;;  %v2392_v2 = vcombine.low %v299_v58, %v307_v59  ;;  %v2721_v3 = vld [vmem:[%s3534_s3 + $0xc0] sm:$0xff]   ;;  %v2727_v9 = vld [vmem:[%s3534_s3 + $0x88] sm:$0xff]   ;;  %v2728_v10 = vld [vmem:[%s3534_s3 + $0x50] sm:$0xff]  }
  0x12   : > { %639 = vmatpush1.bf16.msra.mxu0 %v2366_v28  ;;  %680 = vmatpush1.bf16.msra.mxu1 %v2368_v29  ;;  %v2722_v4 = vld [vmem:[%s3534_s3] sm:$0xff]   ;;  %v2729_v11 = vld [vmem:[%s3534_s3 + $0xd0] sm:$0xff]   ;;  %v2732_v14 = vld [vmem:[%s3534_s3 + $0x58] sm:$0xff]  }
  0x13   : > { %640 = vmatprep.subr.bf16.mxu0 %v2383_v30  ;;  %681 = vmatprep.subr.bf16.mxu1 %v2385_v31  ;;  %v2723_v5 = vld [vmem:[%s3534_s3 + $0x80] sm:$0xff]   ;;  %v2730_v12 = vld [vmem:[%s3534_s3 + $0x10] sm:$0xff]   ;;  %v2733_v15 = vld [vmem:[%s3534_s3 + $0xd8] sm:$0xff]  }
  0x14   : > { %670 = vmatprep.mubr.bf16.mxu0 %v2859_v8  ;;  %711 = vmatprep.mubr.bf16.mxu1 %v2859_v8  ;;  %v2731_v13 = vld [vmem:[%s3534_s3 + $0x90] sm:$0xff]   ;;  %v2734_v16 = vld [vmem:[%s3534_s3 + $0x18] sm:$0xff]   ;;  %v2736_v18 = vld [vmem:[%s3534_s3 + $0x60] sm:$0xff]  }
  0x15   : > { %v2735_v17 = vld [vmem:[%s3534_s3 + $0x98] sm:$0xff]   ;;  %v2737_v19 = vld [vmem:[%s3534_s3 + $0xe0] sm:$0xff]   ;;  %v2740_v22 = vld [vmem:[%s3534_s3 + $0x68] sm:$0xff]  }
  0x16   : > { %641 = vmatpush1.bf16.msra.mxu0 %v2382_v36  ;;  %682 = vmatpush1.bf16.msra.mxu1 %v2384_v38  ;;  %v2738_v20 = vld [vmem:[%s3534_s3 + $0x20] sm:$0xff]   ;;  %v2741_v23 = vld [vmem:[%s3534_s3 + $0xe8] sm:$0xff]   ;;  %v2744_v26 = vld [vmem:[%s3534_s3 + $0x70] sm:$0xff]   ;;  %v312_v36 = vlaneseq }
  0x17   : > { %720 = vmatprep.subr.bf16.mxu0 %v2371_v39  ;;  %761 = vmatprep.subr.bf16.mxu1 %v2373_v41  ;;  %v2739_v21 = vld [vmem:[%s3534_s3 + $0xa0] sm:$0xff]   ;;  %v2742_v24 = vld [vmem:[%s3534_s3 + $0x28] sm:$0xff]   ;;  %v2746_v28 = vld [vmem:[%s3534_s3 + $0x30] sm:$0xff]  }
  0x18   : > { %v2743_v25 = vld [vmem:[%s3534_s3 + $0xa8] sm:$0xff]   ;;  %v2747_v29 = vld [vmem:[%s3534_s3 + $0xb0] sm:$0xff]   ;;  %v2748_v30 = vld [vmem:[%s3534_s3 + $0x78] sm:$0xff]   ;;  %v3149_v37 = vshrl.u32 %v312_v36, 7 }
  0x19   : > { %2396 = vmatmul.mubr.msk.bf16.vlgmr.msra.gmra.mrb[4].mxu0 %vm552_vm0, %v2975_v27  ;;  %2397 = vmatmul.mubr.msk.bf16.vlgmr.msra.gmra.mrb[4].mxu1 %vm552_vm0, %v2975_v27  ;;  %v2749_v31 = vld [vmem:[%s3534_s3 + $0xf8] sm:$0xff]   ;;  %v2752_v34 = vld [vmem:[%s3534_s3 + $0x140] sm:$0xff]  }
  0x1a   : > { %721 = vmatpush1.bf16.msra.mxu0 %v2370_v44  ;;  %762 = vmatpush1.bf16.msra.mxu1 %v2372_v46  ;;  %v2750_v32 = vld [vmem:[%s3534_s3 + $0x38] sm:$0xff]   ;;  %v2753_v35 = vld [vmem:[%s3534_s3 + $0x1c0] sm:$0xff]   ;;  %v314_v38 = vsub.s32 0, %v3149_v37  ;;  %v322_v40 = vsub.s32 2, %v3149_v37  ;;  %v318_v41 = vsub.s32 1, %v3149_v37  ;;  %v326_v42 = vsub.s32 3, %v3149_v37 }
  0x1b   : > { %722 = vmatprep.subr.bf16.mxu0 %v2387_v47  ;;  %763 = vmatprep.subr.bf16.mxu1 %v2389_v49  ;;  %v2751_v33 = vld [vmem:[%s3534_s3 + $0xb8] sm:$0xff]   ;;  %v3155_v39 = vld [vmem:[%s3533_s2] sm:$0xff] }
  0x1c   : > { %752 = vmatprep.mubr.bf16.mxu0 %v2859_v8  ;;  %793 = vmatprep.mubr.bf16.mxu1 %v2859_v8  ;;  %v315_v43 = vrot.slane %v3155_v39, %v314_v38  ;;  %v323_v44 = vrot.slane %v3155_v39, %v322_v40  ;;  %v319_v45 = vrot.slane %v3155_v39, %v318_v41 }
  0x1d   : > { %v327_v46 = vrot.slane %v3155_v39, %v326_v42 }
  0x1e   : > { %723 = vmatpush1.bf16.msra.mxu0 %v2386_v52  ;;  %764 = vmatpush1.bf16.msra.mxu1 %v2388_v54 }
  0x1f   : > { %802 = vmatprep.subr.bf16.mxu0 %v2375_v55  ;;  %843 = vmatprep.subr.bf16.mxu1 %v2377_v57  ;;  %v334_v55 = vsub.s32 5, %v3149_v37 }
  0x21   : > { %2398 = vmatmul.mubr.msk.bf16.vlgmr.msra.gmra.mrb[8].mxu0 %vm552_vm0, %v2975_v27  ;;  %2399 = vmatmul.mubr.msk.bf16.vlgmr.msra.gmra.mrb[8].mxu1 %vm552_vm0, %v2975_v27 }
  0x22   : > { %803 = vmatpush1.bf16.msra.mxu0 %v2374_v60  ;;  %844 = vmatpush1.bf16.msra.mxu1 %v2376_v61  ;;  %v342_v60 = vsub.s32 7, %v3149_v37 }
  0x23   : > { %804 = vmatprep.subr.bf16.mxu0 %v2391_v62  ;;  %845 = vmatprep.subr.bf16.mxu1 %v2393_v63 }
  0x24   : > { %834 = vmatprep.mubr.bf16.mxu0 %v2859_v8  ;;  %875 = vmatprep.mubr.bf16.mxu1 %v2859_v8  ;;  %v2726_v8 = vld [vmem:[%s3534_s3 + $0x8] sm:$0xff]  }
  0x26   : > { %805 = vmatpush1.bf16.msra.mxu0 %v2390_v0  ;;  %846 = vmatpush1.bf16.msra.mxu1 %v2392_v2 }
  0x27   : > { %2535 = vmatprep.subr.bf16.mxu0 %v2720_v1  ;;  %2557 = vmatprep.subr.bf16.mxu1 %v2721_v3  ;;  %v2754_v3 = vld [vmem:[%s3534_s3 + $0x100] sm:$0xff]  }
  0x29   : > { %2400 = vmatmul.mubr.msk.bf16.vlgmr.msra.gmra.mrb[12].mxu0 %vm552_vm0, %v2975_v27  ;;  %2401 = vmatmul.mubr.msk.bf16.vlgmr.msra.gmra.mrb[12].mxu1 %vm552_vm0, %v2975_v27  ;;  %v2745_v27 = vld [vmem:[%s3534_s3 + $0xf0] sm:$0xff]  }
  0x2a   : > { %2536 = vmatpush3.bf16.msra.mxu0 %v2722_v4  ;;  %2558 = vmatpush3.bf16.msra.mxu1 %v2723_v5  ;;  %v335_v4 = vrot.slane %v3155_v39, %v334_v55 }
  0x2b   : > { %2537 = vmatprep.subr.bf16.mxu0 %v2724_v6  ;;  %2559 = vmatprep.subr.bf16.mxu1 %v2725_v7  ;;  %v2755_v7 = vld [vmem:[%s3534_s3 + $0x180] sm:$0xff]  }
  0x2e   : > { %2538 = vmatpush3.bf16.msra.mxu0 %v2726_v8  ;;  %2560 = vmatpush3.bf16.msra.mxu1 %v2727_v9  ;;  %v2756_v8 = vld [vmem:[%s3534_s3 + $0x148] sm:$0xff]   ;;  %v343_v9 = vrot.slane %v3155_v39, %v342_v60 }
  0x2f   : > { %2539 = vmatprep.subr.bf16.mxu0 %v2728_v10  ;;  %2561 = vmatprep.subr.bf16.mxu1 %v2729_v11  ;;  %v2757_v10 = vld [vmem:[%s3534_s3 + $0x1c8] sm:$0xff]  }
  0x32   : > { %2540 = vmatpush3.bf16.msra.mxu0 %v2730_v12  ;;  %2562 = vmatpush3.bf16.msra.mxu1 %v2731_v13 }
  0x33   : > { %2541 = vmatprep.subr.bf16.mxu0 %v2732_v14  ;;  %2563 = vmatprep.subr.bf16.mxu1 %v2733_v15  ;;  %v2758_v14 = vld [vmem:[%s3534_s3 + $0x108] sm:$0xff]  }
  0x36   : > { %2542 = vmatpush3.bf16.msra.mxu0 %v2734_v16  ;;  %2564 = vmatpush3.bf16.msra.mxu1 %v2735_v17 }
  0x37   : > { %2543 = vmatprep.subr.bf16.mxu0 %v2736_v18  ;;  %2565 = vmatprep.subr.bf16.mxu1 %v2737_v19  ;;  %v3200_v18 = vld [vmem:[%s3533_s2 + $0x8] sm:$0xff] }
  0x38   : > { %v2759_v19 = vld [vmem:[%s3534_s3 + $0x188] sm:$0xff]  }
  0x3a   : > { %2544 = vmatpush3.bf16.msra.mxu0 %v2738_v20  ;;  %2566 = vmatpush3.bf16.msra.mxu1 %v2739_v21  ;;  %v2760_v20 = vld [vmem:[%s3534_s3 + $0x150] sm:$0xff]  }
  0x3b   : > { %2545 = vmatprep.subr.bf16.mxu0 %v2740_v22  ;;  %2567 = vmatprep.subr.bf16.mxu1 %v2741_v23 }
  0x3e   : > { %2546 = vmatpush3.bf16.msra.mxu0 %v2742_v24  ;;  %2568 = vmatpush3.bf16.msra.mxu1 %v2743_v25  ;;  %v2761_v24 = vld [vmem:[%s3534_s3 + $0x1d0] sm:$0xff]  }
  0x3f   : > { %2547 = vmatprep.subr.bf16.mxu0 %v2744_v26  ;;  %2569 = vmatprep.subr.bf16.mxu1 %v2745_v27 }
  0x42   : > { %2548 = vmatpush3.bf16.msra.mxu0 %v2746_v28  ;;  %2570 = vmatpush3.bf16.msra.mxu1 %v2747_v29  ;;  %v347_v28 = vrot.slane %v3200_v18, %v314_v38  ;;  %v2762_v29 = vld [vmem:[%s3534_s3 + $0x110] sm:$0xff]  }
  0x43   : > { %2549 = vmatprep.subr.bf16.mxu0 %v2748_v30  ;;  %2571 = vmatprep.subr.bf16.mxu1 %v2749_v31  ;;  %v355_v31 = vrot.slane %v3200_v18, %v322_v40 }
  0x46   : > { %2550 = vmatpush3.bf16.msra.mxu0 %v2750_v32  ;;  %2572 = vmatpush3.bf16.msra.mxu1 %v2751_v33  ;;  %v2763_v32 = vld [vmem:[%s3534_s3 + $0x190] sm:$0xff]   ;;  %v2764_v33 = vld [vmem:[%s3534_s3 + $0x158] sm:$0xff]  }
  0x47   : > { %2579 = vmatprep.subr.bf16.mxu0 %v2752_v34  ;;  %2601 = vmatprep.subr.bf16.mxu1 %v2753_v35  ;;  %v2765_v35 = vld [vmem:[%s3534_s3 + $0x1d8] sm:$0xff]  }
  0xe4   : > { %v590_v47 = vpop.f32.mrb[0].mxu0  ;;  %v631_v49 = vpop.f32.mrb[0].mxu1 }
  0xe5   : > { %v591_v48 = vadd.f32 %v590_v47, %v315_v43  ;;  %v592_v50 = vpop.f32.mrb[1].mxu0  ;;  %v632_v51 = vadd.f32 %v631_v49, %v323_v44  ;;  %v633_v53 = vpop.f32.mrb[1].mxu1  ;;  %v2766_v44 = vld [vmem:[%s3534_s3 + $0x118] sm:$0xff]   ;;  %v2768_v49 = vld [vmem:[%s3534_s3 + $0x160] sm:$0xff]  }
  0xe6   : > { %v593_v52 = vadd.f32 %v592_v50, %v319_v45  ;;  %v594_v54 = vpop.f32.mrb[2].mxu0  ;;  %v634_v57 = vadd.f32 %v633_v53, %v327_v46  ;;  %v635_v58 = vpop.f32.mrb[2].mxu1  ;;  %v330_v50 = vsub.s32 4, %v3149_v37  ;;  %v2769_v53 = vld [vmem:[%s3534_s3 + $0x1e0] sm:$0xff]  }
  0xe7   : > { %v884_v56 = vmax.f32 %v591_v48, 0.0  ;;  %v595_v59 = vpop.f32.mrb[3].mxu0  ;;  %v886_v61 = vmax.f32 %v632_v51, 0.0  ;;  %v636_v63 = vpop.f32.mrb[3].mxu1  ;;  %v2767_v48 = vld [vmem:[%s3534_s3 + $0x198] sm:$0xff]   ;;  %v338_v54 = vsub.s32 6, %v3149_v37 }
  0xe8   : > { %v885_v62 = vmax.f32 %v593_v52, 0.0  ;;  %v887_v0 = vmax.f32 %v634_v57, 0.0  ;;  %v363_v57 = vrot.slane %v3200_v18, %v330_v50  ;;  %v2770_v58 = vld [vmem:[%s3534_s3 + $0x120] sm:$0xff]   ;;  %v2773_v63 = vld [vmem:[%s3534_s3 + $0x1e8] sm:$0xff]   ;;  %v2813_v37 = vld [vmem:[%s3534_s3 + $0x2f8] sm:$0xff]  }
  0xe9   : > { %v902_v1 = vpack.c.bf16 %v886_v61, %v886_v61  ;;  %v900_v5 = vpack.c.bf16 %v884_v56, %v884_v56  ;;  %v371_v59 = vrot.slane %v3200_v18, %v338_v54  ;;  %v2771_v61 = vld [vmem:[%s3534_s3 + $0x1a0] sm:$0xff]  }
  0xea   : > { %v901_v2 = vpack.c.bf16 %v885_v62, %v885_v62  ;;  %v903_v6 = vpack.c.bf16 %v887_v0, %v887_v0  ;;  %v2772_v62 = vld [vmem:[%s3534_s3 + $0x168] sm:$0xff]  }
  0xec   : > { %1979 = vmatprep.mubr.bf16.mxu0 %v901_v2  ;;  %v3190_v11 = vpop.f32.mrb[4].mxu0  ;;  %2019 = vmatprep.mubr.bf16.mxu1 %v903_v6  ;;  %v3192_v13 = vpop.f32.mrb[4].mxu1  ;;  %v339_v6 = vrot.slane %v3155_v39, %v338_v54  ;;  %v2798_v54 = vld [vmem:[%s3534_s3 + $0x218] sm:$0xff]  }
  0xed   : > { %1980 = vmatmul.mubr.bf16.vlgmr.msra.gmra.mrb[16].mxu0 %v900_v5  ;;  %v674_v12 = vpop.f32.mrb[5].mxu0  ;;  %2020 = vmatmul.mubr.bf16.vlgmr.msra.gmra.mrb[16].mxu1 %v902_v1  ;;  %v715_v17 = vpop.f32.mrb[5].mxu1  ;;  %v331_v1 = vrot.slane %v3155_v39, %v330_v50  ;;  %v2774_v5 = vld [vmem:[%s3534_s3 + $0x128] sm:$0xff]   ;;  %v2777_v39 = vld [vmem:[%s3534_s3 + $0x1f0] sm:$0xff]  }
  0xee   : > { %2580 = vmatpush3.bf16.msra.mxu0 %v2754_v3  ;;  %v675_v15 = vadd.f32 %v674_v12, %v335_v4  ;;  %v676_v16 = vpop.f32.mrb[6].mxu0  ;;  %2602 = vmatpush3.bf16.msra.mxu1 %v2755_v7  ;;  %v716_v22 = vadd.f32 %v715_v17, %v343_v9  ;;  %v717_v23 = vpop.f32.mrb[6].mxu1  ;;  %v2776_v12 = vld [vmem:[%s3534_s3 + $0x170] sm:$0xff]  }
  0xef   : > { %2581 = vmatprep.subr.bf16.mxu0 %v2756_v8  ;;  %v677_v21 = vpop.f32.mrb[7].mxu0  ;;  %2603 = vmatprep.subr.bf16.mxu1 %v2757_v10  ;;  %v718_v26 = vpop.f32.mrb[7].mxu1  ;;  %v2775_v10 = vld [vmem:[%s3534_s3 + $0x1a8] sm:$0xff]   ;;  %v351_v16 = vrot.slane %v3200_v18, %v318_v41  ;;  %v2779_v41 = vld [vmem:[%s3534_s3 + $0x1b0] sm:$0xff]  }
  0xf0   : > { %v889_v25 = vmax.f32 %v675_v15, 0.0  ;;  %v891_v27 = vmax.f32 %v716_v22, 0.0  ;;  %v714_v21 = vadd.f32 %v3192_v13, %v339_v6  ;;  %v2778_v22 = vld [vmem:[%s3534_s3 + $0x130] sm:$0xff]   ;;  %v2782_v26 = vld [vmem:[%s3534_s3 + $0x138] sm:$0xff]   ;;  %v367_v6 = vrot.slane %v3200_v18, %v334_v55 }
  0xf1   : > { %v2794_v50 = vld [vmem:[%s3534_s3 + $0x210] sm:$0xff]  }
  0xf2   : > { %2582 = vmatpush3.bf16.msra.mxu0 %v2758_v14  ;;  %v905_v30 = vpack.c.bf16 %v889_v25, %v889_v25  ;;  %2604 = vmatpush3.bf16.msra.mxu1 %v2759_v19  ;;  %v907_v34 = vpack.c.bf16 %v891_v27, %v891_v27  ;;  %v673_v19 = vadd.f32 %v3190_v11, %v331_v1  ;;  %v2780_v11 = vld [vmem:[%s3534_s3 + $0x178] sm:$0xff]   ;;  %v890_v25 = vmax.f32 %v714_v21, 0.0  ;;  %v2807_v1 = vld [vmem:[%s3534_s3 + $0x2a8] sm:$0xff]   ;;  %v2819_v21 = vld [vmem:[%s3534_s3 + $0x380] sm:$0xff]  }
  0xf3   : > { %2583 = vmatprep.subr.bf16.mxu0 %v2760_v20  ;;  %2605 = vmatprep.subr.bf16.mxu1 %v2761_v24  ;;  %v359_v20 = vrot.slane %v3200_v18, %v326_v42  ;;  %v2781_v42 = vld [vmem:[%s3534_s3 + $0x1f8] sm:$0xff]  }
  0xf4   : > { %2059 = vmatprep.mubr.bf16.mxu0 %v905_v30  ;;  %v754_v36 = vpop.f32.mrb[8].mxu0  ;;  %2099 = vmatprep.mubr.bf16.mxu1 %v907_v34  ;;  %v795_v43 = vpop.f32.mrb[8].mxu1  ;;  %v888_v23 = vmax.f32 %v673_v19, 0.0  ;;  %v2783_v27 = vld [vmem:[%s3534_s3 + $0x1b8] sm:$0xff]   ;;  %v2786_v34 = vld [vmem:[%s3534_s3 + $0x200] sm:$0xff]  }
  0xf5   : > { %v3227_v38 = vadd.f32 %v754_v36, %v347_v28  ;;  %v756_v40 = vpop.f32.mrb[9].mxu0  ;;  %v3232_v46 = vadd.f32 %v795_v43, %v355_v31  ;;  %v797_v47 = vpop.f32.mrb[9].mxu1  ;;  %v2784_v28 = vld [vmem:[%s3534_s3 + $0x240] sm:$0xff]   ;;  %v2788_v36 = vld [vmem:[%s3534_s3 + $0x248] sm:$0xff]  }
  0xf6   : > { %2584 = vmatpush3.bf16.msra.mxu0 %v2762_v29  ;;  %v758_v45 = vpop.f32.mrb[10].mxu0  ;;  %2606 = vmatpush3.bf16.msra.mxu1 %v2763_v32  ;;  %v799_v52 = vpop.f32.mrb[10].mxu1  ;;  %v757_v13 = vadd.f32 %v756_v40, %v351_v16  ;;  %v798_v24 = vadd.f32 %v797_v47, %v359_v20  ;;  %v2785_v29 = vld [vmem:[%s3534_s3 + $0x2c0] sm:$0xff]   ;;  %v904_v31 = vpack.c.bf16 %v888_v23, %v888_v23  ;;  %v2789_v40 = vld [vmem:[%s3534_s3 + $0x2c8] sm:$0xff]   ;;  %v2815_v16 = vld [vmem:[%s3534_s3 + $0x2b8] sm:$0xff]  }
  0xf7   : > { %2585 = vmatprep.subr.bf16.mxu0 %v2764_v33  ;;  %v759_v51 = vpop.f32.mrb[11].mxu0  ;;  %2607 = vmatprep.subr.bf16.mxu1 %v2765_v35  ;;  %v800_v56 = vpop.f32.mrb[11].mxu1  ;;  %v906_v33 = vpack.c.bf16 %v890_v25, %v890_v25  ;;  %v2787_v35 = vld [vmem:[%s3534_s3 + $0x280] sm:$0xff]   ;;  %v2790_v45 = vld [vmem:[%s3534_s3 + $0x208] sm:$0xff]   ;;  %v2796_v52 = vld [vmem:[%s3534_s3 + $0x258] sm:$0xff]  }
  0xf8   : > { %v893_v30 = vmax.f32 %v757_v13, 0.0  ;;  %v895_v32 = vmax.f32 %v798_v24, 0.0  ;;  %v2791_v47 = vld [vmem:[%s3534_s3 + $0x288] sm:$0xff]   ;;  %v2795_v51 = vld [vmem:[%s3534_s3 + $0x290] sm:$0xff]   ;;  %v2799_v56 = vld [vmem:[%s3534_s3 + $0x298] sm:$0xff]  }
  0xf9   : > { %v2818_v20 = vld [vmem:[%s3534_s3 + $0x300] sm:$0xff]   ;;  %v2822_v13 = vld [vmem:[%s3534_s3 + $0x308] sm:$0xff]   ;;  %v2824_v24 = vld [vmem:[%s3534_s3 + $0x350] sm:$0xff]  }
  0xfa   : > { %2586 = vmatpush3.bf16.msra.mxu0 %v2766_v44  ;;  %2608 = vmatpush3.bf16.msra.mxu1 %v2767_v48  ;;  %v909_v43 = vpack.c.bf16 %v893_v30, %v893_v30  ;;  %v911_v44 = vpack.c.bf16 %v895_v32, %v895_v32  ;;  %v2792_v48 = vld [vmem:[%s3534_s3 + $0x250] sm:$0xff]   ;;  %v2823_v23 = vld [vmem:[%s3534_s3 + $0x388] sm:$0xff]   ;;  %v2830_v30 = vld [vmem:[%s3534_s3 + $0x318] sm:$0xff]  }
  0xfb   : > { %2587 = vmatprep.subr.bf16.mxu0 %v2768_v49  ;;  %2609 = vmatprep.subr.bf16.mxu1 %v2769_v53  ;;  %v2793_v49 = vld [vmem:[%s3534_s3 + $0x2d0] sm:$0xff]   ;;  %v2797_v53 = vld [vmem:[%s3534_s3 + $0x2d8] sm:$0xff]   ;;  %v2832_v32 = vld [vmem:[%s3534_s3 + $0x360] sm:$0xff]  }
  0xfc   : > { %v836_v0 = vpop.f32.mrb[12].mxu0  ;;  %v877_v4 = vpop.f32.mrb[12].mxu1  ;;  %v2825_v25 = vld [vmem:[%s3534_s3 + $0x3d0] sm:$0xff]  }
  0xfd   : > { %v3260_v2 = vadd.f32 %v836_v0, %v363_v57  ;;  %v3262_v3 = vpop.f32.mrb[13].mxu0  ;;  %v3268_v8 = vadd.f32 %v877_v4, %v371_v59  ;;  %v3270_v9 = vpop.f32.mrb[13].mxu1  ;;  %v2800_v57 = vld [vmem:[%s3534_s3 + $0x260] sm:$0xff]   ;;  %v2806_v0 = vld [vmem:[%s3534_s3 + $0x228] sm:$0xff]   ;;  %v2808_v4 = vld [vmem:[%s3534_s3 + $0x270] sm:$0xff]  }
  0xfe   : > { %2588 = vmatpush3.bf16.msra.mxu0 %v2770_v58  ;;  %v840_v7 = vpop.f32.mrb[14].mxu0  ;;  %2610 = vmatpush3.bf16.msra.mxu1 %v2771_v61  ;;  %v881_v15 = vpop.f32.mrb[14].mxu1  ;;  %v2801_v58 = vld [vmem:[%s3534_s3 + $0x2e0] sm:$0xff]   ;;  %v839_v55 = vadd.f32 %v3262_v3, %v367_v6 }
  0xff   : > { %2589 = vmatprep.subr.bf16.mxu0 %v2772_v62  ;;  %v841_v14 = vpop.f32.mrb[15].mxu0  ;;  %2611 = vmatprep.subr.bf16.mxu1 %v2773_v63  ;;  %v882_v17 = vpop.f32.mrb[15].mxu1  ;;  %v2802_v59 = vld [vmem:[%s3534_s3 + $0x220] sm:$0xff]   ;;  %v2804_v62 = vld [vmem:[%s3534_s3 + $0x268] sm:$0xff]   ;;  %v375_v7 = vrot.slane %v3200_v18, %v342_v60  ;;  %v892_v60 = vmax.f32 %v3227_v38, 0.0  ;;  %v894_v15 = vmax.f32 %v3232_v46, 0.0 }
 0x100   : > { %v2803_v61 = vld [vmem:[%s3534_s3 + $0x2a0] sm:$0xff]   ;;  %v2805_v63 = vld [vmem:[%s3534_s3 + $0x2e8] sm:$0xff]   ;;  %v2812_v14 = vld [vmem:[%s3534_s3 + $0x278] sm:$0xff]   ;;  %v897_v46 = vmax.f32 %v839_v55, 0.0 }
 0x101   : > { %v880_v18 = vadd.f32 %v3270_v9, %v375_v7  ;;  %v2816_v3 = vld [vmem:[%s3534_s3 + $0x340] sm:$0xff]   ;;  %v908_v9 = vpack.c.bf16 %v892_v60, %v892_v60  ;;  %v910_v19 = vpack.c.bf16 %v894_v15, %v894_v15 }
 0x102   : > { %2590 = vmatpush3.bf16.msra.mxu0 %v2774_v5  ;;  %2612 = vmatpush3.bf16.msra.mxu1 %v2775_v10  ;;  %v2809_v5 = vld [vmem:[%s3534_s3 + $0x2f0] sm:$0xff]   ;;  %v2817_v38 = vld [vmem:[%s3534_s3 + $0x3c0] sm:$0xff]  }
 0x103   : > { %2591 = vmatprep.subr.bf16.mxu0 %v2776_v12  ;;  %2613 = vmatprep.subr.bf16.mxu1 %v2777_v39  ;;  %v2810_v10 = vld [vmem:[%s3534_s3 + $0x230] sm:$0xff]   ;;  %v2814_v39 = vld [vmem:[%s3534_s3 + $0x238] sm:$0xff]   ;;  %v899_v17 = vmax.f32 %v880_v18, 0.0 }
 0x104   : > { %v2811_v12 = vld [vmem:[%s3534_s3 + $0x2b0] sm:$0xff]  }
 0x106   : > { %2592 = vmatpush3.bf16.msra.mxu0 %v2778_v22  ;;  %2614 = vmatpush3.bf16.msra.mxu1 %v2779_v41  ;;  %v2820_v22 = vld [vmem:[%s3534_s3 + $0x348] sm:$0xff]  }
 0x107   : > { %2593 = vmatprep.subr.bf16.mxu0 %v2780_v11  ;;  %2615 = vmatprep.subr.bf16.mxu1 %v2781_v42  ;;  %v2821_v41 = vld [vmem:[%s3534_s3 + $0x3c8] sm:$0xff]   ;;  %v913_v11 = vpack.c.bf16 %v897_v46, %v897_v46  ;;  %v915_v42 = vpack.c.bf16 %v899_v17, %v899_v17 }
 0x10a   : > { %2594 = vmatpush3.bf16.msra.mxu0 %v2782_v26  ;;  %2616 = vmatpush3.bf16.msra.mxu1 %v2783_v27  ;;  %v2826_v26 = vld [vmem:[%s3534_s3 + $0x310] sm:$0xff]  }
 0x10b   : > { %2623 = vmatprep.subr.bf16.mxu0 %v2784_v28  ;;  %2645 = vmatprep.subr.bf16.mxu1 %v2785_v29  ;;  %v2827_v27 = vld [vmem:[%s3534_s3 + $0x390] sm:$0xff]   ;;  %v2828_v28 = vld [vmem:[%s3534_s3 + $0x358] sm:$0xff]  }
 0x10c   : > { %v2829_v29 = vld [vmem:[%s3534_s3 + $0x3d8] sm:$0xff]  }
 0x10d   : > { %2060 = vmatmul.mubr.bf16.vlgmr.msra.gmra.mrb[20].mxu0 %v904_v31  ;;  %2100 = vmatmul.mubr.bf16.vlgmr.msra.gmra.mrb[20].mxu1 %v906_v33  ;;  %v2831_v31 = vld [vmem:[%s3534_s3 + $0x398] sm:$0xff]   ;;  %v2833_v33 = vld [vmem:[%s3534_s3 + $0x3e0] sm:$0xff]  }
 0x10e   : > { %2624 = vmatpush3.bf16.msra.mxu0 %v2786_v34  ;;  %2646 = vmatpush3.bf16.msra.mxu1 %v2787_v35  ;;  %v2834_v34 = vld [vmem:[%s3534_s3 + $0x320] sm:$0xff]  }
 0x10f   : > { %2625 = vmatprep.subr.bf16.mxu0 %v2788_v36  ;;  %2647 = vmatprep.subr.bf16.mxu1 %v2789_v40  ;;  %v2835_v35 = vld [vmem:[%s3534_s3 + $0x3a0] sm:$0xff]   ;;  %v2836_v36 = vld [vmem:[%s3534_s3 + $0x368] sm:$0xff]  }
 0x110   : > { %2139 = vmatprep.mubr.bf16.mxu0 %v909_v43  ;;  %2179 = vmatprep.mubr.bf16.mxu1 %v911_v44  ;;  %v2837_v40 = vld [vmem:[%s3534_s3 + $0x3e8] sm:$0xff]  }
 0x111   : > { %v2838_v43 = vld [vmem:[%s3534_s3 + $0x328] sm:$0xff]  }
 0x112   : > { %2626 = vmatpush3.bf16.msra.mxu0 %v2790_v45  ;;  %2648 = vmatpush3.bf16.msra.mxu1 %v2791_v47  ;;  %v2839_v44 = vld [vmem:[%s3534_s3 + $0x3a8] sm:$0xff]   ;;  %v2840_v45 = vld [vmem:[%s3534_s3 + $0x370] sm:$0xff]  }
 0x113   : > { %2627 = vmatprep.subr.bf16.mxu0 %v2792_v48  ;;  %2649 = vmatprep.subr.bf16.mxu1 %v2793_v49  ;;  %v2841_v47 = vld [vmem:[%s3534_s3 + $0x3f0] sm:$0xff]  }
 0x114   : > { %v2842_v48 = vld [vmem:[%s3534_s3 + $0x330] sm:$0xff]  }
 0x115   : > { %v2843_v49 = vld [vmem:[%s3534_s3 + $0x3b0] sm:$0xff]  }
 0x116   : > { %2628 = vmatpush3.bf16.msra.mxu0 %v2794_v50  ;;  %2650 = vmatpush3.bf16.msra.mxu1 %v2795_v51  ;;  %v2844_v50 = vld [vmem:[%s3534_s3 + $0x378] sm:$0xff]  }
 0x117   : > { %2629 = vmatprep.subr.bf16.mxu0 %v2796_v52  ;;  %2651 = vmatprep.subr.bf16.mxu1 %v2797_v53  ;;  %v2845_v51 = vld [vmem:[%s3534_s3 + $0x3f8] sm:$0xff]   ;;  %v898_v52 = vmax.f32 %v3268_v8, 0.0 }
 0x118   : > { %v2846_v53 = vld [vmem:[%s3534_s3 + $0x338] sm:$0xff]  }
 0x11a   : > { %2630 = vmatpush3.bf16.msra.mxu0 %v2798_v54  ;;  %2652 = vmatpush3.bf16.msra.mxu1 %v2799_v56  ;;  %v896_v54 = vmax.f32 %v3260_v2, 0.0  ;;  %v2847_v56 = vld [vmem:[%s3534_s3 + $0x3b8] sm:$0xff]  }
 0x11b   : > { %2631 = vmatprep.subr.bf16.mxu0 %v2800_v57  ;;  %2653 = vmatprep.subr.bf16.mxu1 %v2801_v58  ;;  %v914_v57 = vpack.c.bf16 %v898_v52, %v898_v52 }
 0x11c   : > { %v912_v58 = vpack.c.bf16 %v896_v54, %v896_v54 }
 0x11e   : > { %2632 = vmatpush3.bf16.msra.mxu0 %v2802_v59  ;;  %2654 = vmatpush3.bf16.msra.mxu1 %v2803_v61  ;;  %v2402_v61 = vld [vmem:[%s3535_s4] ss:$0 sm:$0xff] }
 0x11f   : > { %2633 = vmatprep.subr.bf16.mxu0 %v2804_v62  ;;  %2655 = vmatprep.subr.bf16.mxu1 %v2805_v63 }
 0x122   : > { %2634 = vmatpush3.bf16.msra.mxu0 %v2806_v0  ;;  %2656 = vmatpush3.bf16.msra.mxu1 %v2807_v1 }
 0x123   : > { %2635 = vmatprep.subr.bf16.mxu0 %v2808_v4  ;;  %2657 = vmatprep.subr.bf16.mxu1 %v2809_v5 }
 0x126   : > { %2636 = vmatpush3.bf16.msra.mxu0 %v2810_v10  ;;  %2658 = vmatpush3.bf16.msra.mxu1 %v2811_v12 }
 0x127   : > { %2637 = vmatprep.subr.bf16.mxu0 %v2812_v14  ;;  %2659 = vmatprep.subr.bf16.mxu1 %v2813_v37 }
 0x12a   : > { %2638 = vmatpush3.bf16.msra.mxu0 %v2814_v39  ;;  %2660 = vmatpush3.bf16.msra.mxu1 %v2815_v16 }
 0x12b   : > { %2667 = vmatprep.subr.bf16.mxu0 %v2816_v3  ;;  %2689 = vmatprep.subr.bf16.mxu1 %v2817_v38 }
 0x12d   : > { %2140 = vmatmul.mubr.bf16.vlgmr.msra.gmra.mrb[24].mxu0 %v908_v9  ;;  %2180 = vmatmul.mubr.bf16.vlgmr.msra.gmra.mrb[24].mxu1 %v910_v19 }
 0x12e   : > { %2668 = vmatpush3.bf16.msra.mxu0 %v2818_v20  ;;  %2690 = vmatpush3.bf16.msra.mxu1 %v2819_v21 }
 0x12f   : > { %2669 = vmatprep.subr.bf16.mxu0 %v2820_v22  ;;  %2691 = vmatprep.subr.bf16.mxu1 %v2821_v41 }
 0x130   : > { %2219 = vmatprep.mubr.bf16.mxu0 %v913_v11  ;;  %2259 = vmatprep.mubr.bf16.mxu1 %v915_v42 }
 0x132   : > { %2670 = vmatpush3.bf16.msra.mxu0 %v2822_v13  ;;  %2692 = vmatpush3.bf16.msra.mxu1 %v2823_v23 }
 0x133   : > { %2671 = vmatprep.subr.bf16.mxu0 %v2824_v24  ;;  %2693 = vmatprep.subr.bf16.mxu1 %v2825_v25 }
 0x136   : > { %2672 = vmatpush3.bf16.msra.mxu0 %v2826_v26  ;;  %2694 = vmatpush3.bf16.msra.mxu1 %v2827_v27 }
 0x137   : > { %2673 = vmatprep.subr.bf16.mxu0 %v2828_v28  ;;  %2695 = vmatprep.subr.bf16.mxu1 %v2829_v29 }
 0x13a   : > { %2674 = vmatpush3.bf16.msra.mxu0 %v2830_v30  ;;  %2696 = vmatpush3.bf16.msra.mxu1 %v2831_v31 }
 0x13b   : > { %2675 = vmatprep.subr.bf16.mxu0 %v2832_v32  ;;  %2697 = vmatprep.subr.bf16.mxu1 %v2833_v33 }
 0x13e   : > { %2676 = vmatpush3.bf16.msra.mxu0 %v2834_v34  ;;  %2698 = vmatpush3.bf16.msra.mxu1 %v2835_v35 }
 0x13f   : > { %2677 = vmatprep.subr.bf16.mxu0 %v2836_v36  ;;  %2699 = vmatprep.subr.bf16.mxu1 %v2837_v40  ;;  %v2850_v36 = vld [vmem:[%s2960_s10] sm:$0xf] }
 0x140   : > { %v2267_v40 = vunpack.c.l.bf16 %v2850_v36 }
 0x142   : > { %2678 = vmatpush3.bf16.msra.mxu0 %v2838_v43  ;;  %2700 = vmatpush3.bf16.msra.mxu1 %v2839_v44 }
 0x143   : > { %2679 = vmatprep.subr.bf16.mxu0 %v2840_v45  ;;  %2701 = vmatprep.subr.bf16.mxu1 %v2841_v47 }
 0x146   : > { %2680 = vmatpush3.bf16.msra.mxu0 %v2842_v48  ;;  %2702 = vmatpush3.bf16.msra.mxu1 %v2843_v49 }
 0x147   : > { %2681 = vmatprep.subr.bf16.mxu0 %v2844_v50  ;;  %2703 = vmatprep.subr.bf16.mxu1 %v2845_v51 }
 0x14a   : > { %2682 = vmatpush3.bf16.msra.mxu0 %v2846_v53  ;;  %2704 = vmatpush3.bf16.msra.mxu1 %v2847_v56 }
 0x14d   : > { %2220 = vmatmul.mubr.bf16.vlgmr.msra.gmra.mrb[28].mxu0 %v912_v58  ;;  %2260 = vmatmul.mubr.bf16.vlgmr.msra.gmra.mrb[28].mxu1 %v914_v57  ;;  %v2531_v57 = vld [vmem:[%s3536_s5] ss:$0 sm:$0xff] }
 0x1c0   : > { %v2551_v8 = vpop.f32.mrb[16].mxu0  ;;  %v2573_v59 = vpop.f32.mrb[16].mxu1 }
 0x1c1   : > { %v2552_v2 = vpop.f32.mrb[17].mxu0  ;;  %v2574_v63 = vpop.f32.mrb[17].mxu1 }
 0x1c2   : > { %v2553_v62 = vadd.f32 %v2552_v2, %v2551_v8  ;;  %v2554_v0 = vpop.f32.mrb[18].mxu0  ;;  %v2575_v1 = vadd.f32 %v2574_v63, %v2573_v59  ;;  %v2576_v4 = vpop.f32.mrb[18].mxu1  ;;  %v2532_v8 = vld [vmem:[%s3537_s6] ss:$0 sm:$0xff] }
 0x1c3   : > { %v2555_v5 = vpop.f32.mrb[19].mxu0  ;;  %v2577_v7 = vpop.f32.mrb[19].mxu1 }
 0x1c4   : > { %v1982_v6 = vadd.f32 %v2553_v62, %v2402_v61 }
 0x1c6   : > { %v2022_v10 = vadd.f32 %v2575_v1, %v1982_v6 }
 0x1e0   : > { %v2595_v12 = vpop.f32.mrb[20].mxu0  ;;  %v2617_v14 = vpop.f32.mrb[20].mxu1 }
 0x1e1   : > { %v2596_v37 = vpop.f32.mrb[21].mxu0  ;;  %v2618_v60 = vpop.f32.mrb[21].mxu1 }
 0x1e2   : > { %v2597_v55 = vadd.f32 %v2596_v37, %v2595_v12  ;;  %v2598_v18 = vpop.f32.mrb[22].mxu0  ;;  %v2619_v15 = vadd.f32 %v2618_v60, %v2617_v14  ;;  %v2620_v39 = vpop.f32.mrb[22].mxu1 }
 0x1e3   : > { %v2599_v16 = vpop.f32.mrb[23].mxu0  ;;  %v2621_v38 = vpop.f32.mrb[23].mxu1 }
 0x1e4   : > { %v2062_v3 = vadd.f32 %v2597_v55, %v2022_v10 }
 0x1e6   : > { %v2102_v46 = vadd.f32 %v2619_v15, %v2062_v3 }
 0x200   : > { %v2639_v9 = vpop.f32.mrb[24].mxu0  ;;  %v2661_v17 = vpop.f32.mrb[24].mxu1 }
 0x201   : > { %v2640_v19 = vpop.f32.mrb[25].mxu0  ;;  %v2662_v21 = vpop.f32.mrb[25].mxu1 }
 0x202   : > { %v2641_v20 = vadd.f32 %v2640_v19, %v2639_v9  ;;  %v2642_v22 = vpop.f32.mrb[26].mxu0  ;;  %v2663_v41 = vadd.f32 %v2662_v21, %v2661_v17  ;;  %v2664_v11 = vpop.f32.mrb[26].mxu1 }
 0x203   : > { %v2643_v42 = vpop.f32.mrb[27].mxu0  ;;  %v2665_v23 = vpop.f32.mrb[27].mxu1 }
 0x204   : > { %v2142_v13 = vadd.f32 %v2641_v20, %v2102_v46 }
 0x206   : > { %v2182_v24 = vadd.f32 %v2663_v41, %v2142_v13 }
 0x220   : > { %v2683_v25 = vpop.f32.mrb[28].mxu0  ;;  %v2705_v26 = vpop.f32.mrb[28].mxu1 }
 0x221   : > { %v2684_v27 = vpop.f32.mrb[29].mxu0  ;;  %v2706_v29 = vpop.f32.mrb[29].mxu1 }
 0x222   : > { %v2685_v28 = vadd.f32 %v2684_v27, %v2683_v25  ;;  %v2686_v30 = vpop.f32.mrb[30].mxu0  ;;  %v2707_v31 = vadd.f32 %v2706_v29, %v2705_v26  ;;  %v2708_v32 = vpop.f32.mrb[30].mxu1 }
 0x223   : > { %v2687_v33 = vpop.f32.mrb[31].mxu0  ;;  %v2709_v35 = vpop.f32.mrb[31].mxu1 }
 0x224   : > { %v2222_v34 = vadd.f32 %v2685_v28, %v2182_v24 }
 0x226   : > { %v2262_v43 = vadd.f32 %v2707_v31, %v2222_v34 }
 0x228   : > { %v2268_v44 = vadd.f32 %v2267_v40, %v2262_v43 }
 0x22a   : > { %v2271_v45 = vsel %vm552_vm0, %v2268_v44, 0.0 }
 0x22b   : > { %2272 = vadd.xlane.f32.xlu0 %v2271_v45 }
 0x2b8   : > { %v2273_v47 = vpop.xlane.xlu0 %2272 }
 0x2b9   : > { %v2275_v48 = vmul.f32 0.03125, %v2273_v47 }
 0x2bb   : > { %v2276_v49 = vsub.f32 %v2268_v44, %v2275_v48 }
 0x2bd   : > { %v2277_v50 = vmul.f32 %v2276_v49, %v2276_v49 }
 0x2bf   : > { %v2278_v51 = vsel %vm552_vm0, %v2277_v50, 0.0 }
 0x2c0   : > { %2279 = vadd.xlane.f32.xlu0 %v2278_v51 }
 0x34d   : > { %v2280_v52 = vpop.xlane.xlu0 %2279 }
 0x34e   : > { %v2281_v53 = vmul.f32 0.03125, %v2280_v52 }
 0x350   : > { %v2282_v54 = vadd.f32 1e-05, %v2281_v53 }
 0x352   : > { %2848 = vrsqrt.f32 %v2282_v54 }
 0x35c   : > { %v2849_v56 = vpop.eup %2848 }
 0x35d   : > { %v2284_v58 = vmul.f32 %v2849_v56, %v2276_v49 }
 0x35f   : > { %v2291_v59 = vmul.f32 %v2531_v57, %v2284_v58 }
 0x361   : > { %v2298_v61 = vadd.f32 %v2532_v8, %v2291_v59 }
 0x363   : > { %v2299_v2 = vpack.c.bf16 %v2298_v61, %v2298_v61 }
 0x365   : > { %2301 = vst.msk [vmem:[%s273_s14] sm:$0xf] %vm2300_vm1, %v2299_v2 }
 0x366 PF: > { %s17_s24 = sadd.s32 1, %s2857_s24  }
 0x367   : > { %p14_p4 = scmp.ge.s32.totalorder %s17_s24, 4  }
 0x369   :  { %16 = sbr.rel (!%p14_p4) target bundleno = 1 (0x1), region = 78 }

// kernel: _lambda_.7
= control target key start
LH: loop header
LB: loop body
LE: loop exit
PB: predicated region body
PF: predicated region fallthrough
CT: control target
= control target key end

     0   :  { %s2995_s30 = smov 0   ;;  %s3632_s0 = inlined_call_operand.vmem [shape: bf16[16,32], index: 0, kind: input, shape index: {}]   ;;  %s3633_s1 = inlined_call_operand.vmem [shape: bf16[32,2048], index: 1, kind: input, shape index: {}]   ;;  %s3634_s2 = inlined_call_operand.vmem [shape: f32[1,2048], index: 2, kind: input, shape index: {}]   ;;  %s3635_s3 = inlined_call_operand.vmem [shape: bf16[2048,32], index: 3, kind: input, shape index: {}]   ;;  %s3636_s4 = inlined_call_operand.vmem [shape: f32[1,32], index: 4, kind: input, shape index: {}]   ;;  %s3637_s5 = inlined_call_operand.vmem [shape: f32[1,32], index: 5, kind: input, shape index: {}]   ;;  %s3638_s6 = inlined_call_operand.vmem [shape: f32[1,32], index: 6, kind: input, shape index: {}]   ;;  %s3639_s7 = inlined_call_operand.vmem [shape: f32[1,32], index: 7, kind: input, shape index: {}]   ;;  %s3640_s8 = inlined_call_operand.vmem [shape: f32[1,32], index: 8, kind: input, shape index: {}]   ;;  %s3641_s9 = inlined_call_operand.vmem [shape: f32[16,32], index: 9, kind: output, shape index: {}]  }
   0x1 LB: > { %s2436_s10 = sadd.s32 4294967295, %s2942_s30   ;;  %p2440_p0 = scmp.ge.s32.totalorder %s2942_s30, 1  ;;  %s2942_s30 = sphi %s2995_s30, %s19_s30  }
   0x2   : > { %p286_p1 = scmp.lt.s32.totalorder %s2942_s30, 3 }
   0x4   : > { %p287_p2 = pnand %p2440_p0, %p286_p1 }
   0x5   : > { %v330_v0 = vld [vmem:[%s3633_s1] sm:$0xff] (!%p287_p2)  ;;  %v331_v2 = vld [vmem:[%s3633_s1 + $0x8] sm:$0xff] (!%p287_p2)  ;;  %p3012_p3 = scmp.lt.s32.totalorder (!%p287_p2), %s2436_s10, 1  ;;  %v2944_v8 = vmov (!%p287_p2), 0   ;;  %v332_v14 = vld [vmem:[%s3633_s1 + $0x10] sm:$0xff] (!%p287_p2)  ;;  %vm606_vm0 = vcmask (!%p287_p2), 261120  }
   0x6   : > { %290 = sbr.rel (%p287_p2) target bundleno = 1181 (0x49d), region = 56  ;;  %v338_v1 = vld [vmem:[%s3633_s1 + $0x40] sm:$0xff] (!%p287_p2)  ;;  %v339_v4 = vld [vmem:[%s3633_s1 + $0x48] sm:$0xff] (!%p287_p2)  ;;  %642 = vmatprep.mubr.bf16.mxu0 (!%p287_p2), %v2944_v8  ;;  %683 = vmatprep.mubr.bf16.mxu1 (!%p287_p2), %v2944_v8  ;;  %v340_v16 = vld [vmem:[%s3633_s1 + $0x50] sm:$0xff] (!%p287_p2) }
   0x7   : > { %v2444_v3 = vcombine.high (!%p287_p2), %v330_v0, %v338_v1  ;;  %v2443_v5 = vcombine.low (!%p287_p2), %v330_v0, %v338_v1  ;;  %v346_v6 = vld [vmem:[%s3633_s1 + $0x80] sm:$0xff] (!%p287_p2)  ;;  %v2446_v9 = vcombine.high (!%p287_p2), %v331_v2, %v339_v4  ;;  %v2445_v10 = vcombine.low (!%p287_p2), %v331_v2, %v339_v4  ;;  %v347_v12 = vld [vmem:[%s3633_s1 + $0x88] sm:$0xff] (!%p287_p2)  ;;  %v333_v17 = vld [vmem:[%s3633_s1 + $0x18] sm:$0xff] (!%p287_p2) }
   0x8   : > { %v354_v7 = vld [vmem:[%s3633_s1 + $0xc0] sm:$0xff] (!%p287_p2)  ;;  %v355_v13 = vld [vmem:[%s3633_s1 + $0xc8] sm:$0xff] (!%p287_p2)  ;;  %v341_v18 = vld [vmem:[%s3633_s1 + $0x58] sm:$0xff] (!%p287_p2)  ;;  %v2448_v21 = vcombine.high (!%p287_p2), %v332_v14, %v340_v16  ;;  %v2447_v28 = vcombine.low (!%p287_p2), %v332_v14, %v340_v16 }
   0x9   : > { %v2460_v11 = vcombine.high (!%p287_p2), %v346_v6, %v354_v7  ;;  %610 = vmatprep.subr.bf16.mxu0 (!%p287_p2), %v2444_v3  ;;  %v2462_v15 = vcombine.high (!%p287_p2), %v347_v12, %v355_v13  ;;  %651 = vmatprep.subr.bf16.mxu1 (!%p287_p2), %v2446_v9  ;;  %v2459_v19 = vcombine.low (!%p287_p2), %v346_v6, %v354_v7  ;;  %v348_v23 = vld [vmem:[%s3633_s1 + $0x90] sm:$0xff] (!%p287_p2)  ;;  %v349_v25 = vld [vmem:[%s3633_s1 + $0x98] sm:$0xff] (!%p287_p2)  ;;  %v334_v32 = vld [vmem:[%s3633_s1 + $0x20] sm:$0xff] (!%p287_p2) }
   0xa   : > { %611 = vmatpush1.bf16.msra.mxu0 (!%p287_p2), %v2443_v5  ;;  %652 = vmatpush1.bf16.msra.mxu1 (!%p287_p2), %v2445_v10  ;;  %v2461_v20 = vcombine.low (!%p287_p2), %v347_v12, %v355_v13  ;;  %v2450_v22 = vcombine.high (!%p287_p2), %v333_v17, %v341_v18  ;;  %v356_v24 = vld [vmem:[%s3633_s1 + $0xd0] sm:$0xff] (!%p287_p2)  ;;  %v357_v26 = vld [vmem:[%s3633_s1 + $0xd8] sm:$0xff] (!%p287_p2)  ;;  %v2449_v29 = vcombine.low (!%p287_p2), %v333_v17, %v341_v18  ;;  %v342_v33 = vld [vmem:[%s3633_s1 + $0x60] sm:$0xff] (!%p287_p2) }
   0xb   : > { %612 = vmatprep.subr.bf16.mxu0 (!%p287_p2), %v2460_v11  ;;  %653 = vmatprep.subr.bf16.mxu1 (!%p287_p2), %v2462_v15  ;;  %v2464_v30 = vcombine.high (!%p287_p2), %v348_v23, %v356_v24  ;;  %v2466_v31 = vcombine.high (!%p287_p2), %v349_v25, %v357_v26  ;;  %v335_v34 = vld [vmem:[%s3633_s1 + $0x28] sm:$0xff] (!%p287_p2)  ;;  %v2463_v36 = vcombine.low (!%p287_p2), %v348_v23, %v356_v24  ;;  %v350_v37 = vld [vmem:[%s3633_s1 + $0xa0] sm:$0xff] (!%p287_p2)  ;;  %v336_v45 = vld [vmem:[%s3633_s1 + $0x30] sm:$0xff] (!%p287_p2) }
   0xc   : > { %v343_v35 = vld [vmem:[%s3633_s1 + $0x68] sm:$0xff] (!%p287_p2)  ;;  %v2465_v38 = vcombine.low (!%p287_p2), %v349_v25, %v357_v26  ;;  %v2452_v39 = vcombine.high (!%p287_p2), %v334_v32, %v342_v33  ;;  %v358_v40 = vld [vmem:[%s3633_s1 + $0xe0] sm:$0xff] (!%p287_p2)  ;;  %v2451_v44 = vcombine.low (!%p287_p2), %v334_v32, %v342_v33  ;;  %v344_v48 = vld [vmem:[%s3633_s1 + $0x70] sm:$0xff] (!%p287_p2) }
   0xd   : > { %s3644_s10 = smov (!%p3012_p3, %s2436_s10), 1  ;;  %v2454_v41 = vcombine.high %v335_v34, %v343_v35  ;;  %v351_v42 = vld [vmem:[%s3633_s1 + $0xa8] sm:$0xff]  ;;  %v2453_v46 = vcombine.low %v335_v34, %v343_v35  ;;  %v2468_v47 = vcombine.high %v350_v37, %v358_v40  ;;  %v337_v50 = vld [vmem:[%s3633_s1 + $0x38] sm:$0xff]  ;;  %v2467_v52 = vcombine.low %v350_v37, %v358_v40  ;;  %v352_v53 = vld [vmem:[%s3633_s1 + $0xb0] sm:$0xff] }
   0xe   : > { %s2441_s17 = sshll.u32 %s3644_s10, 2  ;;  %613 = vmatpush1.bf16.msra.mxu0 %v2459_v19  ;;  %654 = vmatpush1.bf16.msra.mxu1 %v2461_v20  ;;  %v359_v43 = vld [vmem:[%s3633_s1 + $0xe8] sm:$0xff]  ;;  %v345_v51 = vld [vmem:[%s3633_s1 + $0x78] sm:$0xff]  ;;  %v2456_v55 = vcombine.high %v336_v45, %v344_v48  ;;  %v360_v56 = vld [vmem:[%s3633_s1 + $0xf0] sm:$0xff]  ;;  %v2455_v60 = vcombine.low %v336_v45, %v344_v48  ;;  %s2442_s22 = sshll.u32 %s3644_s10, 3 }
   0xf   : > { %s3053_s20 = scalar_lea.vmem %s3632_s0, %s2441_s17  ;;  %692 = vmatprep.subr.bf16.mxu0 %v2448_v21  ;;  %733 = vmatprep.subr.bf16.mxu1 %v2450_v22  ;;  %v2470_v49 = vcombine.high %v351_v42, %v359_v43  ;;  %v2469_v54 = vcombine.low %v351_v42, %v359_v43  ;;  %v2458_v57 = vcombine.high %v337_v50, %v345_v51  ;;  %v353_v58 = vld [vmem:[%s3633_s1 + $0xb8] sm:$0xff]  ;;  %v2803_v1 = vld [vmem:[%s3635_s3 + $0x40] sm:$0xff]   ;;  %v2807_v6 = vld [vmem:[%s3635_s3 + $0x48] sm:$0xff]   ;;  %s327_s27 = scalar_lea.vmem %s3641_s9, %s2442_s22 }
  0x10   : > { %v3068_v27 = vld [vmem:[%s3053_s20] sm:$0xf]  ;;  %v361_v59 = vld [vmem:[%s3633_s1 + $0xf8] sm:$0xff]  ;;  %v2457_v61 = vcombine.low %v337_v50, %v345_v51  ;;  %v2472_v62 = vcombine.high %v352_v53, %v360_v56  ;;  %v2471_v0 = vcombine.low %v352_v53, %v360_v56  ;;  %v2808_v7 = vld [vmem:[%s3635_s3 + $0xc8] sm:$0xff]  }
  0x11   : > { %2475 = vmatmul.mubr.msk.bf16.vlgmr.msra.gmra.mrb[0].mxu0 %vm606_vm0, %v3068_v27  ;;  %2476 = vmatmul.mubr.msk.bf16.vlgmr.msra.gmra.mrb[0].mxu1 %vm606_vm0, %v3068_v27  ;;  %v2474_v63 = vcombine.high %v353_v58, %v361_v59  ;;  %v2473_v2 = vcombine.low %v353_v58, %v361_v59  ;;  %v2804_v3 = vld [vmem:[%s3635_s3 + $0xc0] sm:$0xff]   ;;  %v2810_v9 = vld [vmem:[%s3635_s3 + $0x88] sm:$0xff]   ;;  %v2811_v10 = vld [vmem:[%s3635_s3 + $0x50] sm:$0xff]  }
  0x12   : > { %693 = vmatpush1.bf16.msra.mxu0 %v2447_v28  ;;  %734 = vmatpush1.bf16.msra.mxu1 %v2449_v29  ;;  %v2805_v4 = vld [vmem:[%s3635_s3] sm:$0xff]   ;;  %v2812_v11 = vld [vmem:[%s3635_s3 + $0xd0] sm:$0xff]   ;;  %v2815_v14 = vld [vmem:[%s3635_s3 + $0x58] sm:$0xff]  }
  0x13   : > { %694 = vmatprep.subr.bf16.mxu0 %v2464_v30  ;;  %735 = vmatprep.subr.bf16.mxu1 %v2466_v31  ;;  %v2806_v5 = vld [vmem:[%s3635_s3 + $0x80] sm:$0xff]   ;;  %v2813_v12 = vld [vmem:[%s3635_s3 + $0x10] sm:$0xff]   ;;  %v2816_v15 = vld [vmem:[%s3635_s3 + $0xd8] sm:$0xff]  }
  0x14   : > { %724 = vmatprep.mubr.bf16.mxu0 %v2944_v8  ;;  %765 = vmatprep.mubr.bf16.mxu1 %v2944_v8  ;;  %v2814_v13 = vld [vmem:[%s3635_s3 + $0x90] sm:$0xff]   ;;  %v2817_v16 = vld [vmem:[%s3635_s3 + $0x18] sm:$0xff]   ;;  %v2819_v18 = vld [vmem:[%s3635_s3 + $0x60] sm:$0xff]  }
  0x15   : > { %v2818_v17 = vld [vmem:[%s3635_s3 + $0x98] sm:$0xff]   ;;  %v2820_v19 = vld [vmem:[%s3635_s3 + $0xe0] sm:$0xff]   ;;  %v2823_v22 = vld [vmem:[%s3635_s3 + $0x68] sm:$0xff]  }
  0x16   : > { %695 = vmatpush1.bf16.msra.mxu0 %v2463_v36  ;;  %736 = vmatpush1.bf16.msra.mxu1 %v2465_v38  ;;  %v2821_v20 = vld [vmem:[%s3635_s3 + $0x20] sm:$0xff]   ;;  %v2824_v23 = vld [vmem:[%s3635_s3 + $0xe8] sm:$0xff]   ;;  %v2827_v26 = vld [vmem:[%s3635_s3 + $0x70] sm:$0xff]   ;;  %v366_v36 = vlaneseq }
  0x17   : > { %774 = vmatprep.subr.bf16.mxu0 %v2452_v39  ;;  %815 = vmatprep.subr.bf16.mxu1 %v2454_v41  ;;  %v2822_v21 = vld [vmem:[%s3635_s3 + $0xa0] sm:$0xff]   ;;  %v2825_v24 = vld [vmem:[%s3635_s3 + $0x28] sm:$0xff]   ;;  %v2829_v28 = vld [vmem:[%s3635_s3 + $0x30] sm:$0xff]  }
  0x18   : > { %v2826_v25 = vld [vmem:[%s3635_s3 + $0xa8] sm:$0xff]   ;;  %v2830_v29 = vld [vmem:[%s3635_s3 + $0xb0] sm:$0xff]   ;;  %v2831_v30 = vld [vmem:[%s3635_s3 + $0x78] sm:$0xff]   ;;  %v3242_v37 = vshrl.u32 %v366_v36, 7 }
  0x19   : > { %2477 = vmatmul.mubr.msk.bf16.vlgmr.msra.gmra.mrb[4].mxu0 %vm606_vm0, %v3068_v27  ;;  %2478 = vmatmul.mubr.msk.bf16.vlgmr.msra.gmra.mrb[4].mxu1 %vm606_vm0, %v3068_v27  ;;  %v2832_v31 = vld [vmem:[%s3635_s3 + $0xf8] sm:$0xff]   ;;  %v2835_v34 = vld [vmem:[%s3635_s3 + $0x140] sm:$0xff]  }
  0x1a   : > { %775 = vmatpush1.bf16.msra.mxu0 %v2451_v44  ;;  %816 = vmatpush1.bf16.msra.mxu1 %v2453_v46  ;;  %v2833_v32 = vld [vmem:[%s3635_s3 + $0x38] sm:$0xff]   ;;  %v2836_v35 = vld [vmem:[%s3635_s3 + $0x1c0] sm:$0xff]   ;;  %v368_v38 = vsub.s32 0, %v3242_v37  ;;  %v376_v40 = vsub.s32 2, %v3242_v37  ;;  %v372_v41 = vsub.s32 1, %v3242_v37  ;;  %v380_v42 = vsub.s32 3, %v3242_v37 }
  0x1b   : > { %776 = vmatprep.subr.bf16.mxu0 %v2468_v47  ;;  %817 = vmatprep.subr.bf16.mxu1 %v2470_v49  ;;  %v2834_v33 = vld [vmem:[%s3635_s3 + $0xb8] sm:$0xff]   ;;  %v3248_v39 = vld [vmem:[%s3634_s2] sm:$0xff] }
  0x1c   : > { %806 = vmatprep.mubr.bf16.mxu0 %v2944_v8  ;;  %847 = vmatprep.mubr.bf16.mxu1 %v2944_v8  ;;  %v369_v43 = vrot.slane %v3248_v39, %v368_v38  ;;  %v377_v44 = vrot.slane %v3248_v39, %v376_v40  ;;  %v373_v45 = vrot.slane %v3248_v39, %v372_v41 }
  0x1d   : > { %v381_v46 = vrot.slane %v3248_v39, %v380_v42 }
  0x1e   : > { %777 = vmatpush1.bf16.msra.mxu0 %v2467_v52  ;;  %818 = vmatpush1.bf16.msra.mxu1 %v2469_v54 }
  0x1f   : > { %856 = vmatprep.subr.bf16.mxu0 %v2456_v55  ;;  %897 = vmatprep.subr.bf16.mxu1 %v2458_v57  ;;  %v388_v55 = vsub.s32 5, %v3242_v37 }
  0x21   : > { %2479 = vmatmul.mubr.msk.bf16.vlgmr.msra.gmra.mrb[8].mxu0 %vm606_vm0, %v3068_v27  ;;  %2480 = vmatmul.mubr.msk.bf16.vlgmr.msra.gmra.mrb[8].mxu1 %vm606_vm0, %v3068_v27 }
  0x22   : > { %857 = vmatpush1.bf16.msra.mxu0 %v2455_v60  ;;  %898 = vmatpush1.bf16.msra.mxu1 %v2457_v61  ;;  %v396_v60 = vsub.s32 7, %v3242_v37 }
  0x23   : > { %858 = vmatprep.subr.bf16.mxu0 %v2472_v62  ;;  %899 = vmatprep.subr.bf16.mxu1 %v2474_v63 }
  0x24   : > { %888 = vmatprep.mubr.bf16.mxu0 %v2944_v8  ;;  %929 = vmatprep.mubr.bf16.mxu1 %v2944_v8  ;;  %v2809_v8 = vld [vmem:[%s3635_s3 + $0x8] sm:$0xff]  }
  0x26   : > { %859 = vmatpush1.bf16.msra.mxu0 %v2471_v0  ;;  %900 = vmatpush1.bf16.msra.mxu1 %v2473_v2 }
  0x27   : > { %2618 = vmatprep.subr.bf16.mxu0 %v2803_v1  ;;  %2640 = vmatprep.subr.bf16.mxu1 %v2804_v3  ;;  %v2837_v3 = vld [vmem:[%s3635_s3 + $0x100] sm:$0xff]  }
  0x29   : > { %2481 = vmatmul.mubr.msk.bf16.vlgmr.msra.gmra.mrb[12].mxu0 %vm606_vm0, %v3068_v27  ;;  %2482 = vmatmul.mubr.msk.bf16.vlgmr.msra.gmra.mrb[12].mxu1 %vm606_vm0, %v3068_v27  ;;  %v2828_v27 = vld [vmem:[%s3635_s3 + $0xf0] sm:$0xff]  }
  0x2a   : > { %2619 = vmatpush3.bf16.msra.mxu0 %v2805_v4  ;;  %2641 = vmatpush3.bf16.msra.mxu1 %v2806_v5  ;;  %v389_v4 = vrot.slane %v3248_v39, %v388_v55 }
  0x2b   : > { %2620 = vmatprep.subr.bf16.mxu0 %v2807_v6  ;;  %2642 = vmatprep.subr.bf16.mxu1 %v2808_v7  ;;  %v2838_v7 = vld [vmem:[%s3635_s3 + $0x180] sm:$0xff]  }
  0x2e   : > { %2621 = vmatpush3.bf16.msra.mxu0 %v2809_v8  ;;  %2643 = vmatpush3.bf16.msra.mxu1 %v2810_v9  ;;  %v2839_v8 = vld [vmem:[%s3635_s3 + $0x148] sm:$0xff]   ;;  %v397_v9 = vrot.slane %v3248_v39, %v396_v60 }
  0x2f   : > { %2622 = vmatprep.subr.bf16.mxu0 %v2811_v10  ;;  %2644 = vmatprep.subr.bf16.mxu1 %v2812_v11  ;;  %v2840_v10 = vld [vmem:[%s3635_s3 + $0x1c8] sm:$0xff]  }
  0x32   : > { %2623 = vmatpush3.bf16.msra.mxu0 %v2813_v12  ;;  %2645 = vmatpush3.bf16.msra.mxu1 %v2814_v13 }
  0x33   : > { %2624 = vmatprep.subr.bf16.mxu0 %v2815_v14  ;;  %2646 = vmatprep.subr.bf16.mxu1 %v2816_v15  ;;  %v2841_v14 = vld [vmem:[%s3635_s3 + $0x108] sm:$0xff]  }
  0x36   : > { %2625 = vmatpush3.bf16.msra.mxu0 %v2817_v16  ;;  %2647 = vmatpush3.bf16.msra.mxu1 %v2818_v17 }
  0x37   : > { %2626 = vmatprep.subr.bf16.mxu0 %v2819_v18  ;;  %2648 = vmatprep.subr.bf16.mxu1 %v2820_v19  ;;  %v3293_v18 = vld [vmem:[%s3634_s2 + $0x8] sm:$0xff] }
  0x38   : > { %v2842_v19 = vld [vmem:[%s3635_s3 + $0x188] sm:$0xff]  }
  0x3a   : > { %2627 = vmatpush3.bf16.msra.mxu0 %v2821_v20  ;;  %2649 = vmatpush3.bf16.msra.mxu1 %v2822_v21  ;;  %v2843_v20 = vld [vmem:[%s3635_s3 + $0x150] sm:$0xff]  }
  0x3b   : > { %2628 = vmatprep.subr.bf16.mxu0 %v2823_v22  ;;  %2650 = vmatprep.subr.bf16.mxu1 %v2824_v23 }
  0x3e   : > { %2629 = vmatpush3.bf16.msra.mxu0 %v2825_v24  ;;  %2651 = vmatpush3.bf16.msra.mxu1 %v2826_v25  ;;  %v2844_v24 = vld [vmem:[%s3635_s3 + $0x1d0] sm:$0xff]  }
  0x3f   : > { %2630 = vmatprep.subr.bf16.mxu0 %v2827_v26  ;;  %2652 = vmatprep.subr.bf16.mxu1 %v2828_v27 }
  0x42   : > { %2631 = vmatpush3.bf16.msra.mxu0 %v2829_v28  ;;  %2653 = vmatpush3.bf16.msra.mxu1 %v2830_v29  ;;  %v401_v28 = vrot.slane %v3293_v18, %v368_v38  ;;  %v2845_v29 = vld [vmem:[%s3635_s3 + $0x110] sm:$0xff]  }
  0x43   : > { %2632 = vmatprep.subr.bf16.mxu0 %v2831_v30  ;;  %2654 = vmatprep.subr.bf16.mxu1 %v2832_v31  ;;  %v409_v31 = vrot.slane %v3293_v18, %v376_v40 }
  0x46   : > { %2633 = vmatpush3.bf16.msra.mxu0 %v2833_v32  ;;  %2655 = vmatpush3.bf16.msra.mxu1 %v2834_v33  ;;  %v2846_v32 = vld [vmem:[%s3635_s3 + $0x190] sm:$0xff]   ;;  %v2847_v33 = vld [vmem:[%s3635_s3 + $0x158] sm:$0xff]  }
  0x47   : > { %2662 = vmatprep.subr.bf16.mxu0 %v2835_v34  ;;  %2684 = vmatprep.subr.bf16.mxu1 %v2836_v35  ;;  %v2848_v35 = vld [vmem:[%s3635_s3 + $0x1d8] sm:$0xff]  }
  0xe4   : > { %v644_v47 = vpop.f32.mrb[0].mxu0  ;;  %v685_v49 = vpop.f32.mrb[0].mxu1 }
  0xe5   : > { %v645_v48 = vadd.f32 %v644_v47, %v369_v43  ;;  %v646_v50 = vpop.f32.mrb[1].mxu0  ;;  %v686_v51 = vadd.f32 %v685_v49, %v377_v44  ;;  %v687_v53 = vpop.f32.mrb[1].mxu1  ;;  %v2849_v44 = vld [vmem:[%s3635_s3 + $0x118] sm:$0xff]   ;;  %v2851_v49 = vld [vmem:[%s3635_s3 + $0x160] sm:$0xff]  }
  0xe6   : > { %v647_v52 = vadd.f32 %v646_v50, %v373_v45  ;;  %v648_v54 = vpop.f32.mrb[2].mxu0  ;;  %v688_v57 = vadd.f32 %v687_v53, %v381_v46  ;;  %v689_v58 = vpop.f32.mrb[2].mxu1  ;;  %v384_v50 = vsub.s32 4, %v3242_v37  ;;  %v2852_v53 = vld [vmem:[%s3635_s3 + $0x1e0] sm:$0xff]  }
  0xe7   : > { %v938_v56 = vmax.f32 %v645_v48, 0.0  ;;  %v649_v59 = vpop.f32.mrb[3].mxu0  ;;  %v940_v61 = vmax.f32 %v686_v51, 0.0  ;;  %v690_v63 = vpop.f32.mrb[3].mxu1  ;;  %v2850_v48 = vld [vmem:[%s3635_s3 + $0x198] sm:$0xff]   ;;  %v392_v54 = vsub.s32 6, %v3242_v37 }
  0xe8   : > { %v939_v62 = vmax.f32 %v647_v52, 0.0  ;;  %v941_v0 = vmax.f32 %v688_v57, 0.0  ;;  %v417_v57 = vrot.slane %v3293_v18, %v384_v50  ;;  %v2853_v58 = vld [vmem:[%s3635_s3 + $0x120] sm:$0xff]   ;;  %v2856_v63 = vld [vmem:[%s3635_s3 + $0x1e8] sm:$0xff]   ;;  %v2896_v37 = vld [vmem:[%s3635_s3 + $0x2f8] sm:$0xff]  }
  0xe9   : > { %v956_v1 = vpack.c.bf16 %v940_v61, %v940_v61  ;;  %v954_v5 = vpack.c.bf16 %v938_v56, %v938_v56  ;;  %v425_v59 = vrot.slane %v3293_v18, %v392_v54  ;;  %v2854_v61 = vld [vmem:[%s3635_s3 + $0x1a0] sm:$0xff]  }
  0xea   : > { %v955_v2 = vpack.c.bf16 %v939_v62, %v939_v62  ;;  %v957_v6 = vpack.c.bf16 %v941_v0, %v941_v0  ;;  %v2855_v62 = vld [vmem:[%s3635_s3 + $0x168] sm:$0xff]  }
  0xec   : > { %2033 = vmatprep.mubr.bf16.mxu0 %v955_v2  ;;  %v3283_v11 = vpop.f32.mrb[4].mxu0  ;;  %2073 = vmatprep.mubr.bf16.mxu1 %v957_v6  ;;  %v3285_v13 = vpop.f32.mrb[4].mxu1  ;;  %v393_v6 = vrot.slane %v3248_v39, %v392_v54  ;;  %v2881_v54 = vld [vmem:[%s3635_s3 + $0x218] sm:$0xff]  }
  0xed   : > { %2034 = vmatmul.mubr.bf16.vlgmr.msra.gmra.mrb[16].mxu0 %v954_v5  ;;  %v728_v12 = vpop.f32.mrb[5].mxu0  ;;  %2074 = vmatmul.mubr.bf16.vlgmr.msra.gmra.mrb[16].mxu1 %v956_v1  ;;  %v769_v17 = vpop.f32.mrb[5].mxu1  ;;  %v385_v1 = vrot.slane %v3248_v39, %v384_v50  ;;  %v2857_v5 = vld [vmem:[%s3635_s3 + $0x128] sm:$0xff]   ;;  %v2860_v39 = vld [vmem:[%s3635_s3 + $0x1f0] sm:$0xff]  }
  0xee   : > { %2663 = vmatpush3.bf16.msra.mxu0 %v2837_v3  ;;  %v729_v15 = vadd.f32 %v728_v12, %v389_v4  ;;  %v730_v16 = vpop.f32.mrb[6].mxu0  ;;  %2685 = vmatpush3.bf16.msra.mxu1 %v2838_v7  ;;  %v770_v22 = vadd.f32 %v769_v17, %v397_v9  ;;  %v771_v23 = vpop.f32.mrb[6].mxu1  ;;  %v2859_v12 = vld [vmem:[%s3635_s3 + $0x170] sm:$0xff]  }
  0xef   : > { %2664 = vmatprep.subr.bf16.mxu0 %v2839_v8  ;;  %v731_v21 = vpop.f32.mrb[7].mxu0  ;;  %2686 = vmatprep.subr.bf16.mxu1 %v2840_v10  ;;  %v772_v26 = vpop.f32.mrb[7].mxu1  ;;  %v2858_v10 = vld [vmem:[%s3635_s3 + $0x1a8] sm:$0xff]   ;;  %v405_v16 = vrot.slane %v3293_v18, %v372_v41  ;;  %v2862_v41 = vld [vmem:[%s3635_s3 + $0x1b0] sm:$0xff]  }
  0xf0   : > { %v943_v25 = vmax.f32 %v729_v15, 0.0  ;;  %v945_v27 = vmax.f32 %v770_v22, 0.0  ;;  %v768_v21 = vadd.f32 %v3285_v13, %v393_v6  ;;  %v2861_v22 = vld [vmem:[%s3635_s3 + $0x130] sm:$0xff]   ;;  %v2865_v26 = vld [vmem:[%s3635_s3 + $0x138] sm:$0xff]   ;;  %v421_v6 = vrot.slane %v3293_v18, %v388_v55 }
  0xf1   : > { %v2877_v50 = vld [vmem:[%s3635_s3 + $0x210] sm:$0xff]  }
  0xf2   : > { %2665 = vmatpush3.bf16.msra.mxu0 %v2841_v14  ;;  %v959_v30 = vpack.c.bf16 %v943_v25, %v943_v25  ;;  %2687 = vmatpush3.bf16.msra.mxu1 %v2842_v19  ;;  %v961_v34 = vpack.c.bf16 %v945_v27, %v945_v27  ;;  %v727_v19 = vadd.f32 %v3283_v11, %v385_v1  ;;  %v2863_v11 = vld [vmem:[%s3635_s3 + $0x178] sm:$0xff]   ;;  %v944_v25 = vmax.f32 %v768_v21, 0.0  ;;  %v2890_v1 = vld [vmem:[%s3635_s3 + $0x2a8] sm:$0xff]   ;;  %v2902_v21 = vld [vmem:[%s3635_s3 + $0x380] sm:$0xff]  }
  0xf3   : > { %2666 = vmatprep.subr.bf16.mxu0 %v2843_v20  ;;  %2688 = vmatprep.subr.bf16.mxu1 %v2844_v24  ;;  %v413_v20 = vrot.slane %v3293_v18, %v380_v42  ;;  %v2864_v42 = vld [vmem:[%s3635_s3 + $0x1f8] sm:$0xff]  }
  0xf4   : > { %2113 = vmatprep.mubr.bf16.mxu0 %v959_v30  ;;  %v808_v36 = vpop.f32.mrb[8].mxu0  ;;  %2153 = vmatprep.mubr.bf16.mxu1 %v961_v34  ;;  %v849_v43 = vpop.f32.mrb[8].mxu1  ;;  %v942_v23 = vmax.f32 %v727_v19, 0.0  ;;  %v2866_v27 = vld [vmem:[%s3635_s3 + $0x1b8] sm:$0xff]   ;;  %v2869_v34 = vld [vmem:[%s3635_s3 + $0x200] sm:$0xff]  }
  0xf5   : > { %v3320_v38 = vadd.f32 %v808_v36, %v401_v28  ;;  %v810_v40 = vpop.f32.mrb[9].mxu0  ;;  %v3325_v46 = vadd.f32 %v849_v43, %v409_v31  ;;  %v851_v47 = vpop.f32.mrb[9].mxu1  ;;  %v2867_v28 = vld [vmem:[%s3635_s3 + $0x240] sm:$0xff]   ;;  %v2871_v36 = vld [vmem:[%s3635_s3 + $0x248] sm:$0xff]  }
  0xf6   : > { %2667 = vmatpush3.bf16.msra.mxu0 %v2845_v29  ;;  %v812_v45 = vpop.f32.mrb[10].mxu0  ;;  %2689 = vmatpush3.bf16.msra.mxu1 %v2846_v32  ;;  %v853_v52 = vpop.f32.mrb[10].mxu1  ;;  %v811_v13 = vadd.f32 %v810_v40, %v405_v16  ;;  %v852_v24 = vadd.f32 %v851_v47, %v413_v20  ;;  %v2868_v29 = vld [vmem:[%s3635_s3 + $0x2c0] sm:$0xff]   ;;  %v958_v31 = vpack.c.bf16 %v942_v23, %v942_v23  ;;  %v2872_v40 = vld [vmem:[%s3635_s3 + $0x2c8] sm:$0xff]   ;;  %v2898_v16 = vld [vmem:[%s3635_s3 + $0x2b8] sm:$0xff]  }
  0xf7   : > { %2668 = vmatprep.subr.bf16.mxu0 %v2847_v33  ;;  %v813_v51 = vpop.f32.mrb[11].mxu0  ;;  %2690 = vmatprep.subr.bf16.mxu1 %v2848_v35  ;;  %v854_v56 = vpop.f32.mrb[11].mxu1  ;;  %v960_v33 = vpack.c.bf16 %v944_v25, %v944_v25  ;;  %v2870_v35 = vld [vmem:[%s3635_s3 + $0x280] sm:$0xff]   ;;  %v2873_v45 = vld [vmem:[%s3635_s3 + $0x208] sm:$0xff]   ;;  %v2879_v52 = vld [vmem:[%s3635_s3 + $0x258] sm:$0xff]  }
  0xf8   : > { %v947_v30 = vmax.f32 %v811_v13, 0.0  ;;  %v949_v32 = vmax.f32 %v852_v24, 0.0  ;;  %v2874_v47 = vld [vmem:[%s3635_s3 + $0x288] sm:$0xff]   ;;  %v2878_v51 = vld [vmem:[%s3635_s3 + $0x290] sm:$0xff]   ;;  %v2882_v56 = vld [vmem:[%s3635_s3 + $0x298] sm:$0xff]  }
  0xf9   : > { %v2901_v20 = vld [vmem:[%s3635_s3 + $0x300] sm:$0xff]   ;;  %v2905_v13 = vld [vmem:[%s3635_s3 + $0x308] sm:$0xff]   ;;  %v2907_v24 = vld [vmem:[%s3635_s3 + $0x350] sm:$0xff]  }
  0xfa   : > { %2669 = vmatpush3.bf16.msra.mxu0 %v2849_v44  ;;  %2691 = vmatpush3.bf16.msra.mxu1 %v2850_v48  ;;  %v963_v43 = vpack.c.bf16 %v947_v30, %v947_v30  ;;  %v965_v44 = vpack.c.bf16 %v949_v32, %v949_v32  ;;  %v2875_v48 = vld [vmem:[%s3635_s3 + $0x250] sm:$0xff]   ;;  %v2906_v23 = vld [vmem:[%s3635_s3 + $0x388] sm:$0xff]   ;;  %v2913_v30 = vld [vmem:[%s3635_s3 + $0x318] sm:$0xff]  }
  0xfb   : > { %2670 = vmatprep.subr.bf16.mxu0 %v2851_v49  ;;  %2692 = vmatprep.subr.bf16.mxu1 %v2852_v53  ;;  %v2876_v49 = vld [vmem:[%s3635_s3 + $0x2d0] sm:$0xff]   ;;  %v2880_v53 = vld [vmem:[%s3635_s3 + $0x2d8] sm:$0xff]   ;;  %v2915_v32 = vld [vmem:[%s3635_s3 + $0x360] sm:$0xff]  }
  0xfc   : > { %v890_v0 = vpop.f32.mrb[12].mxu0  ;;  %v931_v4 = vpop.f32.mrb[12].mxu1  ;;  %v2908_v25 = vld [vmem:[%s3635_s3 + $0x3d0] sm:$0xff]  }
  0xfd   : > { %v3353_v2 = vadd.f32 %v890_v0, %v417_v57  ;;  %v3355_v3 = vpop.f32.mrb[13].mxu0  ;;  %v3361_v8 = vadd.f32 %v931_v4, %v425_v59  ;;  %v3363_v9 = vpop.f32.mrb[13].mxu1  ;;  %v2883_v57 = vld [vmem:[%s3635_s3 + $0x260] sm:$0xff]   ;;  %v2889_v0 = vld [vmem:[%s3635_s3 + $0x228] sm:$0xff]   ;;  %v2891_v4 = vld [vmem:[%s3635_s3 + $0x270] sm:$0xff]  }
  0xfe   : > { %2671 = vmatpush3.bf16.msra.mxu0 %v2853_v58  ;;  %v894_v7 = vpop.f32.mrb[14].mxu0  ;;  %2693 = vmatpush3.bf16.msra.mxu1 %v2854_v61  ;;  %v935_v15 = vpop.f32.mrb[14].mxu1  ;;  %v2884_v58 = vld [vmem:[%s3635_s3 + $0x2e0] sm:$0xff]   ;;  %v893_v55 = vadd.f32 %v3355_v3, %v421_v6 }
  0xff   : > { %2672 = vmatprep.subr.bf16.mxu0 %v2855_v62  ;;  %v895_v14 = vpop.f32.mrb[15].mxu0  ;;  %2694 = vmatprep.subr.bf16.mxu1 %v2856_v63  ;;  %v936_v17 = vpop.f32.mrb[15].mxu1  ;;  %v2885_v59 = vld [vmem:[%s3635_s3 + $0x220] sm:$0xff]   ;;  %v2887_v62 = vld [vmem:[%s3635_s3 + $0x268] sm:$0xff]   ;;  %v429_v7 = vrot.slane %v3293_v18, %v396_v60  ;;  %v946_v60 = vmax.f32 %v3320_v38, 0.0  ;;  %v948_v15 = vmax.f32 %v3325_v46, 0.0 }
 0x100   : > { %v2886_v61 = vld [vmem:[%s3635_s3 + $0x2a0] sm:$0xff]   ;;  %v2888_v63 = vld [vmem:[%s3635_s3 + $0x2e8] sm:$0xff]   ;;  %v2895_v14 = vld [vmem:[%s3635_s3 + $0x278] sm:$0xff]   ;;  %v951_v46 = vmax.f32 %v893_v55, 0.0 }
 0x101   : > { %v934_v18 = vadd.f32 %v3363_v9, %v429_v7  ;;  %v2899_v3 = vld [vmem:[%s3635_s3 + $0x340] sm:$0xff]   ;;  %v962_v9 = vpack.c.bf16 %v946_v60, %v946_v60  ;;  %v964_v19 = vpack.c.bf16 %v948_v15, %v948_v15 }
 0x102   : > { %2673 = vmatpush3.bf16.msra.mxu0 %v2857_v5  ;;  %2695 = vmatpush3.bf16.msra.mxu1 %v2858_v10  ;;  %v2892_v5 = vld [vmem:[%s3635_s3 + $0x2f0] sm:$0xff]   ;;  %v2900_v38 = vld [vmem:[%s3635_s3 + $0x3c0] sm:$0xff]  }
 0x103   : > { %2674 = vmatprep.subr.bf16.mxu0 %v2859_v12  ;;  %2696 = vmatprep.subr.bf16.mxu1 %v2860_v39  ;;  %v2893_v10 = vld [vmem:[%s3635_s3 + $0x230] sm:$0xff]   ;;  %v2897_v39 = vld [vmem:[%s3635_s3 + $0x238] sm:$0xff]   ;;  %v953_v17 = vmax.f32 %v934_v18, 0.0 }
 0x104   : > { %v2894_v12 = vld [vmem:[%s3635_s3 + $0x2b0] sm:$0xff]  }
 0x106   : > { %2675 = vmatpush3.bf16.msra.mxu0 %v2861_v22  ;;  %2697 = vmatpush3.bf16.msra.mxu1 %v2862_v41  ;;  %v2903_v22 = vld [vmem:[%s3635_s3 + $0x348] sm:$0xff]  }
 0x107   : > { %2676 = vmatprep.subr.bf16.mxu0 %v2863_v11  ;;  %2698 = vmatprep.subr.bf16.mxu1 %v2864_v42  ;;  %v2904_v41 = vld [vmem:[%s3635_s3 + $0x3c8] sm:$0xff]   ;;  %v967_v11 = vpack.c.bf16 %v951_v46, %v951_v46  ;;  %v969_v42 = vpack.c.bf16 %v953_v17, %v953_v17 }
 0x10a   : > { %2677 = vmatpush3.bf16.msra.mxu0 %v2865_v26  ;;  %2699 = vmatpush3.bf16.msra.mxu1 %v2866_v27  ;;  %v2909_v26 = vld [vmem:[%s3635_s3 + $0x310] sm:$0xff]  }
 0x10b   : > { %2706 = vmatprep.subr.bf16.mxu0 %v2867_v28  ;;  %2728 = vmatprep.subr.bf16.mxu1 %v2868_v29  ;;  %v2910_v27 = vld [vmem:[%s3635_s3 + $0x390] sm:$0xff]   ;;  %v2911_v28 = vld [vmem:[%s3635_s3 + $0x358] sm:$0xff]  }
 0x10c   : > { %v2912_v29 = vld [vmem:[%s3635_s3 + $0x3d8] sm:$0xff]  }
 0x10d   : > { %2114 = vmatmul.mubr.bf16.vlgmr.msra.gmra.mrb[20].mxu0 %v958_v31  ;;  %2154 = vmatmul.mubr.bf16.vlgmr.msra.gmra.mrb[20].mxu1 %v960_v33  ;;  %v2914_v31 = vld [vmem:[%s3635_s3 + $0x398] sm:$0xff]   ;;  %v2916_v33 = vld [vmem:[%s3635_s3 + $0x3e0] sm:$0xff]  }
 0x10e   : > { %2707 = vmatpush3.bf16.msra.mxu0 %v2869_v34  ;;  %2729 = vmatpush3.bf16.msra.mxu1 %v2870_v35  ;;  %v2917_v34 = vld [vmem:[%s3635_s3 + $0x320] sm:$0xff]  }
 0x10f   : > { %2708 = vmatprep.subr.bf16.mxu0 %v2871_v36  ;;  %2730 = vmatprep.subr.bf16.mxu1 %v2872_v40  ;;  %v2918_v35 = vld [vmem:[%s3635_s3 + $0x3a0] sm:$0xff]   ;;  %v2919_v36 = vld [vmem:[%s3635_s3 + $0x368] sm:$0xff]  }
 0x110   : > { %2193 = vmatprep.mubr.bf16.mxu0 %v963_v43  ;;  %2233 = vmatprep.mubr.bf16.mxu1 %v965_v44  ;;  %v2920_v40 = vld [vmem:[%s3635_s3 + $0x3e8] sm:$0xff]  }
 0x111   : > { %v2921_v43 = vld [vmem:[%s3635_s3 + $0x328] sm:$0xff]  }
 0x112   : > { %2709 = vmatpush3.bf16.msra.mxu0 %v2873_v45  ;;  %2731 = vmatpush3.bf16.msra.mxu1 %v2874_v47  ;;  %v2922_v44 = vld [vmem:[%s3635_s3 + $0x3a8] sm:$0xff]   ;;  %v2923_v45 = vld [vmem:[%s3635_s3 + $0x370] sm:$0xff]  }
 0x113   : > { %2710 = vmatprep.subr.bf16.mxu0 %v2875_v48  ;;  %2732 = vmatprep.subr.bf16.mxu1 %v2876_v49  ;;  %v2924_v47 = vld [vmem:[%s3635_s3 + $0x3f0] sm:$0xff]  }
 0x114   : > { %v2925_v48 = vld [vmem:[%s3635_s3 + $0x330] sm:$0xff]  }
 0x115   : > { %v2926_v49 = vld [vmem:[%s3635_s3 + $0x3b0] sm:$0xff]  }
 0x116   : > { %2711 = vmatpush3.bf16.msra.mxu0 %v2877_v50  ;;  %2733 = vmatpush3.bf16.msra.mxu1 %v2878_v51  ;;  %v2927_v50 = vld [vmem:[%s3635_s3 + $0x378] sm:$0xff]  }
 0x117   : > { %2712 = vmatprep.subr.bf16.mxu0 %v2879_v52  ;;  %2734 = vmatprep.subr.bf16.mxu1 %v2880_v53  ;;  %v2928_v51 = vld [vmem:[%s3635_s3 + $0x3f8] sm:$0xff]   ;;  %v952_v52 = vmax.f32 %v3361_v8, 0.0 }
 0x118   : > { %v2929_v53 = vld [vmem:[%s3635_s3 + $0x338] sm:$0xff]  }
 0x11a   : > { %2713 = vmatpush3.bf16.msra.mxu0 %v2881_v54  ;;  %2735 = vmatpush3.bf16.msra.mxu1 %v2882_v56  ;;  %v950_v54 = vmax.f32 %v3353_v2, 0.0  ;;  %v2930_v56 = vld [vmem:[%s3635_s3 + $0x3b8] sm:$0xff]  }
 0x11b   : > { %2714 = vmatprep.subr.bf16.mxu0 %v2883_v57  ;;  %2736 = vmatprep.subr.bf16.mxu1 %v2884_v58  ;;  %v968_v57 = vpack.c.bf16 %v952_v52, %v952_v52 }
 0x11c   : > { %v966_v58 = vpack.c.bf16 %v950_v54, %v950_v54 }
 0x11e   : > { %2715 = vmatpush3.bf16.msra.mxu0 %v2885_v59  ;;  %2737 = vmatpush3.bf16.msra.mxu1 %v2886_v61  ;;  %v2483_v61 = vld [vmem:[%s3636_s4] ss:$0 sm:$0xff] }
 0x11f   : > { %2716 = vmatprep.subr.bf16.mxu0 %v2887_v62  ;;  %2738 = vmatprep.subr.bf16.mxu1 %v2888_v63 }
 0x122   : > { %2717 = vmatpush3.bf16.msra.mxu0 %v2889_v0  ;;  %2739 = vmatpush3.bf16.msra.mxu1 %v2890_v1 }
 0x123   : > { %2718 = vmatprep.subr.bf16.mxu0 %v2891_v4  ;;  %2740 = vmatprep.subr.bf16.mxu1 %v2892_v5 }
 0x126   : > { %2719 = vmatpush3.bf16.msra.mxu0 %v2893_v10  ;;  %2741 = vmatpush3.bf16.msra.mxu1 %v2894_v12 }
 0x127   : > { %2720 = vmatprep.subr.bf16.mxu0 %v2895_v14  ;;  %2742 = vmatprep.subr.bf16.mxu1 %v2896_v37 }
 0x12a   : > { %2721 = vmatpush3.bf16.msra.mxu0 %v2897_v39  ;;  %2743 = vmatpush3.bf16.msra.mxu1 %v2898_v16 }
 0x12b   : > { %2750 = vmatprep.subr.bf16.mxu0 %v2899_v3  ;;  %2772 = vmatprep.subr.bf16.mxu1 %v2900_v38 }
 0x12d   : > { %2194 = vmatmul.mubr.bf16.vlgmr.msra.gmra.mrb[24].mxu0 %v962_v9  ;;  %2234 = vmatmul.mubr.bf16.vlgmr.msra.gmra.mrb[24].mxu1 %v964_v19 }
 0x12e   : > { %2751 = vmatpush3.bf16.msra.mxu0 %v2901_v20  ;;  %2773 = vmatpush3.bf16.msra.mxu1 %v2902_v21 }
 0x12f   : > { %2752 = vmatprep.subr.bf16.mxu0 %v2903_v22  ;;  %2774 = vmatprep.subr.bf16.mxu1 %v2904_v41 }
 0x130   : > { %2273 = vmatprep.mubr.bf16.mxu0 %v967_v11  ;;  %2313 = vmatprep.mubr.bf16.mxu1 %v969_v42 }
 0x132   : > { %2753 = vmatpush3.bf16.msra.mxu0 %v2905_v13  ;;  %2775 = vmatpush3.bf16.msra.mxu1 %v2906_v23 }
 0x133   : > { %2754 = vmatprep.subr.bf16.mxu0 %v2907_v24  ;;  %2776 = vmatprep.subr.bf16.mxu1 %v2908_v25 }
 0x136   : > { %2755 = vmatpush3.bf16.msra.mxu0 %v2909_v26  ;;  %2777 = vmatpush3.bf16.msra.mxu1 %v2910_v27 }
 0x137   : > { %2756 = vmatprep.subr.bf16.mxu0 %v2911_v28  ;;  %2778 = vmatprep.subr.bf16.mxu1 %v2912_v29 }
 0x13a   : > { %2757 = vmatpush3.bf16.msra.mxu0 %v2913_v30  ;;  %2779 = vmatpush3.bf16.msra.mxu1 %v2914_v31 }
 0x13b   : > { %2758 = vmatprep.subr.bf16.mxu0 %v2915_v32  ;;  %2780 = vmatprep.subr.bf16.mxu1 %v2916_v33 }
 0x13e   : > { %2759 = vmatpush3.bf16.msra.mxu0 %v2917_v34  ;;  %2781 = vmatpush3.bf16.msra.mxu1 %v2918_v35 }
 0x13f   : > { %2760 = vmatprep.subr.bf16.mxu0 %v2919_v36  ;;  %2782 = vmatprep.subr.bf16.mxu1 %v2920_v40  ;;  %v2935_v36 = vld [vmem:[%s3053_s20] sm:$0xf] }
 0x140   : > { %v2321_v40 = vunpack.c.l.bf16 %v2935_v36 }
 0x142   : > { %2761 = vmatpush3.bf16.msra.mxu0 %v2921_v43  ;;  %2783 = vmatpush3.bf16.msra.mxu1 %v2922_v44 }
 0x143   : > { %2762 = vmatprep.subr.bf16.mxu0 %v2923_v45  ;;  %2784 = vmatprep.subr.bf16.mxu1 %v2924_v47 }
 0x146   : > { %2763 = vmatpush3.bf16.msra.mxu0 %v2925_v48  ;;  %2785 = vmatpush3.bf16.msra.mxu1 %v2926_v49 }
 0x147   : > { %2764 = vmatprep.subr.bf16.mxu0 %v2927_v50  ;;  %2786 = vmatprep.subr.bf16.mxu1 %v2928_v51 }
 0x14a   : > { %2765 = vmatpush3.bf16.msra.mxu0 %v2929_v53  ;;  %2787 = vmatpush3.bf16.msra.mxu1 %v2930_v56 }
 0x14d   : > { %2274 = vmatmul.mubr.bf16.vlgmr.msra.gmra.mrb[28].mxu0 %v966_v58  ;;  %2314 = vmatmul.mubr.bf16.vlgmr.msra.gmra.mrb[28].mxu1 %v968_v57  ;;  %v2612_v57 = vld [vmem:[%s3637_s5] ss:$0 sm:$0xff] }
 0x1c0   : > { %v2634_v8 = vpop.f32.mrb[16].mxu0  ;;  %v2656_v59 = vpop.f32.mrb[16].mxu1 }
 0x1c1   : > { %v2635_v2 = vpop.f32.mrb[17].mxu0  ;;  %v2657_v63 = vpop.f32.mrb[17].mxu1 }
 0x1c2   : > { %v2636_v62 = vadd.f32 %v2635_v2, %v2634_v8  ;;  %v2637_v0 = vpop.f32.mrb[18].mxu0  ;;  %v2658_v1 = vadd.f32 %v2657_v63, %v2656_v59  ;;  %v2659_v4 = vpop.f32.mrb[18].mxu1  ;;  %v2613_v8 = vld [vmem:[%s3638_s6] ss:$0 sm:$0xff] }
 0x1c3   : > { %v2638_v5 = vpop.f32.mrb[19].mxu0  ;;  %v2660_v7 = vpop.f32.mrb[19].mxu1 }
 0x1c4   : > { %v2036_v6 = vadd.f32 %v2636_v62, %v2483_v61 }
 0x1c6   : > { %v2076_v10 = vadd.f32 %v2658_v1, %v2036_v6 }
 0x1e0   : > { %v2678_v12 = vpop.f32.mrb[20].mxu0  ;;  %v2700_v14 = vpop.f32.mrb[20].mxu1 }
 0x1e1   : > { %v2679_v37 = vpop.f32.mrb[21].mxu0  ;;  %v2701_v60 = vpop.f32.mrb[21].mxu1 }
 0x1e2   : > { %v2680_v55 = vadd.f32 %v2679_v37, %v2678_v12  ;;  %v2681_v18 = vpop.f32.mrb[22].mxu0  ;;  %v2702_v15 = vadd.f32 %v2701_v60, %v2700_v14  ;;  %v2703_v39 = vpop.f32.mrb[22].mxu1  ;;  %v2614_v12 = vld [vmem:[%s3639_s7] ss:$0 sm:$0xff] }
 0x1e3   : > { %v2682_v16 = vpop.f32.mrb[23].mxu0  ;;  %v2704_v38 = vpop.f32.mrb[23].mxu1  ;;  %v2615_v37 = vld [vmem:[%s3640_s8] ss:$0 sm:$0xff] }
 0x1e4   : > { %v2116_v3 = vadd.f32 %v2680_v55, %v2076_v10 }
 0x1e6   : > { %v2156_v46 = vadd.f32 %v2702_v15, %v2116_v3 }
 0x200   : > { %v2722_v9 = vpop.f32.mrb[24].mxu0  ;;  %v2744_v17 = vpop.f32.mrb[24].mxu1 }
 0x201   : > { %v2723_v19 = vpop.f32.mrb[25].mxu0  ;;  %v2745_v21 = vpop.f32.mrb[25].mxu1 }
 0x202   : > { %v2724_v20 = vadd.f32 %v2723_v19, %v2722_v9  ;;  %v2725_v22 = vpop.f32.mrb[26].mxu0  ;;  %v2746_v41 = vadd.f32 %v2745_v21, %v2744_v17  ;;  %v2747_v11 = vpop.f32.mrb[26].mxu1 }
 0x203   : > { %v2726_v42 = vpop.f32.mrb[27].mxu0  ;;  %v2748_v23 = vpop.f32.mrb[27].mxu1 }
 0x204   : > { %v2196_v13 = vadd.f32 %v2724_v20, %v2156_v46 }
 0x206   : > { %v2236_v24 = vadd.f32 %v2746_v41, %v2196_v13 }
 0x220   : > { %v2766_v25 = vpop.f32.mrb[28].mxu0  ;;  %v2788_v26 = vpop.f32.mrb[28].mxu1 }
 0x221   : > { %v2767_v27 = vpop.f32.mrb[29].mxu0  ;;  %v2789_v29 = vpop.f32.mrb[29].mxu1 }
 0x222   : > { %v2768_v28 = vadd.f32 %v2767_v27, %v2766_v25  ;;  %v2769_v30 = vpop.f32.mrb[30].mxu0  ;;  %v2790_v31 = vadd.f32 %v2789_v29, %v2788_v26  ;;  %v2791_v32 = vpop.f32.mrb[30].mxu1 }
 0x223   : > { %v2770_v33 = vpop.f32.mrb[31].mxu0  ;;  %v2792_v35 = vpop.f32.mrb[31].mxu1 }
 0x224   : > { %v2276_v34 = vadd.f32 %v2768_v28, %v2236_v24 }
 0x226   : > { %v2316_v43 = vadd.f32 %v2790_v31, %v2276_v34 }
 0x228   : > { %v2322_v44 = vadd.f32 %v2321_v40, %v2316_v43 }
 0x22a   : > { %v2325_v45 = vsel %vm606_vm0, %v2322_v44, 0.0 }
 0x22b   : > { %2326 = vadd.xlane.f32.xlu0 %v2325_v45 }
 0x2b8   : > { %v2327_v47 = vpop.xlane.xlu0 %2326 }
 0x2b9   : > { %v2329_v48 = vmul.f32 0.03125, %v2327_v47 }
 0x2bb   : > { %v2330_v49 = vsub.f32 %v2322_v44, %v2329_v48 }
 0x2bd   : > { %v2331_v50 = vmul.f32 %v2330_v49, %v2330_v49 }
 0x2bf   : > { %v2332_v51 = vsel %vm606_vm0, %v2331_v50, 0.0 }
 0x2c0   : > { %2333 = vadd.xlane.f32.xlu0 %v2332_v51 }
 0x34d   : > { %v2334_v52 = vpop.xlane.xlu0 %2333 }
 0x34e   : > { %v2335_v53 = vmul.f32 0.03125, %v2334_v52 }
 0x350   : > { %v2336_v54 = vadd.f32 1e-05, %v2335_v53 }
 0x352   : > { %2931 = vrsqrt.f32 %v2336_v54 }
 0x35c   : > { %v2932_v56 = vpop.eup %2931 }
 0x35d   : > { %v2338_v58 = vmul.f32 %v2932_v56, %v2330_v49 }
 0x35f   : > { %v2345_v59 = vmul.f32 %v2612_v57, %v2338_v58 }
 0x361   : > { %v2352_v61 = vadd.f32 %v2613_v8, %v2345_v59 }
 0x363   : > { %v2355_v2 = vsel %vm606_vm0, %v2352_v61, 0.0 }
 0x364   : > { %2356 = vadd.xlane.f32.xlu1 %v2355_v2 }
 0x3f1   : > { %v2357_v62 = vpop.xlane.xlu1 %2356 }
 0x3f2   : > { %v2358_v63 = vmul.f32 0.03125, %v2357_v62 }
 0x3f4   : > { %v2359_v0 = vsub.f32 %v2352_v61, %v2358_v63 }
 0x3f6   : > { %v2360_v1 = vmul.f32 %v2359_v0, %v2359_v0 }
 0x3f8   : > { %v2361_v4 = vsel %vm606_vm0, %v2360_v1, 0.0 }
 0x3f9   : > { %2362 = vadd.xlane.f32.xlu1 %v2361_v4 }
 0x486   : > { %v2363_v5 = vpop.xlane.xlu1 %2362 }
 0x487   : > { %v2364_v6 = vmul.f32 0.03125, %v2363_v5 }
 0x489   : > { %v2365_v7 = vadd.f32 1e-05, %v2364_v6 }
 0x48b   : > { %2933 = vrsqrt.f32 %v2365_v7 }
 0x495   : > { %v2934_v10 = vpop.eup %2933 }
 0x496   : > { %v2367_v14 = vmul.f32 %v2934_v10, %v2359_v0 }
 0x498   : > { %v2374_v55 = vmul.f32 %v2614_v12, %v2367_v14 }
 0x49a   : > { %v2381_v60 = vadd.f32 %v2615_v37, %v2374_v55 }
 0x49c   : > { %2382 = vst.msk [vmem:[%s327_s27] sm:$0xff] %vm606_vm0, %v2381_v60 }
 0x49d PF: > { %s19_s30 = sadd.s32 1, %s2942_s30  }
 0x49e   : > { %p16_p4 = scmp.ge.s32.totalorder %s19_s30, 4  }
 0x4a0   :  { %18 = sbr.rel (!%p16_p4) target bundleno = 1 (0x1), region = 86 }

</bundles_post_ra>
